<compile_context>
chip_gen: v7x
topology: tpu7x:2x2x1
jax: 0.10.0
libtpu: 0.0.40
codegen_flags: <defaults>
</compile_context>

<pallas_src>
import jax
import jax.numpy as jnp
from jax import lax
from jax.experimental import pallas as pl
from jax.experimental.pallas import tpu as pltpu


def rnn_encoder_kernel(emb_ref, len_ref, wm_ref, bm_ref, wih_ref, whh_ref,
                       bg_ref, out_ref, hid_ref, embv_ref,
                       h_scr, c_scr, gx_scr, v_scr):
    Bp = len_ref.shape[0]                 # padded batch (sublane multiple)
    M = emb_ref.shape[0]                  # T_BLK * Bp rows in this time block
    T_BLK = M // Bp
    H = hid_ref.shape[-1]

    t0 = pl.program_id(0) * T_BLK

    @pl.when(pl.program_id(0) == 0)
    def _():
        h_scr[...] = jnp.zeros_like(h_scr)
        c_scr[...] = jnp.zeros_like(c_scr)

    # ---- Hoisted, time-independent projections (one big matmul each) --------
    x = emb_ref[...]                                                  # (M, E) bf16
    v = jnp.dot(x, wm_ref[...], preferred_element_type=jnp.float32) + bm_ref[...]
    v = jnp.maximum(v, 0.0)                                           # (M, V) f32
    v_scr[...] = v

    gx = jnp.dot(v.astype(jnp.bfloat16), wih_ref[...],
                 preferred_element_type=jnp.float32) + bg_ref[...]    # (M, 4H) f32
    gx_scr[...] = gx

    lens = len_ref[...]                                               # (Bp, 1) i32
    whh = whh_ref[...]                                                # (H, 4H) bf16

    # ---- Serial recurrence: only one (Bp,H)@(H,4H) matmul per timestep ------
    def step(tl, carry):
        t_glob = t0 + tl
        row0 = pl.multiple_of(tl * Bp, Bp)
        m = (lens > t_glob).astype(jnp.float32)                       # (Bp, 1)

        h = h_scr[...]
        c = c_scr[...]
        gates = gx_scr[pl.ds(row0, Bp), :] + jnp.dot(
            h.astype(jnp.bfloat16), whh, preferred_element_type=jnp.float32)

        # PyTorch LSTM gate order: input, forget, cell, output (f32 epilogue).
        i_g = jax.nn.sigmoid(gates[:, 0 * H:1 * H])
        f_g = jax.nn.sigmoid(gates[:, 1 * H:2 * H])
        g_g = jnp.tanh(gates[:, 2 * H:3 * H])
        o_g = jax.nn.sigmoid(gates[:, 3 * H:4 * H])

        c_new = f_g * c + i_g * g_g
        h_new = o_g * jnp.tanh(c_new)

        # pack/pad_packed semantics: freeze state, zero outputs past lengths.
        c_scr[...] = m * c_new + (1.0 - m) * c
        h_scr[...] = m * h_new + (1.0 - m) * h
        out_ref[pl.ds(row0, Bp), :] = (m * h_new).astype(out_ref.dtype)
        embv_ref[pl.ds(row0, Bp), :] = (
            m * v_scr[pl.ds(row0, Bp), :]).astype(embv_ref.dtype)
        return carry

    lax.fori_loop(0, T_BLK, step, 0, unroll=True)

    # hidden = h at each sequence's last valid timestep (== final masked carry).
    hid_ref[...] = h_scr[...].astype(hid_ref.dtype)


def _pick_t_block(L, cap=32):
    if L <= cap:
        return L
    for t in range(cap, 0, -1):
        if L % t == 0:
            return t
    return 1


def rnn_encoder(input_labels, params):
    """Returns (output, hidden, embedded) like RNNEncoder.forward (eval mode)."""
    B, L = input_labels.shape

    # --- glue: embedding lookups + lengths (eval mode: dropout == identity) ---
    emb1 = jnp.take(params["emb1"], input_labels, axis=0)
    emb2 = jnp.take(params["emb2"], input_labels, axis=0)
    emb = jnp.concatenate([emb1, emb2], axis=-1)                       # (B, L, E)
    lengths = jnp.sum((input_labels != 0).astype(jnp.int32), axis=1)   # (B,)

    E = emb.shape[-1]
    V = params["w_mlp"].shape[0]          # word_vec_size
    H = params["w_hh"].shape[1]           # hidden_size

    # --- pad batch to a sublane multiple; padded rows get length 0 ------------
    Bp = max(8, ((B + 7) // 8) * 8)
    pad = Bp - B
    emb_t = jnp.transpose(emb, (1, 0, 2))                              # (L, B, E)
    if pad:
        emb_t = jnp.pad(emb_t, ((0, 0), (0, pad), (0, 0)))
        lengths_p = jnp.pad(lengths, (0, pad))
    else:
        lengths_p = lengths
    emb_rows = emb_t.reshape(L * Bp, E).astype(jnp.bfloat16)           # time-major rows
    len_col = lengths_p.reshape(Bp, 1).astype(jnp.int32)

    # --- weights: (in, out) layout, bf16 MXU operands, fused LSTM bias --------
    wm = params["w_mlp"].T.astype(jnp.bfloat16)                        # (E, V)
    bm = params["b_mlp"].reshape(1, V).astype(jnp.float32)
    wih = params["w_ih"].T.astype(jnp.bfloat16)                        # (V, 4H)
    whh = params["w_hh"].T.astype(jnp.bfloat16)                        # (H, 4H)
    bg = (params["b_ih"] + params["b_hh"]).reshape(1, 4 * H).astype(jnp.float32)

    T_BLK = _pick_t_block(L)
    n_blk = L // T_BLK
    M_BLK = T_BLK * Bp

    rows_spec = lambda n: pl.BlockSpec((M_BLK, n), lambda i: (i, 0))
    const_spec = lambda shape: pl.BlockSpec(shape, lambda i: (0, 0))

    out_rows, hidden_p, embv_rows = pl.pallas_call(
        rnn_encoder_kernel,
        out_shape=(
            jax.ShapeDtypeStruct((L * Bp, H), jnp.float32),   # LSTM output rows
            jax.ShapeDtypeStruct((Bp, H), jnp.float32),       # final hidden
            jax.ShapeDtypeStruct((L * Bp, V), jnp.float32),   # masked MLP output
        ),
        grid_spec=pltpu.PrefetchScalarGridSpec(
            num_scalar_prefetch=0,
            grid=(n_blk,),
            in_specs=[
                rows_spec(E),                # embedded rows for this time block
                const_spec((Bp, 1)),         # lengths (replaces per-step mask DMA)
                const_spec((E, V)),          # mlp weight
                const_spec((1, V)),          # mlp bias
                const_spec((V, 4 * H)),      # W_ih^T
                const_spec((H, 4 * H)),      # W_hh^T
                const_spec((1, 4 * H)),      # b_ih + b_hh
            ],
            out_specs=[
                rows_spec(H),
                const_spec((Bp, H)),         # resident across the time axis
                rows_spec(V),
            ],
            scratch_shapes=[
                pltpu.VMEM((Bp, H), jnp.float32),          # h carry
                pltpu.VMEM((Bp, H), jnp.float32),          # c carry
                pltpu.VMEM((M_BLK, 4 * H), jnp.float32),   # hoisted x-gates Gx
                pltpu.VMEM((M_BLK, V), jnp.float32),       # hoisted MLP output v
            ],
        ),
        # time axis is a true recurrence -> sequential
        compiler_params=pltpu.CompilerParams(
            dimension_semantics=("arbitrary",)),
    )(emb_rows, len_col, wm, bm, wih, whh, bg)

    out_t = out_rows.reshape(L, Bp, H)
    embv_t = embv_rows.reshape(L, Bp, V)
    # TODO(synk): if downstream can consume time-major tensors, these two
    # transposes (full HBM passes at scale) can be dropped.
    output = jnp.transpose(out_t, (1, 0, 2))[:B]      # (B, L, H)
    embedded = jnp.transpose(embv_t, (1, 0, 2))[:B]   # (B, L, V)
    hidden = hidden_p[:B]                             # (B, H)
    return output, hidden, embedded


def reference(input_labels, params):
    """Pure-JAX f32 reference reproducing the PyTorch forward (eval mode)."""
    emb1 = jnp.take(params["emb1"], input_labels, axis=0)
    emb2 = jnp.take(params["emb2"], input_labels, axis=0)
    emb = jnp.concatenate([emb1, emb2], axis=-1)                       # (B, L, E)
    lengths = jnp.sum((input_labels != 0).astype(jnp.int32), axis=1)

    v = jax.nn.relu(emb @ params["w_mlp"].T + params["b_mlp"])         # (B, L, V)
    B, L, _ = v.shape
    H = params["w_hh"].shape[1]
    mask = (jnp.arange(L)[None, :] < lengths[:, None]).astype(jnp.float32)  # (B, L)

    def step(carry, xt):
        h, c = carry
        x_t, m_t = xt                                                  # (B,V),(B,1)
        gates = (x_t @ params["w_ih"].T + params["b_ih"]
                 + h @ params["w_hh"].T + params["b_hh"])
        i, f, g, o = jnp.split(gates, 4, axis=-1)
        i, f, g, o = jax.nn.sigmoid(i), jax.nn.sigmoid(f), jnp.tanh(g), jax.nn.sigmoid(o)
        c_new = f * c + i * g
        h_new = o * jnp.tanh(c_new)
        c = m_t * c_new + (1.0 - m_t) * c
        h = m_t * h_new + (1.0 - m_t) * h
        return (h, c), m_t * h_new

    h0 = jnp.zeros((B, H), jnp.float32)
    c0 = jnp.zeros((B, H), jnp.float32)
    (h_fin, _), outs = jax.lax.scan(
        step, (h0, c0),
        (jnp.transpose(v, (1, 0, 2)), jnp.transpose(mask)[..., None]))
    output = jnp.transpose(outs, (1, 0, 2))                            # (B, L, H)
    embedded = v * mask[..., None]                                     # (B, L, V)
    return output, h_fin, embedded


def init_params(key, vocab, E, V, H):
    ks = jax.random.split(key, 8)
    s = 0.1
    return {
        "emb1": 0.5 * jax.random.normal(ks[0], (vocab, E - 300), jnp.float32),
        "emb2": 0.5 * jax.random.normal(ks[1], (vocab, 300), jnp.float32),  # dict_emb
        "w_mlp": s * jax.random.normal(ks[2], (V, E), jnp.float32),
        "b_mlp": s * jax.random.normal(ks[3], (V,), jnp.float32),
        "w_ih": s * jax.random.normal(ks[4], (4 * H, V), jnp.float32),
        "b_ih": s * jax.random.normal(ks[5], (4 * H,), jnp.float32),
        "w_hh": s * jax.random.normal(ks[6], (4 * H, H), jnp.float32),
        "b_hh": s * jax.random.normal(ks[7], (4 * H,), jnp.float32),
    }


if __name__ == "__main__":
    key = jax.random.PRNGKey(0)
    k_p, k_l = jax.random.split(key)

    # Small shapes implied by the module: batch=2, seq=8,
    # word_embedding_size=320 (=> embedding1 dim 20, embedding2 dim 300),
    # word_vec_size=128, hidden_size=128, vocab=50.
    B, L = 2, 8
    vocab, E, V, H = 50, 320, 128, 128
    params = init_params(k_p, vocab, E, V, H)

    # Variable-length labels: nonzero ids followed by 0-padding; one sequence
    # is full length (the module asserts max(lengths) == seq_len).
    labels = jax.random.randint(k_l, (B, L), 1, vocab)
    lengths = jnp.array([L, 5])
    labels = jnp.where(jnp.arange(L)[None, :] < lengths[:, None], labels, 0)

    # TODO(synk): training-mode dropout (input_dropout_p / dropout_p) and the
    # bidirectional / multi-layer RNN configurations are not implemented;
    # this covers the default eval-mode single-layer unidirectional LSTM.
    output, hidden, embedded = rnn_encoder(labels, params)
    output = jax.block_until_ready(output)
    hidden = jax.block_until_ready(hidden)
    embedded = jax.block_until_ready(embedded)

    ro, rh, re = reference(labels, params)
    assert output.shape == (B, L, H)
    assert hidden.shape == (B, H)
    assert embedded.shape == (B, L, V)
    # bf16 matmul operands (f32 accumulation) => relaxed tolerance vs f32 reference.
    tol = 4e-2
    assert jnp.max(jnp.abs(output - ro)) < tol, "output mismatch vs reference"
    assert jnp.max(jnp.abs(hidden - rh)) < tol, "hidden mismatch vs reference"
    assert jnp.max(jnp.abs(embedded - re)) < tol, "embedded mismatch vs reference"

    print("KERNEL_OK")
</pallas_src>

<mosaic_0001>
module attributes {stable_mosaic.version = 11 : i64} {
  func.func @rnn_encoder_kernel(%arg0: i32, %arg1: memref<64x320xbf16, #tpu.memory_space<vmem>>, %arg2: memref<8x1xi32, #tpu.memory_space<vmem>>, %arg3: memref<320x128xbf16, #tpu.memory_space<vmem>>, %arg4: memref<1x128xf32, #tpu.memory_space<vmem>>, %arg5: memref<128x512xbf16, #tpu.memory_space<vmem>>, %arg6: memref<128x512xbf16, #tpu.memory_space<vmem>>, %arg7: memref<1x512xf32, #tpu.memory_space<vmem>>, %arg8: memref<64x128xf32, #tpu.memory_space<vmem>>, %arg9: memref<8x128xf32, #tpu.memory_space<vmem>>, %arg10: memref<64x128xf32, #tpu.memory_space<vmem>>, %arg11: memref<8x128xf32, #tpu.memory_space<vmem>>, %arg12: memref<8x128xf32, #tpu.memory_space<vmem>>, %arg13: memref<64x512xf32, #tpu.memory_space<vmem>>, %arg14: memref<64x128xf32, #tpu.memory_space<vmem>>) attributes {dimension_semantics = [#tpu.dimension_semantics<arbitrary>], iteration_bounds = array<i64: 1>, scalar_prefetch = 0 : i64, scratch_operands = 4 : i64, tpu.core_type = #tpu.core_type<tc>, window_params = [{transform_indices = @transform_0, window_bounds = array<i64: 64, 320>}, {pipeline_mode = #tpu.pipeline_mode<synchronous>, transform_indices = @transform_1, window_bounds = array<i64: 8, 1>}, {pipeline_mode = #tpu.pipeline_mode<synchronous>, transform_indices = @transform_2, window_bounds = array<i64: 320, 128>}, {pipeline_mode = #tpu.pipeline_mode<synchronous>, transform_indices = @transform_3, window_bounds = array<i64: 1, 128>}, {pipeline_mode = #tpu.pipeline_mode<synchronous>, transform_indices = @transform_4, window_bounds = array<i64: 128, 512>}, {pipeline_mode = #tpu.pipeline_mode<synchronous>, transform_indices = @transform_5, window_bounds = array<i64: 128, 512>}, {pipeline_mode = #tpu.pipeline_mode<synchronous>, transform_indices = @transform_6, window_bounds = array<i64: 1, 512>}, {transform_indices = @transform_7, window_bounds = array<i64: 64, 128>}, {pipeline_mode = #tpu.pipeline_mode<synchronous>, transform_indices = @transform_8, window_bounds = array<i64: 8, 128>}, {transform_indices = @transform_9, window_bounds = array<i64: 64, 128>}]} {
    %c8_i32 = arith.constant 8 : i32
    %0 = arith.muli %arg0, %c8_i32 : i32
    %c0_i32 = arith.constant 0 : i32
    %1 = arith.cmpi eq, %arg0, %c0_i32 : i32
    %2 = arith.extui %1 : i1 to i32
    %c0_i32_0 = arith.constant 0 : i32
    %3 = arith.cmpi ne, %2, %c0_i32_0 : i32
    scf.if %3 {
      %cst_178 = arith.constant 0.000000e+00 : f32
      %544 = vector.broadcast %cst_178 : f32 to vector<8x128xf32>
      %c0_179 = arith.constant 0 : index
      %c0_180 = arith.constant 0 : index
      %545 = vector.load %arg11[%c0_179, %c0_180] : memref<8x128xf32, #tpu.memory_space<vmem>>, vector<8x128xf32>
      tpu.vector_store %arg11[%c0_179, %c0_180], %544 {strides = array<i32>} : memref<8x128xf32, #tpu.memory_space<vmem>>, vector<8x128xf32>,
      %cst_181 = arith.constant 0.000000e+00 : f32
      %546 = vector.broadcast %cst_181 : f32 to vector<8x128xf32>
      %c0_182 = arith.constant 0 : index
      %c0_183 = arith.constant 0 : index
      %547 = vector.load %arg12[%c0_182, %c0_183] : memref<8x128xf32, #tpu.memory_space<vmem>>, vector<8x128xf32>
      tpu.vector_store %arg12[%c0_182, %c0_183], %546 {strides = array<i32>} : memref<8x128xf32, #tpu.memory_space<vmem>>, vector<8x128xf32>,
    } else {
    }
    %c0 = arith.constant 0 : index
    %c0_1 = arith.constant 0 : index
    %4 = vector.load %arg1[%c0, %c0_1] : memref<64x320xbf16, #tpu.memory_space<vmem>>, vector<64x320xbf16>
    %c0_2 = arith.constant 0 : index
    %c0_3 = arith.constant 0 : index
    %5 = vector.load %arg3[%c0_2, %c0_3] : memref<320x128xbf16, #tpu.memory_space<vmem>>, vector<320x128xbf16>
    %cst = arith.constant dense<0.000000e+00> : vector<64x128xf32>
    %6 = tpu.matmul %4, %5, %cst {dimension_numbers = #tpu.dot_dimension_numbers<[1], [0], [0], [1], [0, 0, 1, 1], [], []>} : vector<64x320xbf16>, vector<320x128xbf16>, vector<64x128xf32> -> vector<64x128xf32>
    %c0_4 = arith.constant 0 : index
    %c0_5 = arith.constant 0 : index
    %7 = vector.load %arg4[%c0_4, %c0_5] : memref<1x128xf32, #tpu.memory_space<vmem>>, vector<1x128xf32>
    %8 = vector.broadcast %7 : vector<1x128xf32> to vector<64x128xf32>
    %9 = arith.addf %6, %8 : vector<64x128xf32>
    %cst_6 = arith.constant 0.000000e+00 : f32
    %10 = vector.broadcast %cst_6 : f32 to vector<64x128xf32>
    %11 = arith.maximumf %9, %10 : vector<64x128xf32>
    %c0_7 = arith.constant 0 : index
    %c0_8 = arith.constant 0 : index
    %12 = vector.load %arg14[%c0_7, %c0_8] : memref<64x128xf32, #tpu.memory_space<vmem>>, vector<64x128xf32>
    tpu.vector_store %arg14[%c0_7, %c0_8], %11 {strides = array<i32>} : memref<64x128xf32, #tpu.memory_space<vmem>>, vector<64x128xf32>,
    %13 = arith.truncf %11 : vector<64x128xf32> to vector<64x128xbf16>
    %c0_9 = arith.constant 0 : index
    %c0_10 = arith.constant 0 : index
    %14 = vector.load %arg5[%c0_9, %c0_10] : memref<128x512xbf16, #tpu.memory_space<vmem>>, vector<128x512xbf16>
    %cst_11 = arith.constant dense<0.000000e+00> : vector<64x512xf32>
    %15 = tpu.matmul %13, %14, %cst_11 {dimension_numbers = #tpu.dot_dimension_numbers<[1], [0], [0], [1], [0, 0, 1, 1], [], []>} : vector<64x128xbf16>, vector<128x512xbf16>, vector<64x512xf32> -> vector<64x512xf32>
    %c0_12 = arith.constant 0 : index
    %c0_13 = arith.constant 0 : index
    %16 = vector.load %arg7[%c0_12, %c0_13] : memref<1x512xf32, #tpu.memory_space<vmem>>, vector<1x512xf32>
    %17 = vector.broadcast %16 : vector<1x512xf32> to vector<64x512xf32>
    %18 = arith.addf %15, %17 : vector<64x512xf32>
    %c0_14 = arith.constant 0 : index
    %c0_15 = arith.constant 0 : index
    %19 = vector.load %arg13[%c0_14, %c0_15] : memref<64x512xf32, #tpu.memory_space<vmem>>, vector<64x512xf32>
    tpu.vector_store %arg13[%c0_14, %c0_15], %18 {strides = array<i32>} : memref<64x512xf32, #tpu.memory_space<vmem>>, vector<64x512xf32>,
    %c0_16 = arith.constant 0 : index
    %c0_17 = arith.constant 0 : index
    %20 = vector.load %arg2[%c0_16, %c0_17] : memref<8x1xi32, #tpu.memory_space<vmem>>, vector<8x1xi32>
    %c0_18 = arith.constant 0 : index
    %c0_19 = arith.constant 0 : index
    %21 = vector.load %arg6[%c0_18, %c0_19] : memref<128x512xbf16, #tpu.memory_space<vmem>>, vector<128x512xbf16>
    %c0_i32_20 = arith.constant 0 : i32
    %22 = arith.addi %0, %c0_i32_20 : i32
    %c8_i32_21 = arith.constant 8 : i32
    %23 = arith.muli %c0_i32_20, %c8_i32_21 : i32
    %24 = tpu.assume_multiple %23, 8 : i32
    %25 = vector.broadcast %22 : i32 to vector<8x1xi32>
    %26 = arith.cmpi sgt, %20, %25 : vector<8x1xi32>
    %27 = arith.extui %26 : vector<8x1xi1> to vector<8x1xi32>
    %28 = arith.sitofp %27 : vector<8x1xi32> to vector<8x1xf32>
    %c0_22 = arith.constant 0 : index
    %c0_23 = arith.constant 0 : index
    %29 = vector.load %arg11[%c0_22, %c0_23] : memref<8x128xf32, #tpu.memory_space<vmem>>, vector<8x128xf32>
    %c0_24 = arith.constant 0 : index
    %c0_25 = arith.constant 0 : index
    %30 = vector.load %arg12[%c0_24, %c0_25] : memref<8x128xf32, #tpu.memory_space<vmem>>, vector<8x128xf32>
    %31 = arith.index_cast %24 : i32 to index
    %c0_26 = arith.constant 0 : index
    %32 = vector.load %arg13[%31, %c0_26] : memref<64x512xf32, #tpu.memory_space<vmem>>, vector<8x512xf32>
    %33 = arith.truncf %29 : vector<8x128xf32> to vector<8x128xbf16>
    %cst_27 = arith.constant dense<0.000000e+00> : vector<8x512xf32>
    %34 = tpu.matmul %33, %21, %cst_27 {dimension_numbers = #tpu.dot_dimension_numbers<[1], [0], [0], [1], [0, 0, 1, 1], [], []>} : vector<8x128xbf16>, vector<128x512xbf16>, vector<8x512xf32> -> vector<8x512xf32>
    %35 = arith.addf %32, %34 : vector<8x512xf32>
    %36 = vector.extract_strided_slice %35 {offsets = [0, 0], sizes = [8, 128], strides = [1, 1]} : vector<8x512xf32> to vector<8x128xf32>
    %37 = arith.negf %36 : vector<8x128xf32>
    %38 = math.exp %37 : vector<8x128xf32>
    %cst_28 = arith.constant 1.000000e+00 : f32
    %39 = vector.broadcast %cst_28 : f32 to vector<8x128xf32>
    %40 = arith.addf %39, %38 : vector<8x128xf32>
    %41 = arith.divf %39, %40 : vector<8x128xf32>
    %42 = vector.extract_strided_slice %35 {offsets = [0, 128], sizes = [8, 128], strides = [1, 1]} : vector<8x512xf32> to vector<8x128xf32>
    %43 = arith.negf %42 : vector<8x128xf32>
    %44 = math.exp %43 : vector<8x128xf32>
    %cst_29 = arith.constant 1.000000e+00 : f32
    %45 = vector.broadcast %cst_29 : f32 to vector<8x128xf32>
    %46 = arith.addf %45, %44 : vector<8x128xf32>
    %47 = arith.divf %45, %46 : vector<8x128xf32>
    %48 = vector.extract_strided_slice %35 {offsets = [0, 256], sizes = [8, 128], strides = [1, 1]} : vector<8x512xf32> to vector<8x128xf32>
    %49 = math.tanh %48 : vector<8x128xf32>
    %50 = vector.extract_strided_slice %35 {offsets = [0, 384], sizes = [8, 128], strides = [1, 1]} : vector<8x512xf32> to vector<8x128xf32>
    %51 = arith.negf %50 : vector<8x128xf32>
    %52 = math.exp %51 : vector<8x128xf32>
    %cst_30 = arith.constant 1.000000e+00 : f32
    %53 = vector.broadcast %cst_30 : f32 to vector<8x128xf32>
    %54 = arith.addf %53, %52 : vector<8x128xf32>
    %55 = arith.divf %53, %54 : vector<8x128xf32>
    %56 = arith.mulf %47, %30 : vector<8x128xf32>
    %57 = arith.mulf %41, %49 : vector<8x128xf32>
    %58 = arith.addf %56, %57 : vector<8x128xf32>
    %59 = math.tanh %58 : vector<8x128xf32>
    %60 = arith.mulf %55, %59 : vector<8x128xf32>
    %61 = vector.broadcast %28 : vector<8x1xf32> to vector<8x128xf32>
    %62 = arith.mulf %61, %58 : vector<8x128xf32>
    %cst_31 = arith.constant 1.000000e+00 : f32
    %63 = vector.broadcast %cst_31 : f32 to vector<8x1xf32>
    %64 = arith.subf %63, %28 : vector<8x1xf32>
    %65 = vector.broadcast %64 : vector<8x1xf32> to vector<8x128xf32>
    %66 = arith.mulf %65, %30 : vector<8x128xf32>
    %67 = arith.addf %62, %66 : vector<8x128xf32>
    %c0_32 = arith.constant 0 : index
    %c0_33 = arith.constant 0 : index
    %68 = vector.load %arg12[%c0_32, %c0_33] : memref<8x128xf32, #tpu.memory_space<vmem>>, vector<8x128xf32>
    tpu.vector_store %arg12[%c0_32, %c0_33], %67 {strides = array<i32>} : memref<8x128xf32, #tpu.memory_space<vmem>>, vector<8x128xf32>,
    %69 = vector.broadcast %28 : vector<8x1xf32> to vector<8x128xf32>
    %70 = arith.mulf %69, %60 : vector<8x128xf32>
    %cst_34 = arith.constant 1.000000e+00 : f32
    %71 = vector.broadcast %cst_34 : f32 to vector<8x1xf32>
    %72 = arith.subf %71, %28 : vector<8x1xf32>
    %73 = vector.broadcast %72 : vector<8x1xf32> to vector<8x128xf32>
    %74 = arith.mulf %73, %29 : vector<8x128xf32>
    %75 = arith.addf %70, %74 : vector<8x128xf32>
    %c0_35 = arith.constant 0 : index
    %c0_36 = arith.constant 0 : index
    %76 = vector.load %arg11[%c0_35, %c0_36] : memref<8x128xf32, #tpu.memory_space<vmem>>, vector<8x128xf32>
    tpu.vector_store %arg11[%c0_35, %c0_36], %75 {strides = array<i32>} : memref<8x128xf32, #tpu.memory_space<vmem>>, vector<8x128xf32>,
    %77 = vector.broadcast %28 : vector<8x1xf32> to vector<8x128xf32>
    %78 = arith.mulf %77, %60 : vector<8x128xf32>
    %79 = arith.index_cast %24 : i32 to index
    %c0_37 = arith.constant 0 : index
    %80 = vector.load %arg8[%79, %c0_37] : memref<64x128xf32, #tpu.memory_space<vmem>>, vector<8x128xf32>
    tpu.vector_store %arg8[%79, %c0_37], %78 {strides = array<i32>} : memref<64x128xf32, #tpu.memory_space<vmem>>, vector<8x128xf32>,
    %81 = arith.index_cast %24 : i32 to index
    %c0_38 = arith.constant 0 : index
    %82 = vector.load %arg14[%81, %c0_38] : memref<64x128xf32, #tpu.memory_space<vmem>>, vector<8x128xf32>
    %83 = vector.broadcast %28 : vector<8x1xf32> to vector<8x128xf32>
    %84 = arith.mulf %83, %82 : vector<8x128xf32>
    %85 = arith.index_cast %24 : i32 to index
    %c0_39 = arith.constant 0 : index
    %86 = vector.load %arg10[%85, %c0_39] : memref<64x128xf32, #tpu.memory_space<vmem>>, vector<8x128xf32>
    tpu.vector_store %arg10[%85, %c0_39], %84 {strides = array<i32>} : memref<64x128xf32, #tpu.memory_space<vmem>>, vector<8x128xf32>,
    %c1_i32 = arith.constant 1 : i32
    %87 = arith.addi %0, %c1_i32 : i32
    %c8_i32_40 = arith.constant 8 : i32
    %88 = arith.muli %c1_i32, %c8_i32_40 : i32
    %89 = tpu.assume_multiple %88, 8 : i32
    %90 = vector.broadcast %87 : i32 to vector<8x1xi32>
    %91 = arith.cmpi sgt, %20, %90 : vector<8x1xi32>
    %92 = arith.extui %91 : vector<8x1xi1> to vector<8x1xi32>
    %93 = arith.sitofp %92 : vector<8x1xi32> to vector<8x1xf32>
    %c0_41 = arith.constant 0 : index
    %c0_42 = arith.constant 0 : index
    %94 = vector.load %arg11[%c0_41, %c0_42] : memref<8x128xf32, #tpu.memory_space<vmem>>, vector<8x128xf32>
    %c0_43 = arith.constant 0 : index
    %c0_44 = arith.constant 0 : index
    %95 = vector.load %arg12[%c0_43, %c0_44] : memref<8x128xf32, #tpu.memory_space<vmem>>, vector<8x128xf32>
    %96 = arith.index_cast %89 : i32 to index
    %c0_45 = arith.constant 0 : index
    %97 = vector.load %arg13[%96, %c0_45] : memref<64x512xf32, #tpu.memory_space<vmem>>, vector<8x512xf32>
    %98 = arith.truncf %94 : vector<8x128xf32> to vector<8x128xbf16>
    %cst_46 = arith.constant dense<0.000000e+00> : vector<8x512xf32>
    %99 = tpu.matmul %98, %21, %cst_46 {dimension_numbers = #tpu.dot_dimension_numbers<[1], [0], [0], [1], [0, 0, 1, 1], [], []>} : vector<8x128xbf16>, vector<128x512xbf16>, vector<8x512xf32> -> vector<8x512xf32>
    %100 = arith.addf %97, %99 : vector<8x512xf32>
    %101 = vector.extract_strided_slice %100 {offsets = [0, 0], sizes = [8, 128], strides = [1, 1]} : vector<8x512xf32> to vector<8x128xf32>
    %102 = arith.negf %101 : vector<8x128xf32>
    %103 = math.exp %102 : vector<8x128xf32>
    %cst_47 = arith.constant 1.000000e+00 : f32
    %104 = vector.broadcast %cst_47 : f32 to vector<8x128xf32>
    %105 = arith.addf %104, %103 : vector<8x128xf32>
    %106 = arith.divf %104, %105 : vector<8x128xf32>
    %107 = vector.extract_strided_slice %100 {offsets = [0, 128], sizes = [8, 128], strides = [1, 1]} : vector<8x512xf32> to vector<8x128xf32>
    %108 = arith.negf %107 : vector<8x128xf32>
    %109 = math.exp %108 : vector<8x128xf32>
    %cst_48 = arith.constant 1.000000e+00 : f32
    %110 = vector.broadcast %cst_48 : f32 to vector<8x128xf32>
    %111 = arith.addf %110, %109 : vector<8x128xf32>
    %112 = arith.divf %110, %111 : vector<8x128xf32>
    %113 = vector.extract_strided_slice %100 {offsets = [0, 256], sizes = [8, 128], strides = [1, 1]} : vector<8x512xf32> to vector<8x128xf32>
    %114 = math.tanh %113 : vector<8x128xf32>
    %115 = vector.extract_strided_slice %100 {offsets = [0, 384], sizes = [8, 128], strides = [1, 1]} : vector<8x512xf32> to vector<8x128xf32>
    %116 = arith.negf %115 : vector<8x128xf32>
    %117 = math.exp %116 : vector<8x128xf32>
    %cst_49 = arith.constant 1.000000e+00 : f32
    %118 = vector.broadcast %cst_49 : f32 to vector<8x128xf32>
    %119 = arith.addf %118, %117 : vector<8x128xf32>
    %120 = arith.divf %118, %119 : vector<8x128xf32>
    %121 = arith.mulf %112, %95 : vector<8x128xf32>
    %122 = arith.mulf %106, %114 : vector<8x128xf32>
    %123 = arith.addf %121, %122 : vector<8x128xf32>
    %124 = math.tanh %123 : vector<8x128xf32>
    %125 = arith.mulf %120, %124 : vector<8x128xf32>
    %126 = vector.broadcast %93 : vector<8x1xf32> to vector<8x128xf32>
    %127 = arith.mulf %126, %123 : vector<8x128xf32>
    %cst_50 = arith.constant 1.000000e+00 : f32
    %128 = vector.broadcast %cst_50 : f32 to vector<8x1xf32>
    %129 = arith.subf %128, %93 : vector<8x1xf32>
    %130 = vector.broadcast %129 : vector<8x1xf32> to vector<8x128xf32>
    %131 = arith.mulf %130, %95 : vector<8x128xf32>
    %132 = arith.addf %127, %131 : vector<8x128xf32>
    %c0_51 = arith.constant 0 : index
    %c0_52 = arith.constant 0 : index
    %133 = vector.load %arg12[%c0_51, %c0_52] : memref<8x128xf32, #tpu.memory_space<vmem>>, vector<8x128xf32>
    tpu.vector_store %arg12[%c0_51, %c0_52], %132 {strides = array<i32>} : memref<8x128xf32, #tpu.memory_space<vmem>>, vector<8x128xf32>,
    %134 = vector.broadcast %93 : vector<8x1xf32> to vector<8x128xf32>
    %135 = arith.mulf %134, %125 : vector<8x128xf32>
    %cst_53 = arith.constant 1.000000e+00 : f32
    %136 = vector.broadcast %cst_53 : f32 to vector<8x1xf32>
    %137 = arith.subf %136, %93 : vector<8x1xf32>
    %138 = vector.broadcast %137 : vector<8x1xf32> to vector<8x128xf32>
    %139 = arith.mulf %138, %94 : vector<8x128xf32>
    %140 = arith.addf %135, %139 : vector<8x128xf32>
    %c0_54 = arith.constant 0 : index
    %c0_55 = arith.constant 0 : index
    %141 = vector.load %arg11[%c0_54, %c0_55] : memref<8x128xf32, #tpu.memory_space<vmem>>, vector<8x128xf32>
    tpu.vector_store %arg11[%c0_54, %c0_55], %140 {strides = array<i32>} : memref<8x128xf32, #tpu.memory_space<vmem>>, vector<8x128xf32>,
    %142 = vector.broadcast %93 : vector<8x1xf32> to vector<8x128xf32>
    %143 = arith.mulf %142, %125 : vector<8x128xf32>
    %144 = arith.index_cast %89 : i32 to index
    %c0_56 = arith.constant 0 : index
    %145 = vector.load %arg8[%144, %c0_56] : memref<64x128xf32, #tpu.memory_space<vmem>>, vector<8x128xf32>
    tpu.vector_store %arg8[%144, %c0_56], %143 {strides = array<i32>} : memref<64x128xf32, #tpu.memory_space<vmem>>, vector<8x128xf32>,
    %146 = arith.index_cast %89 : i32 to index
    %c0_57 = arith.constant 0 : index
    %147 = vector.load %arg14[%146, %c0_57] : memref<64x128xf32, #tpu.memory_space<vmem>>, vector<8x128xf32>
    %148 = vector.broadcast %93 : vector<8x1xf32> to vector<8x128xf32>
    %149 = arith.mulf %148, %147 : vector<8x128xf32>
    %150 = arith.index_cast %89 : i32 to index
    %c0_58 = arith.constant 0 : index
    %151 = vector.load %arg10[%150, %c0_58] : memref<64x128xf32, #tpu.memory_space<vmem>>, vector<8x128xf32>
    tpu.vector_store %arg10[%150, %c0_58], %149 {strides = array<i32>} : memref<64x128xf32, #tpu.memory_space<vmem>>, vector<8x128xf32>,
    %c2_i32 = arith.constant 2 : i32
    %152 = arith.addi %0, %c2_i32 : i32
    %c8_i32_59 = arith.constant 8 : i32
    %153 = arith.muli %c2_i32, %c8_i32_59 : i32
    %154 = tpu.assume_multiple %153, 8 : i32
    %155 = vector.broadcast %152 : i32 to vector<8x1xi32>
    %156 = arith.cmpi sgt, %20, %155 : vector<8x1xi32>
    %157 = arith.extui %156 : vector<8x1xi1> to vector<8x1xi32>
    %158 = arith.sitofp %157 : vector<8x1xi32> to vector<8x1xf32>
    %c0_60 = arith.constant 0 : index
    %c0_61 = arith.constant 0 : index
    %159 = vector.load %arg11[%c0_60, %c0_61] : memref<8x128xf32, #tpu.memory_space<vmem>>, vector<8x128xf32>
    %c0_62 = arith.constant 0 : index
    %c0_63 = arith.constant 0 : index
    %160 = vector.load %arg12[%c0_62, %c0_63] : memref<8x128xf32, #tpu.memory_space<vmem>>, vector<8x128xf32>
    %161 = arith.index_cast %154 : i32 to index
    %c0_64 = arith.constant 0 : index
    %162 = vector.load %arg13[%161, %c0_64] : memref<64x512xf32, #tpu.memory_space<vmem>>, vector<8x512xf32>
    %163 = arith.truncf %159 : vector<8x128xf32> to vector<8x128xbf16>
    %cst_65 = arith.constant dense<0.000000e+00> : vector<8x512xf32>
    %164 = tpu.matmul %163, %21, %cst_65 {dimension_numbers = #tpu.dot_dimension_numbers<[1], [0], [0], [1], [0, 0, 1, 1], [], []>} : vector<8x128xbf16>, vector<128x512xbf16>, vector<8x512xf32> -> vector<8x512xf32>
    %165 = arith.addf %162, %164 : vector<8x512xf32>
    %166 = vector.extract_strided_slice %165 {offsets = [0, 0], sizes = [8, 128], strides = [1, 1]} : vector<8x512xf32> to vector<8x128xf32>
    %167 = arith.negf %166 : vector<8x128xf32>
    %168 = math.exp %167 : vector<8x128xf32>
    %cst_66 = arith.constant 1.000000e+00 : f32
    %169 = vector.broadcast %cst_66 : f32 to vector<8x128xf32>
    %170 = arith.addf %169, %168 : vector<8x128xf32>
    %171 = arith.divf %169, %170 : vector<8x128xf32>
    %172 = vector.extract_strided_slice %165 {offsets = [0, 128], sizes = [8, 128], strides = [1, 1]} : vector<8x512xf32> to vector<8x128xf32>
    %173 = arith.negf %172 : vector<8x128xf32>
    %174 = math.exp %173 : vector<8x128xf32>
    %cst_67 = arith.constant 1.000000e+00 : f32
    %175 = vector.broadcast %cst_67 : f32 to vector<8x128xf32>
    %176 = arith.addf %175, %174 : vector<8x128xf32>
    %177 = arith.divf %175, %176 : vector<8x128xf32>
    %178 = vector.extract_strided_slice %165 {offsets = [0, 256], sizes = [8, 128], strides = [1, 1]} : vector<8x512xf32> to vector<8x128xf32>
    %179 = math.tanh %178 : vector<8x128xf32>
    %180 = vector.extract_strided_slice %165 {offsets = [0, 384], sizes = [8, 128], strides = [1, 1]} : vector<8x512xf32> to vector<8x128xf32>
    %181 = arith.negf %180 : vector<8x128xf32>
    %182 = math.exp %181 : vector<8x128xf32>
    %cst_68 = arith.constant 1.000000e+00 : f32
    %183 = vector.broadcast %cst_68 : f32 to vector<8x128xf32>
    %184 = arith.addf %183, %182 : vector<8x128xf32>
    %185 = arith.divf %183, %184 : vector<8x128xf32>
    %186 = arith.mulf %177, %160 : vector<8x128xf32>
    %187 = arith.mulf %171, %179 : vector<8x128xf32>
    %188 = arith.addf %186, %187 : vector<8x128xf32>
    %189 = math.tanh %188 : vector<8x128xf32>
    %190 = arith.mulf %185, %189 : vector<8x128xf32>
    %191 = vector.broadcast %158 : vector<8x1xf32> to vector<8x128xf32>
    %192 = arith.mulf %191, %188 : vector<8x128xf32>
    %cst_69 = arith.constant 1.000000e+00 : f32
    %193 = vector.broadcast %cst_69 : f32 to vector<8x1xf32>
    %194 = arith.subf %193, %158 : vector<8x1xf32>
    %195 = vector.broadcast %194 : vector<8x1xf32> to vector<8x128xf32>
    %196 = arith.mulf %195, %160 : vector<8x128xf32>
    %197 = arith.addf %192, %196 : vector<8x128xf32>
    %c0_70 = arith.constant 0 : index
    %c0_71 = arith.constant 0 : index
    %198 = vector.load %arg12[%c0_70, %c0_71] : memref<8x128xf32, #tpu.memory_space<vmem>>, vector<8x128xf32>
    tpu.vector_store %arg12[%c0_70, %c0_71], %197 {strides = array<i32>} : memref<8x128xf32, #tpu.memory_space<vmem>>, vector<8x128xf32>,
    %199 = vector.broadcast %158 : vector<8x1xf32> to vector<8x128xf32>
    %200 = arith.mulf %199, %190 : vector<8x128xf32>
    %cst_72 = arith.constant 1.000000e+00 : f32
    %201 = vector.broadcast %cst_72 : f32 to vector<8x1xf32>
    %202 = arith.subf %201, %158 : vector<8x1xf32>
    %203 = vector.broadcast %202 : vector<8x1xf32> to vector<8x128xf32>
    %204 = arith.mulf %203, %159 : vector<8x128xf32>
    %205 = arith.addf %200, %204 : vector<8x128xf32>
    %c0_73 = arith.constant 0 : index
    %c0_74 = arith.constant 0 : index
    %206 = vector.load %arg11[%c0_73, %c0_74] : memref<8x128xf32, #tpu.memory_space<vmem>>, vector<8x128xf32>
    tpu.vector_store %arg11[%c0_73, %c0_74], %205 {strides = array<i32>} : memref<8x128xf32, #tpu.memory_space<vmem>>, vector<8x128xf32>,
    %207 = vector.broadcast %158 : vector<8x1xf32> to vector<8x128xf32>
    %208 = arith.mulf %207, %190 : vector<8x128xf32>
    %209 = arith.index_cast %154 : i32 to index
    %c0_75 = arith.constant 0 : index
    %210 = vector.load %arg8[%209, %c0_75] : memref<64x128xf32, #tpu.memory_space<vmem>>, vector<8x128xf32>
    tpu.vector_store %arg8[%209, %c0_75], %208 {strides = array<i32>} : memref<64x128xf32, #tpu.memory_space<vmem>>, vector<8x128xf32>,
    %211 = arith.index_cast %154 : i32 to index
    %c0_76 = arith.constant 0 : index
    %212 = vector.load %arg14[%211, %c0_76] : memref<64x128xf32, #tpu.memory_space<vmem>>, vector<8x128xf32>
    %213 = vector.broadcast %158 : vector<8x1xf32> to vector<8x128xf32>
    %214 = arith.mulf %213, %212 : vector<8x128xf32>
    %215 = arith.index_cast %154 : i32 to index
    %c0_77 = arith.constant 0 : index
    %216 = vector.load %arg10[%215, %c0_77] : memref<64x128xf32, #tpu.memory_space<vmem>>, vector<8x128xf32>
    tpu.vector_store %arg10[%215, %c0_77], %214 {strides = array<i32>} : memref<64x128xf32, #tpu.memory_space<vmem>>, vector<8x128xf32>,
    %c3_i32 = arith.constant 3 : i32
    %217 = arith.addi %0, %c3_i32 : i32
    %c8_i32_78 = arith.constant 8 : i32
    %218 = arith.muli %c3_i32, %c8_i32_78 : i32
    %219 = tpu.assume_multiple %218, 8 : i32
    %220 = vector.broadcast %217 : i32 to vector<8x1xi32>
    %221 = arith.cmpi sgt, %20, %220 : vector<8x1xi32>
    %222 = arith.extui %221 : vector<8x1xi1> to vector<8x1xi32>
    %223 = arith.sitofp %222 : vector<8x1xi32> to vector<8x1xf32>
    %c0_79 = arith.constant 0 : index
    %c0_80 = arith.constant 0 : index
    %224 = vector.load %arg11[%c0_79, %c0_80] : memref<8x128xf32, #tpu.memory_space<vmem>>, vector<8x128xf32>
    %c0_81 = arith.constant 0 : index
    %c0_82 = arith.constant 0 : index
    %225 = vector.load %arg12[%c0_81, %c0_82] : memref<8x128xf32, #tpu.memory_space<vmem>>, vector<8x128xf32>
    %226 = arith.index_cast %219 : i32 to index
    %c0_83 = arith.constant 0 : index
    %227 = vector.load %arg13[%226, %c0_83] : memref<64x512xf32, #tpu.memory_space<vmem>>, vector<8x512xf32>
    %228 = arith.truncf %224 : vector<8x128xf32> to vector<8x128xbf16>
    %cst_84 = arith.constant dense<0.000000e+00> : vector<8x512xf32>
    %229 = tpu.matmul %228, %21, %cst_84 {dimension_numbers = #tpu.dot_dimension_numbers<[1], [0], [0], [1], [0, 0, 1, 1], [], []>} : vector<8x128xbf16>, vector<128x512xbf16>, vector<8x512xf32> -> vector<8x512xf32>
    %230 = arith.addf %227, %229 : vector<8x512xf32>
    %231 = vector.extract_strided_slice %230 {offsets = [0, 0], sizes = [8, 128], strides = [1, 1]} : vector<8x512xf32> to vector<8x128xf32>
    %232 = arith.negf %231 : vector<8x128xf32>
    %233 = math.exp %232 : vector<8x128xf32>
    %cst_85 = arith.constant 1.000000e+00 : f32
    %234 = vector.broadcast %cst_85 : f32 to vector<8x128xf32>
    %235 = arith.addf %234, %233 : vector<8x128xf32>
    %236 = arith.divf %234, %235 : vector<8x128xf32>
    %237 = vector.extract_strided_slice %230 {offsets = [0, 128], sizes = [8, 128], strides = [1, 1]} : vector<8x512xf32> to vector<8x128xf32>
    %238 = arith.negf %237 : vector<8x128xf32>
    %239 = math.exp %238 : vector<8x128xf32>
    %cst_86 = arith.constant 1.000000e+00 : f32
    %240 = vector.broadcast %cst_86 : f32 to vector<8x128xf32>
    %241 = arith.addf %240, %239 : vector<8x128xf32>
    %242 = arith.divf %240, %241 : vector<8x128xf32>
    %243 = vector.extract_strided_slice %230 {offsets = [0, 256], sizes = [8, 128], strides = [1, 1]} : vector<8x512xf32> to vector<8x128xf32>
    %244 = math.tanh %243 : vector<8x128xf32>
    %245 = vector.extract_strided_slice %230 {offsets = [0, 384], sizes = [8, 128], strides = [1, 1]} : vector<8x512xf32> to vector<8x128xf32>
    %246 = arith.negf %245 : vector<8x128xf32>
    %247 = math.exp %246 : vector<8x128xf32>
    %cst_87 = arith.constant 1.000000e+00 : f32
    %248 = vector.broadcast %cst_87 : f32 to vector<8x128xf32>
    %249 = arith.addf %248, %247 : vector<8x128xf32>
    %250 = arith.divf %248, %249 : vector<8x128xf32>
    %251 = arith.mulf %242, %225 : vector<8x128xf32>
    %252 = arith.mulf %236, %244 : vector<8x128xf32>
    %253 = arith.addf %251, %252 : vector<8x128xf32>
    %254 = math.tanh %253 : vector<8x128xf32>
    %255 = arith.mulf %250, %254 : vector<8x128xf32>
    %256 = vector.broadcast %223 : vector<8x1xf32> to vector<8x128xf32>
    %257 = arith.mulf %256, %253 : vector<8x128xf32>
    %cst_88 = arith.constant 1.000000e+00 : f32
    %258 = vector.broadcast %cst_88 : f32 to vector<8x1xf32>
    %259 = arith.subf %258, %223 : vector<8x1xf32>
    %260 = vector.broadcast %259 : vector<8x1xf32> to vector<8x128xf32>
    %261 = arith.mulf %260, %225 : vector<8x128xf32>
    %262 = arith.addf %257, %261 : vector<8x128xf32>
    %c0_89 = arith.constant 0 : index
    %c0_90 = arith.constant 0 : index
    %263 = vector.load %arg12[%c0_89, %c0_90] : memref<8x128xf32, #tpu.memory_space<vmem>>, vector<8x128xf32>
    tpu.vector_store %arg12[%c0_89, %c0_90], %262 {strides = array<i32>} : memref<8x128xf32, #tpu.memory_space<vmem>>, vector<8x128xf32>,
    %264 = vector.broadcast %223 : vector<8x1xf32> to vector<8x128xf32>
    %265 = arith.mulf %264, %255 : vector<8x128xf32>
    %cst_91 = arith.constant 1.000000e+00 : f32
    %266 = vector.broadcast %cst_91 : f32 to vector<8x1xf32>
    %267 = arith.subf %266, %223 : vector<8x1xf32>
    %268 = vector.broadcast %267 : vector<8x1xf32> to vector<8x128xf32>
    %269 = arith.mulf %268, %224 : vector<8x128xf32>
    %270 = arith.addf %265, %269 : vector<8x128xf32>
    %c0_92 = arith.constant 0 : index
    %c0_93 = arith.constant 0 : index
    %271 = vector.load %arg11[%c0_92, %c0_93] : memref<8x128xf32, #tpu.memory_space<vmem>>, vector<8x128xf32>
    tpu.vector_store %arg11[%c0_92, %c0_93], %270 {strides = array<i32>} : memref<8x128xf32, #tpu.memory_space<vmem>>, vector<8x128xf32>,
    %272 = vector.broadcast %223 : vector<8x1xf32> to vector<8x128xf32>
    %273 = arith.mulf %272, %255 : vector<8x128xf32>
    %274 = arith.index_cast %219 : i32 to index
    %c0_94 = arith.constant 0 : index
    %275 = vector.load %arg8[%274, %c0_94] : memref<64x128xf32, #tpu.memory_space<vmem>>, vector<8x128xf32>
    tpu.vector_store %arg8[%274, %c0_94], %273 {strides = array<i32>} : memref<64x128xf32, #tpu.memory_space<vmem>>, vector<8x128xf32>,
    %276 = arith.index_cast %219 : i32 to index
    %c0_95 = arith.constant 0 : index
    %277 = vector.load %arg14[%276, %c0_95] : memref<64x128xf32, #tpu.memory_space<vmem>>, vector<8x128xf32>
    %278 = vector.broadcast %223 : vector<8x1xf32> to vector<8x128xf32>
    %279 = arith.mulf %278, %277 : vector<8x128xf32>
    %280 = arith.index_cast %219 : i32 to index
    %c0_96 = arith.constant 0 : index
    %281 = vector.load %arg10[%280, %c0_96] : memref<64x128xf32, #tpu.memory_space<vmem>>, vector<8x128xf32>
    tpu.vector_store %arg10[%280, %c0_96], %279 {strides = array<i32>} : memref<64x128xf32, #tpu.memory_space<vmem>>, vector<8x128xf32>,
    %c4_i32 = arith.constant 4 : i32
    %282 = arith.addi %0, %c4_i32 : i32
    %c8_i32_97 = arith.constant 8 : i32
    %283 = arith.muli %c4_i32, %c8_i32_97 : i32
    %284 = tpu.assume_multiple %283, 8 : i32
    %285 = vector.broadcast %282 : i32 to vector<8x1xi32>
    %286 = arith.cmpi sgt, %20, %285 : vector<8x1xi32>
    %287 = arith.extui %286 : vector<8x1xi1> to vector<8x1xi32>
    %288 = arith.sitofp %287 : vector<8x1xi32> to vector<8x1xf32>
    %c0_98 = arith.constant 0 : index
    %c0_99 = arith.constant 0 : index
    %289 = vector.load %arg11[%c0_98, %c0_99] : memref<8x128xf32, #tpu.memory_space<vmem>>, vector<8x128xf32>
    %c0_100 = arith.constant 0 : index
    %c0_101 = arith.constant 0 : index
    %290 = vector.load %arg12[%c0_100, %c0_101] : memref<8x128xf32, #tpu.memory_space<vmem>>, vector<8x128xf32>
    %291 = arith.index_cast %284 : i32 to index
    %c0_102 = arith.constant 0 : index
    %292 = vector.load %arg13[%291, %c0_102] : memref<64x512xf32, #tpu.memory_space<vmem>>, vector<8x512xf32>
    %293 = arith.truncf %289 : vector<8x128xf32> to vector<8x128xbf16>
    %cst_103 = arith.constant dense<0.000000e+00> : vector<8x512xf32>
    %294 = tpu.matmul %293, %21, %cst_103 {dimension_numbers = #tpu.dot_dimension_numbers<[1], [0], [0], [1], [0, 0, 1, 1], [], []>} : vector<8x128xbf16>, vector<128x512xbf16>, vector<8x512xf32> -> vector<8x512xf32>
    %295 = arith.addf %292, %294 : vector<8x512xf32>
    %296 = vector.extract_strided_slice %295 {offsets = [0, 0], sizes = [8, 128], strides = [1, 1]} : vector<8x512xf32> to vector<8x128xf32>
    %297 = arith.negf %296 : vector<8x128xf32>
    %298 = math.exp %297 : vector<8x128xf32>
    %cst_104 = arith.constant 1.000000e+00 : f32
    %299 = vector.broadcast %cst_104 : f32 to vector<8x128xf32>
    %300 = arith.addf %299, %298 : vector<8x128xf32>
    %301 = arith.divf %299, %300 : vector<8x128xf32>
    %302 = vector.extract_strided_slice %295 {offsets = [0, 128], sizes = [8, 128], strides = [1, 1]} : vector<8x512xf32> to vector<8x128xf32>
    %303 = arith.negf %302 : vector<8x128xf32>
    %304 = math.exp %303 : vector<8x128xf32>
    %cst_105 = arith.constant 1.000000e+00 : f32
    %305 = vector.broadcast %cst_105 : f32 to vector<8x128xf32>
    %306 = arith.addf %305, %304 : vector<8x128xf32>
    %307 = arith.divf %305, %306 : vector<8x128xf32>
    %308 = vector.extract_strided_slice %295 {offsets = [0, 256], sizes = [8, 128], strides = [1, 1]} : vector<8x512xf32> to vector<8x128xf32>
    %309 = math.tanh %308 : vector<8x128xf32>
    %310 = vector.extract_strided_slice %295 {offsets = [0, 384], sizes = [8, 128], strides = [1, 1]} : vector<8x512xf32> to vector<8x128xf32>
    %311 = arith.negf %310 : vector<8x128xf32>
    %312 = math.exp %311 : vector<8x128xf32>
    %cst_106 = arith.constant 1.000000e+00 : f32
    %313 = vector.broadcast %cst_106 : f32 to vector<8x128xf32>
    %314 = arith.addf %313, %312 : vector<8x128xf32>
    %315 = arith.divf %313, %314 : vector<8x128xf32>
    %316 = arith.mulf %307, %290 : vector<8x128xf32>
    %317 = arith.mulf %301, %309 : vector<8x128xf32>
    %318 = arith.addf %316, %317 : vector<8x128xf32>
    %319 = math.tanh %318 : vector<8x128xf32>
    %320 = arith.mulf %315, %319 : vector<8x128xf32>
    %321 = vector.broadcast %288 : vector<8x1xf32> to vector<8x128xf32>
    %322 = arith.mulf %321, %318 : vector<8x128xf32>
    %cst_107 = arith.constant 1.000000e+00 : f32
    %323 = vector.broadcast %cst_107 : f32 to vector<8x1xf32>
    %324 = arith.subf %323, %288 : vector<8x1xf32>
    %325 = vector.broadcast %324 : vector<8x1xf32> to vector<8x128xf32>
    %326 = arith.mulf %325, %290 : vector<8x128xf32>
    %327 = arith.addf %322, %326 : vector<8x128xf32>
    %c0_108 = arith.constant 0 : index
    %c0_109 = arith.constant 0 : index
    %328 = vector.load %arg12[%c0_108, %c0_109] : memref<8x128xf32, #tpu.memory_space<vmem>>, vector<8x128xf32>
    tpu.vector_store %arg12[%c0_108, %c0_109], %327 {strides = array<i32>} : memref<8x128xf32, #tpu.memory_space<vmem>>, vector<8x128xf32>,
    %329 = vector.broadcast %288 : vector<8x1xf32> to vector<8x128xf32>
    %330 = arith.mulf %329, %320 : vector<8x128xf32>
    %cst_110 = arith.constant 1.000000e+00 : f32
    %331 = vector.broadcast %cst_110 : f32 to vector<8x1xf32>
    %332 = arith.subf %331, %288 : vector<8x1xf32>
    %333 = vector.broadcast %332 : vector<8x1xf32> to vector<8x128xf32>
    %334 = arith.mulf %333, %289 : vector<8x128xf32>
    %335 = arith.addf %330, %334 : vector<8x128xf32>
    %c0_111 = arith.constant 0 : index
    %c0_112 = arith.constant 0 : index
    %336 = vector.load %arg11[%c0_111, %c0_112] : memref<8x128xf32, #tpu.memory_space<vmem>>, vector<8x128xf32>
    tpu.vector_store %arg11[%c0_111, %c0_112], %335 {strides = array<i32>} : memref<8x128xf32, #tpu.memory_space<vmem>>, vector<8x128xf32>,
    %337 = vector.broadcast %288 : vector<8x1xf32> to vector<8x128xf32>
    %338 = arith.mulf %337, %320 : vector<8x128xf32>
    %339 = arith.index_cast %284 : i32 to index
    %c0_113 = arith.constant 0 : index
    %340 = vector.load %arg8[%339, %c0_113] : memref<64x128xf32, #tpu.memory_space<vmem>>, vector<8x128xf32>
    tpu.vector_store %arg8[%339, %c0_113], %338 {strides = array<i32>} : memref<64x128xf32, #tpu.memory_space<vmem>>, vector<8x128xf32>,
    %341 = arith.index_cast %284 : i32 to index
    %c0_114 = arith.constant 0 : index
    %342 = vector.load %arg14[%341, %c0_114] : memref<64x128xf32, #tpu.memory_space<vmem>>, vector<8x128xf32>
    %343 = vector.broadcast %288 : vector<8x1xf32> to vector<8x128xf32>
    %344 = arith.mulf %343, %342 : vector<8x128xf32>
    %345 = arith.index_cast %284 : i32 to index
    %c0_115 = arith.constant 0 : index
    %346 = vector.load %arg10[%345, %c0_115] : memref<64x128xf32, #tpu.memory_space<vmem>>, vector<8x128xf32>
    tpu.vector_store %arg10[%345, %c0_115], %344 {strides = array<i32>} : memref<64x128xf32, #tpu.memory_space<vmem>>, vector<8x128xf32>,
    %c5_i32 = arith.constant 5 : i32
    %347 = arith.addi %0, %c5_i32 : i32
    %c8_i32_116 = arith.constant 8 : i32
    %348 = arith.muli %c5_i32, %c8_i32_116 : i32
    %349 = tpu.assume_multiple %348, 8 : i32
    %350 = vector.broadcast %347 : i32 to vector<8x1xi32>
    %351 = arith.cmpi sgt, %20, %350 : vector<8x1xi32>
    %352 = arith.extui %351 : vector<8x1xi1> to vector<8x1xi32>
    %353 = arith.sitofp %352 : vector<8x1xi32> to vector<8x1xf32>
    %c0_117 = arith.constant 0 : index
    %c0_118 = arith.constant 0 : index
    %354 = vector.load %arg11[%c0_117, %c0_118] : memref<8x128xf32, #tpu.memory_space<vmem>>, vector<8x128xf32>
    %c0_119 = arith.constant 0 : index
    %c0_120 = arith.constant 0 : index
    %355 = vector.load %arg12[%c0_119, %c0_120] : memref<8x128xf32, #tpu.memory_space<vmem>>, vector<8x128xf32>
    %356 = arith.index_cast %349 : i32 to index
    %c0_121 = arith.constant 0 : index
    %357 = vector.load %arg13[%356, %c0_121] : memref<64x512xf32, #tpu.memory_space<vmem>>, vector<8x512xf32>
    %358 = arith.truncf %354 : vector<8x128xf32> to vector<8x128xbf16>
    %cst_122 = arith.constant dense<0.000000e+00> : vector<8x512xf32>
    %359 = tpu.matmul %358, %21, %cst_122 {dimension_numbers = #tpu.dot_dimension_numbers<[1], [0], [0], [1], [0, 0, 1, 1], [], []>} : vector<8x128xbf16>, vector<128x512xbf16>, vector<8x512xf32> -> vector<8x512xf32>
    %360 = arith.addf %357, %359 : vector<8x512xf32>
    %361 = vector.extract_strided_slice %360 {offsets = [0, 0], sizes = [8, 128], strides = [1, 1]} : vector<8x512xf32> to vector<8x128xf32>
    %362 = arith.negf %361 : vector<8x128xf32>
    %363 = math.exp %362 : vector<8x128xf32>
    %cst_123 = arith.constant 1.000000e+00 : f32
    %364 = vector.broadcast %cst_123 : f32 to vector<8x128xf32>
    %365 = arith.addf %364, %363 : vector<8x128xf32>
    %366 = arith.divf %364, %365 : vector<8x128xf32>
    %367 = vector.extract_strided_slice %360 {offsets = [0, 128], sizes = [8, 128], strides = [1, 1]} : vector<8x512xf32> to vector<8x128xf32>
    %368 = arith.negf %367 : vector<8x128xf32>
    %369 = math.exp %368 : vector<8x128xf32>
    %cst_124 = arith.constant 1.000000e+00 : f32
    %370 = vector.broadcast %cst_124 : f32 to vector<8x128xf32>
    %371 = arith.addf %370, %369 : vector<8x128xf32>
    %372 = arith.divf %370, %371 : vector<8x128xf32>
    %373 = vector.extract_strided_slice %360 {offsets = [0, 256], sizes = [8, 128], strides = [1, 1]} : vector<8x512xf32> to vector<8x128xf32>
    %374 = math.tanh %373 : vector<8x128xf32>
    %375 = vector.extract_strided_slice %360 {offsets = [0, 384], sizes = [8, 128], strides = [1, 1]} : vector<8x512xf32> to vector<8x128xf32>
    %376 = arith.negf %375 : vector<8x128xf32>
    %377 = math.exp %376 : vector<8x128xf32>
    %cst_125 = arith.constant 1.000000e+00 : f32
    %378 = vector.broadcast %cst_125 : f32 to vector<8x128xf32>
    %379 = arith.addf %378, %377 : vector<8x128xf32>
    %380 = arith.divf %378, %379 : vector<8x128xf32>
    %381 = arith.mulf %372, %355 : vector<8x128xf32>
    %382 = arith.mulf %366, %374 : vector<8x128xf32>
    %383 = arith.addf %381, %382 : vector<8x128xf32>
    %384 = math.tanh %383 : vector<8x128xf32>
    %385 = arith.mulf %380, %384 : vector<8x128xf32>
    %386 = vector.broadcast %353 : vector<8x1xf32> to vector<8x128xf32>
    %387 = arith.mulf %386, %383 : vector<8x128xf32>
    %cst_126 = arith.constant 1.000000e+00 : f32
    %388 = vector.broadcast %cst_126 : f32 to vector<8x1xf32>
    %389 = arith.subf %388, %353 : vector<8x1xf32>
    %390 = vector.broadcast %389 : vector<8x1xf32> to vector<8x128xf32>
    %391 = arith.mulf %390, %355 : vector<8x128xf32>
    %392 = arith.addf %387, %391 : vector<8x128xf32>
    %c0_127 = arith.constant 0 : index
    %c0_128 = arith.constant 0 : index
    %393 = vector.load %arg12[%c0_127, %c0_128] : memref<8x128xf32, #tpu.memory_space<vmem>>, vector<8x128xf32>
    tpu.vector_store %arg12[%c0_127, %c0_128], %392 {strides = array<i32>} : memref<8x128xf32, #tpu.memory_space<vmem>>, vector<8x128xf32>,
    %394 = vector.broadcast %353 : vector<8x1xf32> to vector<8x128xf32>
    %395 = arith.mulf %394, %385 : vector<8x128xf32>
    %cst_129 = arith.constant 1.000000e+00 : f32
    %396 = vector.broadcast %cst_129 : f32 to vector<8x1xf32>
    %397 = arith.subf %396, %353 : vector<8x1xf32>
    %398 = vector.broadcast %397 : vector<8x1xf32> to vector<8x128xf32>
    %399 = arith.mulf %398, %354 : vector<8x128xf32>
    %400 = arith.addf %395, %399 : vector<8x128xf32>
    %c0_130 = arith.constant 0 : index
    %c0_131 = arith.constant 0 : index
    %401 = vector.load %arg11[%c0_130, %c0_131] : memref<8x128xf32, #tpu.memory_space<vmem>>, vector<8x128xf32>
    tpu.vector_store %arg11[%c0_130, %c0_131], %400 {strides = array<i32>} : memref<8x128xf32, #tpu.memory_space<vmem>>, vector<8x128xf32>,
    %402 = vector.broadcast %353 : vector<8x1xf32> to vector<8x128xf32>
    %403 = arith.mulf %402, %385 : vector<8x128xf32>
    %404 = arith.index_cast %349 : i32 to index
    %c0_132 = arith.constant 0 : index
    %405 = vector.load %arg8[%404, %c0_132] : memref<64x128xf32, #tpu.memory_space<vmem>>, vector<8x128xf32>
    tpu.vector_store %arg8[%404, %c0_132], %403 {strides = array<i32>} : memref<64x128xf32, #tpu.memory_space<vmem>>, vector<8x128xf32>,
    %406 = arith.index_cast %349 : i32 to index
    %c0_133 = arith.constant 0 : index
    %407 = vector.load %arg14[%406, %c0_133] : memref<64x128xf32, #tpu.memory_space<vmem>>, vector<8x128xf32>
    %408 = vector.broadcast %353 : vector<8x1xf32> to vector<8x128xf32>
    %409 = arith.mulf %408, %407 : vector<8x128xf32>
    %410 = arith.index_cast %349 : i32 to index
    %c0_134 = arith.constant 0 : index
    %411 = vector.load %arg10[%410, %c0_134] : memref<64x128xf32, #tpu.memory_space<vmem>>, vector<8x128xf32>
    tpu.vector_store %arg10[%410, %c0_134], %409 {strides = array<i32>} : memref<64x128xf32, #tpu.memory_space<vmem>>, vector<8x128xf32>,
    %c6_i32 = arith.constant 6 : i32
    %412 = arith.addi %0, %c6_i32 : i32
    %c8_i32_135 = arith.constant 8 : i32
    %413 = arith.muli %c6_i32, %c8_i32_135 : i32
    %414 = tpu.assume_multiple %413, 8 : i32
    %415 = vector.broadcast %412 : i32 to vector<8x1xi32>
    %416 = arith.cmpi sgt, %20, %415 : vector<8x1xi32>
    %417 = arith.extui %416 : vector<8x1xi1> to vector<8x1xi32>
    %418 = arith.sitofp %417 : vector<8x1xi32> to vector<8x1xf32>
    %c0_136 = arith.constant 0 : index
    %c0_137 = arith.constant 0 : index
    %419 = vector.load %arg11[%c0_136, %c0_137] : memref<8x128xf32, #tpu.memory_space<vmem>>, vector<8x128xf32>
    %c0_138 = arith.constant 0 : index
    %c0_139 = arith.constant 0 : index
    %420 = vector.load %arg12[%c0_138, %c0_139] : memref<8x128xf32, #tpu.memory_space<vmem>>, vector<8x128xf32>
    %421 = arith.index_cast %414 : i32 to index
    %c0_140 = arith.constant 0 : index
    %422 = vector.load %arg13[%421, %c0_140] : memref<64x512xf32, #tpu.memory_space<vmem>>, vector<8x512xf32>
    %423 = arith.truncf %419 : vector<8x128xf32> to vector<8x128xbf16>
    %cst_141 = arith.constant dense<0.000000e+00> : vector<8x512xf32>
    %424 = tpu.matmul %423, %21, %cst_141 {dimension_numbers = #tpu.dot_dimension_numbers<[1], [0], [0], [1], [0, 0, 1, 1], [], []>} : vector<8x128xbf16>, vector<128x512xbf16>, vector<8x512xf32> -> vector<8x512xf32>
    %425 = arith.addf %422, %424 : vector<8x512xf32>
    %426 = vector.extract_strided_slice %425 {offsets = [0, 0], sizes = [8, 128], strides = [1, 1]} : vector<8x512xf32> to vector<8x128xf32>
    %427 = arith.negf %426 : vector<8x128xf32>
    %428 = math.exp %427 : vector<8x128xf32>
    %cst_142 = arith.constant 1.000000e+00 : f32
    %429 = vector.broadcast %cst_142 : f32 to vector<8x128xf32>
    %430 = arith.addf %429, %428 : vector<8x128xf32>
    %431 = arith.divf %429, %430 : vector<8x128xf32>
    %432 = vector.extract_strided_slice %425 {offsets = [0, 128], sizes = [8, 128], strides = [1, 1]} : vector<8x512xf32> to vector<8x128xf32>
    %433 = arith.negf %432 : vector<8x128xf32>
    %434 = math.exp %433 : vector<8x128xf32>
    %cst_143 = arith.constant 1.000000e+00 : f32
    %435 = vector.broadcast %cst_143 : f32 to vector<8x128xf32>
    %436 = arith.addf %435, %434 : vector<8x128xf32>
    %437 = arith.divf %435, %436 : vector<8x128xf32>
    %438 = vector.extract_strided_slice %425 {offsets = [0, 256], sizes = [8, 128], strides = [1, 1]} : vector<8x512xf32> to vector<8x128xf32>
    %439 = math.tanh %438 : vector<8x128xf32>
    %440 = vector.extract_strided_slice %425 {offsets = [0, 384], sizes = [8, 128], strides = [1, 1]} : vector<8x512xf32> to vector<8x128xf32>
    %441 = arith.negf %440 : vector<8x128xf32>
    %442 = math.exp %441 : vector<8x128xf32>
    %cst_144 = arith.constant 1.000000e+00 : f32
    %443 = vector.broadcast %cst_144 : f32 to vector<8x128xf32>
    %444 = arith.addf %443, %442 : vector<8x128xf32>
    %445 = arith.divf %443, %444 : vector<8x128xf32>
    %446 = arith.mulf %437, %420 : vector<8x128xf32>
    %447 = arith.mulf %431, %439 : vector<8x128xf32>
    %448 = arith.addf %446, %447 : vector<8x128xf32>
    %449 = math.tanh %448 : vector<8x128xf32>
    %450 = arith.mulf %445, %449 : vector<8x128xf32>
    %451 = vector.broadcast %418 : vector<8x1xf32> to vector<8x128xf32>
    %452 = arith.mulf %451, %448 : vector<8x128xf32>
    %cst_145 = arith.constant 1.000000e+00 : f32
    %453 = vector.broadcast %cst_145 : f32 to vector<8x1xf32>
    %454 = arith.subf %453, %418 : vector<8x1xf32>
    %455 = vector.broadcast %454 : vector<8x1xf32> to vector<8x128xf32>
    %456 = arith.mulf %455, %420 : vector<8x128xf32>
    %457 = arith.addf %452, %456 : vector<8x128xf32>
    %c0_146 = arith.constant 0 : index
    %c0_147 = arith.constant 0 : index
    %458 = vector.load %arg12[%c0_146, %c0_147] : memref<8x128xf32, #tpu.memory_space<vmem>>, vector<8x128xf32>
    tpu.vector_store %arg12[%c0_146, %c0_147], %457 {strides = array<i32>} : memref<8x128xf32, #tpu.memory_space<vmem>>, vector<8x128xf32>,
    %459 = vector.broadcast %418 : vector<8x1xf32> to vector<8x128xf32>
    %460 = arith.mulf %459, %450 : vector<8x128xf32>
    %cst_148 = arith.constant 1.000000e+00 : f32
    %461 = vector.broadcast %cst_148 : f32 to vector<8x1xf32>
    %462 = arith.subf %461, %418 : vector<8x1xf32>
    %463 = vector.broadcast %462 : vector<8x1xf32> to vector<8x128xf32>
    %464 = arith.mulf %463, %419 : vector<8x128xf32>
    %465 = arith.addf %460, %464 : vector<8x128xf32>
    %c0_149 = arith.constant 0 : index
    %c0_150 = arith.constant 0 : index
    %466 = vector.load %arg11[%c0_149, %c0_150] : memref<8x128xf32, #tpu.memory_space<vmem>>, vector<8x128xf32>
    tpu.vector_store %arg11[%c0_149, %c0_150], %465 {strides = array<i32>} : memref<8x128xf32, #tpu.memory_space<vmem>>, vector<8x128xf32>,
    %467 = vector.broadcast %418 : vector<8x1xf32> to vector<8x128xf32>
    %468 = arith.mulf %467, %450 : vector<8x128xf32>
    %469 = arith.index_cast %414 : i32 to index
    %c0_151 = arith.constant 0 : index
    %470 = vector.load %arg8[%469, %c0_151] : memref<64x128xf32, #tpu.memory_space<vmem>>, vector<8x128xf32>
    tpu.vector_store %arg8[%469, %c0_151], %468 {strides = array<i32>} : memref<64x128xf32, #tpu.memory_space<vmem>>, vector<8x128xf32>,
    %471 = arith.index_cast %414 : i32 to index
    %c0_152 = arith.constant 0 : index
    %472 = vector.load %arg14[%471, %c0_152] : memref<64x128xf32, #tpu.memory_space<vmem>>, vector<8x128xf32>
    %473 = vector.broadcast %418 : vector<8x1xf32> to vector<8x128xf32>
    %474 = arith.mulf %473, %472 : vector<8x128xf32>
    %475 = arith.index_cast %414 : i32 to index
    %c0_153 = arith.constant 0 : index
    %476 = vector.load %arg10[%475, %c0_153] : memref<64x128xf32, #tpu.memory_space<vmem>>, vector<8x128xf32>
    tpu.vector_store %arg10[%475, %c0_153], %474 {strides = array<i32>} : memref<64x128xf32, #tpu.memory_space<vmem>>, vector<8x128xf32>,
    %c7_i32 = arith.constant 7 : i32
    %477 = arith.addi %0, %c7_i32 : i32
    %c8_i32_154 = arith.constant 8 : i32
    %478 = arith.muli %c7_i32, %c8_i32_154 : i32
    %479 = tpu.assume_multiple %478, 8 : i32
    %480 = vector.broadcast %477 : i32 to vector<8x1xi32>
    %481 = arith.cmpi sgt, %20, %480 : vector<8x1xi32>
    %482 = arith.extui %481 : vector<8x1xi1> to vector<8x1xi32>
    %483 = arith.sitofp %482 : vector<8x1xi32> to vector<8x1xf32>
    %c0_155 = arith.constant 0 : index
    %c0_156 = arith.constant 0 : index
    %484 = vector.load %arg11[%c0_155, %c0_156] : memref<8x128xf32, #tpu.memory_space<vmem>>, vector<8x128xf32>
    %c0_157 = arith.constant 0 : index
    %c0_158 = arith.constant 0 : index
    %485 = vector.load %arg12[%c0_157, %c0_158] : memref<8x128xf32, #tpu.memory_space<vmem>>, vector<8x128xf32>
    %486 = arith.index_cast %479 : i32 to index
    %c0_159 = arith.constant 0 : index
    %487 = vector.load %arg13[%486, %c0_159] : memref<64x512xf32, #tpu.memory_space<vmem>>, vector<8x512xf32>
    %488 = arith.truncf %484 : vector<8x128xf32> to vector<8x128xbf16>
    %cst_160 = arith.constant dense<0.000000e+00> : vector<8x512xf32>
    %489 = tpu.matmul %488, %21, %cst_160 {dimension_numbers = #tpu.dot_dimension_numbers<[1], [0], [0], [1], [0, 0, 1, 1], [], []>} : vector<8x128xbf16>, vector<128x512xbf16>, vector<8x512xf32> -> vector<8x512xf32>
    %490 = arith.addf %487, %489 : vector<8x512xf32>
    %491 = vector.extract_strided_slice %490 {offsets = [0, 0], sizes = [8, 128], strides = [1, 1]} : vector<8x512xf32> to vector<8x128xf32>
    %492 = arith.negf %491 : vector<8x128xf32>
    %493 = math.exp %492 : vector<8x128xf32>
    %cst_161 = arith.constant 1.000000e+00 : f32
    %494 = vector.broadcast %cst_161 : f32 to vector<8x128xf32>
    %495 = arith.addf %494, %493 : vector<8x128xf32>
    %496 = arith.divf %494, %495 : vector<8x128xf32>
    %497 = vector.extract_strided_slice %490 {offsets = [0, 128], sizes = [8, 128], strides = [1, 1]} : vector<8x512xf32> to vector<8x128xf32>
    %498 = arith.negf %497 : vector<8x128xf32>
    %499 = math.exp %498 : vector<8x128xf32>
    %cst_162 = arith.constant 1.000000e+00 : f32
    %500 = vector.broadcast %cst_162 : f32 to vector<8x128xf32>
    %501 = arith.addf %500, %499 : vector<8x128xf32>
    %502 = arith.divf %500, %501 : vector<8x128xf32>
    %503 = vector.extract_strided_slice %490 {offsets = [0, 256], sizes = [8, 128], strides = [1, 1]} : vector<8x512xf32> to vector<8x128xf32>
    %504 = math.tanh %503 : vector<8x128xf32>
    %505 = vector.extract_strided_slice %490 {offsets = [0, 384], sizes = [8, 128], strides = [1, 1]} : vector<8x512xf32> to vector<8x128xf32>
    %506 = arith.negf %505 : vector<8x128xf32>
    %507 = math.exp %506 : vector<8x128xf32>
    %cst_163 = arith.constant 1.000000e+00 : f32
    %508 = vector.broadcast %cst_163 : f32 to vector<8x128xf32>
    %509 = arith.addf %508, %507 : vector<8x128xf32>
    %510 = arith.divf %508, %509 : vector<8x128xf32>
    %511 = arith.mulf %502, %485 : vector<8x128xf32>
    %512 = arith.mulf %496, %504 : vector<8x128xf32>
    %513 = arith.addf %511, %512 : vector<8x128xf32>
    %514 = math.tanh %513 : vector<8x128xf32>
    %515 = arith.mulf %510, %514 : vector<8x128xf32>
    %516 = vector.broadcast %483 : vector<8x1xf32> to vector<8x128xf32>
    %517 = arith.mulf %516, %513 : vector<8x128xf32>
    %cst_164 = arith.constant 1.000000e+00 : f32
    %518 = vector.broadcast %cst_164 : f32 to vector<8x1xf32>
    %519 = arith.subf %518, %483 : vector<8x1xf32>
    %520 = vector.broadcast %519 : vector<8x1xf32> to vector<8x128xf32>
    %521 = arith.mulf %520, %485 : vector<8x128xf32>
    %522 = arith.addf %517, %521 : vector<8x128xf32>
    %c0_165 = arith.constant 0 : index
    %c0_166 = arith.constant 0 : index
    %523 = vector.load %arg12[%c0_165, %c0_166] : memref<8x128xf32, #tpu.memory_space<vmem>>, vector<8x128xf32>
    tpu.vector_store %arg12[%c0_165, %c0_166], %522 {strides = array<i32>} : memref<8x128xf32, #tpu.memory_space<vmem>>, vector<8x128xf32>,
    %524 = vector.broadcast %483 : vector<8x1xf32> to vector<8x128xf32>
    %525 = arith.mulf %524, %515 : vector<8x128xf32>
    %cst_167 = arith.constant 1.000000e+00 : f32
    %526 = vector.broadcast %cst_167 : f32 to vector<8x1xf32>
    %527 = arith.subf %526, %483 : vector<8x1xf32>
    %528 = vector.broadcast %527 : vector<8x1xf32> to vector<8x128xf32>
    %529 = arith.mulf %528, %484 : vector<8x128xf32>
    %530 = arith.addf %525, %529 : vector<8x128xf32>
    %c0_168 = arith.constant 0 : index
    %c0_169 = arith.constant 0 : index
    %531 = vector.load %arg11[%c0_168, %c0_169] : memref<8x128xf32, #tpu.memory_space<vmem>>, vector<8x128xf32>
    tpu.vector_store %arg11[%c0_168, %c0_169], %530 {strides = array<i32>} : memref<8x128xf32, #tpu.memory_space<vmem>>, vector<8x128xf32>,
    %532 = vector.broadcast %483 : vector<8x1xf32> to vector<8x128xf32>
    %533 = arith.mulf %532, %515 : vector<8x128xf32>
    %534 = arith.index_cast %479 : i32 to index
    %c0_170 = arith.constant 0 : index
    %535 = vector.load %arg8[%534, %c0_170] : memref<64x128xf32, #tpu.memory_space<vmem>>, vector<8x128xf32>
    tpu.vector_store %arg8[%534, %c0_170], %533 {strides = array<i32>} : memref<64x128xf32, #tpu.memory_space<vmem>>, vector<8x128xf32>,
    %536 = arith.index_cast %479 : i32 to index
    %c0_171 = arith.constant 0 : index
    %537 = vector.load %arg14[%536, %c0_171] : memref<64x128xf32, #tpu.memory_space<vmem>>, vector<8x128xf32>
    %538 = vector.broadcast %483 : vector<8x1xf32> to vector<8x128xf32>
    %539 = arith.mulf %538, %537 : vector<8x128xf32>
    %540 = arith.index_cast %479 : i32 to index
    %c0_172 = arith.constant 0 : index
    %541 = vector.load %arg10[%540, %c0_172] : memref<64x128xf32, #tpu.memory_space<vmem>>, vector<8x128xf32>
    tpu.vector_store %arg10[%540, %c0_172], %539 {strides = array<i32>} : memref<64x128xf32, #tpu.memory_space<vmem>>, vector<8x128xf32>,
    %c8_i32_173 = arith.constant 8 : i32
    %c0_174 = arith.constant 0 : index
    %c0_175 = arith.constant 0 : index
    %542 = vector.load %arg11[%c0_174, %c0_175] : memref<8x128xf32, #tpu.memory_space<vmem>>, vector<8x128xf32>
    %c0_176 = arith.constant 0 : index
    %c0_177 = arith.constant 0 : index
    %543 = vector.load %arg9[%c0_176, %c0_177] : memref<8x128xf32, #tpu.memory_space<vmem>>, vector<8x128xf32>
    tpu.vector_store %arg9[%c0_176, %c0_177], %542 {strides = array<i32>} : memref<8x128xf32, #tpu.memory_space<vmem>>, vector<8x128xf32>,
    return
  }
  func.func @transform_0(%arg0: i32) -> (i32, i32) {
    %c0_i32 = arith.constant 0 : i32
    %c0_i32_0 = arith.constant 0 : i32
    return %arg0, %c0_i32 : i32, i32
  }
  func.func @transform_1(%arg0: i32) -> (i32, i32) {
    %c0_i32 = arith.constant 0 : i32
    %c0_i32_0 = arith.constant 0 : i32
    %c0_i32_1 = arith.constant 0 : i32
    return %c0_i32, %c0_i32_0 : i32, i32
  }
  func.func @transform_2(%arg0: i32) -> (i32, i32) {
    %c0_i32 = arith.constant 0 : i32
    %c0_i32_0 = arith.constant 0 : i32
    %c0_i32_1 = arith.constant 0 : i32
    return %c0_i32, %c0_i32_0 : i32, i32
  }
  func.func @transform_3(%arg0: i32) -> (i32, i32) {
    %c0_i32 = arith.constant 0 : i32
    %c0_i32_0 = arith.constant 0 : i32
    %c0_i32_1 = arith.constant 0 : i32
    return %c0_i32, %c0_i32_0 : i32, i32
  }
  func.func @transform_4(%arg0: i32) -> (i32, i32) {
    %c0_i32 = arith.constant 0 : i32
    %c0_i32_0 = arith.constant 0 : i32
    %c0_i32_1 = arith.constant 0 : i32
    return %c0_i32, %c0_i32_0 : i32, i32
  }
  func.func @transform_5(%arg0: i32) -> (i32, i32) {
    %c0_i32 = arith.constant 0 : i32
    %c0_i32_0 = arith.constant 0 : i32
    %c0_i32_1 = arith.constant 0 : i32
    return %c0_i32, %c0_i32_0 : i32, i32
  }
  func.func @transform_6(%arg0: i32) -> (i32, i32) {
    %c0_i32 = arith.constant 0 : i32
    %c0_i32_0 = arith.constant 0 : i32
    %c0_i32_1 = arith.constant 0 : i32
    return %c0_i32, %c0_i32_0 : i32, i32
  }
  func.func @transform_7(%arg0: i32) -> (i32, i32) {
    %c0_i32 = arith.constant 0 : i32
    %c0_i32_0 = arith.constant 0 : i32
    return %arg0, %c0_i32 : i32, i32
  }
  func.func @transform_8(%arg0: i32) -> (i32, i32) {
    %c0_i32 = arith.constant 0 : i32
    %c0_i32_0 = arith.constant 0 : i32
    %c0_i32_1 = arith.constant 0 : i32
    return %c0_i32, %c0_i32_0 : i32, i32
  }
  func.func @transform_9(%arg0: i32) -> (i32, i32) {
    %c0_i32 = arith.constant 0 : i32
    %c0_i32_0 = arith.constant 0 : i32
    return %arg0, %c0_i32 : i32, i32
  }
}

</mosaic_0001>

<bundles_post_ra>
// kernel: tpu_custom_call.1
= control target key start
LH: loop header
LB: loop body
LE: loop exit
PB: predicated region body
PF: predicated region fallthrough
CT: control target
= control target key end

     0   :  { %15 = vsyncpa [#allocation7], 0  ;;  %s3876_s0 = inlined_call_operand.hbm [shape: bf16[64,320], index: 0, kind: input, shape index: {}]   ;;  %s3877_s1 = inlined_call_operand.vmem [shape: s32[8,1], index: 1, kind: input, shape index: {}]   ;;  %s3878_s2 = inlined_call_operand.hbm [shape: bf16[320,128], index: 2, kind: input, shape index: {}]   ;;  %s3879_s3 = inlined_call_operand.vmem [shape: f32[1,128], index: 3, kind: input, shape index: {}]   ;;  %s3880_s4 = inlined_call_operand.hbm [shape: bf16[128,512], index: 4, kind: input, shape index: {}]   ;;  %s3881_s5 = inlined_call_operand.hbm [shape: bf16[128,512], index: 5, kind: input, shape index: {}]   ;;  %s3882_s6 = inlined_call_operand.vmem [shape: f32[1,512], index: 6, kind: input, shape index: {}]   ;;  %s3883_s7 = inlined_call_operand.hbm [shape: f32[64,128], index: 7, kind: output, shape index: {0}]   ;;  %s3884_s8 = inlined_call_operand.hbm [shape: f32[8,128], index: 8, kind: output, shape index: {1}]   ;;  %s3885_s9 = inlined_call_operand.hbm [shape: f32[64,128], index: 9, kind: output, shape index: {2}]  }
   0x1   :  { %16 = vsyncpa [#allocation10], 0 }
   0x2   :  { %17 = vsyncpa [#allocation13], 0 }
   0x3   :  { %18 = vsyncpa [#allocation8], 0 }
   0x4   :  { %19 = vsyncpa [#allocation16], 0  ;;  %s3019_s30 = smov [#allocation9]   ;;  %s2855_s13 = scalar_lea.hbm %s3878_s2, 2560 }
   0x5   :  { %s39_s10 = sshll.u32 %s3019_s30, 4  ;;  %p2856_p0 = scmp.ne.s32.totalorder %s3878_s2, %s2855_s13  ;;  %s40_s10 = int_to_ptr.vmem [resolvable:$true] %s39_s10 }
   0x6   :  { %p2859_p1 = scmp.lt.u32.totalorder %s2855_s13, %s3878_s2 }
   0x8   :  { %p2861_p2 = pnand %p2859_p1, %p2856_p0 }
   0xa   :  { %2864 = shalt.err (!%p2861_p2)
}
   0xb   :  { %s2865_s18 = scalar_lea.vmem %s40_s10, 2560  ;;  %p2870_p4 = scmp.lt.s32.totalorder %s40_s10, %s40_s10 }
   0xc   :  { %p2866_p3 = scmp.ne.s32.totalorder %s40_s10, %s2865_s18  ;;  %p2871_p5 = scmp.lt.s32.totalorder %s2865_s18, %s2865_s18 }
   0xe   :  { %p2872_p6 = por %p2871_p5, %p2870_p4 }
  0x10   :  { %p2873_p7 = pnand %p2872_p6, %p2866_p3 }
  0x12   :  { %2876 = shalt.err (!%p2873_p7)
}
  0x13   :  { %s3020_s19 = smov 64   ;;  %s3021_s20 = smov 4  }
  0x14   :  { %45 = dma.hbm_to_vmem [thread:$0]  %s3878_s2, 2560, %s40_s10, [#allocation10], %s3020_s19, %s3020_s19, %s3021_s20  }
  0x15   :  { %s3022_s23 = smov [#allocation6]   ;;  %s2877_s27 = scalar_lea.hbm %s3876_s0, 1536 }
  0x16   :  { %s25_s24 = sshll.u32 %s3022_s23, 4  ;;  %p2878_p8 = scmp.ne.s32.totalorder %s3876_s0, %s2877_s27  ;;  %s26_s24 = int_to_ptr.vmem [resolvable:$true] %s25_s24 }
  0x17   :  { %p2881_p9 = scmp.lt.u32.totalorder %s2877_s27, %s3876_s0 }
  0x19   :  { %p2883_p10 = pnand %p2881_p9, %p2878_p8 }
  0x1b   :  { %2886 = shalt.err (!%p2883_p10)
}
  0x1c   :  { %s2887_s12 = scalar_lea.vmem %s26_s24, 1536  ;;  %p2892_p12 = scmp.lt.s32.totalorder %s26_s24, %s26_s24 }
  0x1d   :  { %p2888_p11 = scmp.ne.s32.totalorder %s26_s24, %s2887_s12  ;;  %p2893_p13 = scmp.lt.s32.totalorder %s2887_s12, %s2887_s12 }
  0x1f   :  { %p2894_p0 = por %p2893_p13, %p2892_p12 }
  0x21   :  { %p2895_p1 = pnand %p2894_p0, %p2888_p11 }
  0x23   :  { %2898 = shalt.err (!%p2895_p1)
}
  0x24   :  { %s3023_s2 = smov 192   ;;  %s3024_s10 = smov 12  }
  0x25   :  { %31 = dma.hbm_to_vmem [thread:$0]  %s3876_s0, 1536, %s26_s24, [#allocation7], %s3023_s2, %s3023_s2, %s3024_s10  }
  0x26   :  { %s3025_s15 = smov [#allocation11]   ;;  %s2899_s19 = scalar_lea.hbm %s3880_s4, 4096 }
  0x27   :  { %s53_s16 = sshll.u32 %s3025_s15, 4  ;;  %p2900_p2 = scmp.ne.s32.totalorder %s3880_s4, %s2899_s19  ;;  %s54_s16 = int_to_ptr.vmem [resolvable:$true] %s53_s16 }
  0x28   :  { %p2903_p3 = scmp.lt.u32.totalorder %s2899_s19, %s3880_s4 }
  0x2a   :  { %p2905_p4 = pnand %p2903_p3, %p2900_p2 }
  0x2c   :  { %2908 = shalt.err (!%p2905_p4)
}
  0x2d   :  { %s2909_s25 = scalar_lea.vmem %s54_s16, 4096  ;;  %p2914_p6 = scmp.lt.s32.totalorder %s54_s16, %s54_s16 }
  0x2e   :  { %p2910_p5 = scmp.ne.s32.totalorder %s54_s16, %s2909_s25  ;;  %p2915_p7 = scmp.lt.s32.totalorder %s2909_s25, %s2909_s25 }
  0x30   :  { %p2916_p8 = por %p2915_p7, %p2914_p6 }
  0x32   :  { %p2917_p9 = pnand %p2916_p8, %p2910_p5 }
  0x34   :  { %2920 = shalt.err (!%p2917_p9)
}
  0x35   :  { %s3026_s0 = smov 256   ;;  %s3027_s24 = smov 16  }
  0x36   :  { %59 = dma.hbm_to_vmem [thread:$0]  %s3880_s4, 4096, %s54_s16, [#allocation10], %s3026_s0, %s3026_s0, %s3027_s24  }
  0x37   :  { %s3028_s28 = smov [#allocation12]   ;;  %s2921_s12 = scalar_lea.hbm %s3881_s5, 4096 }
  0x38   :  { %s65_s29 = sshll.u32 %s3028_s28, 4  ;;  %p2922_p10 = scmp.ne.s32.totalorder %s3881_s5, %s2921_s12  ;;  %s66_s29 = int_to_ptr.vmem [resolvable:$true] %s65_s29 }
  0x39   :  { %p2925_p11 = scmp.lt.u32.totalorder %s2921_s12, %s3881_s5 }
  0x3b   :  { %p2927_p12 = pnand %p2925_p11, %p2922_p10 }
  0x3d   :  { %2930 = shalt.err (!%p2927_p12)
}
  0x3e   :  { %s2931_s15 = scalar_lea.vmem %s66_s29, 4096  ;;  %p2936_p0 = scmp.lt.s32.totalorder %s66_s29, %s66_s29 }
  0x3f   :  { %p2932_p13 = scmp.ne.s32.totalorder %s66_s29, %s2931_s15  ;;  %p2937_p1 = scmp.lt.s32.totalorder %s2931_s15, %s2931_s15 }
  0x41   :  { %p2938_p2 = por %p2937_p1, %p2936_p0 }
  0x43   :  { %p2939_p3 = pnand %p2938_p2, %p2932_p13 }
  0x45   :  { %2942 = shalt.err (!%p2939_p3)
}
  0x46   :  { %71 = dma.hbm_to_vmem [thread:$0]  %s3881_s5, 4096, %s66_s29, [#allocation13], %s3026_s0, %s3026_s0, %s3027_s24  }
  0x47   :  { %3009 = dma.done.wait [#allocation7], 1536  }
  0x48   :  { %3010 = vsyncadd [#allocation7], 4294965760 }
  0x49   :  { %3011 = dma.done.wait [#allocation10], 6656  }
  0x4a   :  { %3012 = vsyncadd [#allocation10], 4294960640 }
  0x4b   :  { %3013 = dma.done.wait [#allocation13], 4096  }
  0x4c   :  { %3014 = vsyncadd [#allocation13], 4294963200  ;;  %v3886_v0 = vmov 0   ;;  %v2563_v1 = vld [vmem:[#allocation9 + $0x40] sm:$0xff]   ;;  %v2565_v3 = vld [vmem:[#allocation9 + $0x48] sm:$0xff]   ;;  %vm337_vm0 = vcmask 523264  }
  0x4d   :  { %2561 = vset.pattern.permute.xlu0 %v3886_v0  ;;  %2562 = vset.pattern.permute.xlu1 %v3886_v0  ;;  %v2564_v2 = vld [vmem:[#allocation9] sm:$0xff]   ;;  %v2566_v4 = vld [vmem:[#allocation9 + $0x8] sm:$0xff]   ;;  %v2567_v5 = vld [vmem:[#allocation9 + $0x50] sm:$0xff]   ;;  %v3030_v28 = vmov 0.0   ;;  %s3033_s21 = smov [#allocation15]   ;;  %s3034_s23 = smov [#allocation17]  }
  0x4e   :  { %2479 = vmatprep.subr.bf16.mxu0 %v2563_v1  ;;  %v2568_v6 = vld [vmem:[#allocation9 + $0x10] sm:$0xff]   ;;  %v2569_v7 = vld [vmem:[#allocation9 + $0x58] sm:$0xff]   ;;  %v2573_v8 = vld [vmem:[#allocation9 + $0x80] sm:$0xff]   ;;  %s2309_s22 = sshll.u32 %s3033_s21, 4  ;;  %s2318_s25 = sshll.u32 %s3034_s23, 4  ;;  %s3820_s22 = int_to_ptr.vmem [resolvable:$true] %s2309_s22  ;;  %s3822_s25 = int_to_ptr.vmem [resolvable:$true] %s2318_s25 }
  0x4f   :  { %2480 = vmatpush3.bf16.msra.mxu0 %v2564_v2  ;;  %v2570_v9 = vld [vmem:[#allocation9 + $0x18] sm:$0xff]   ;;  %v2571_v10 = vld [vmem:[#allocation9 + $0x60] sm:$0xff]   ;;  %2527 = vmatprep.subr.bf16.mxu1 %v2573_v8  ;;  %v2576_v11 = vld [vmem:[#allocation9 + $0x88] sm:$0xff]  }
  0x50   :  { %2481 = vmatprep.subr.bf16.mxu0 %v2565_v3  ;;  %2528 = vmatpush3.bf16.msra.mxu1 %v2573_v8  ;;  %v2572_v12 = vld [vmem:[#allocation9 + $0x20] sm:$0xff]   ;;  %v2574_v13 = vld [vmem:[#allocation9 + $0x68] sm:$0xff]   ;;  %v2579_v14 = vld [vmem:[#allocation9 + $0x90] sm:$0xff]  }
  0x51   :  { %2529 = vmatprep.subr.bf16.mxu1 %v2576_v11  ;;  %v2575_v15 = vld [vmem:[#allocation9 + $0x28] sm:$0xff]   ;;  %v2582_v16 = vld [vmem:[#allocation9 + $0x98] sm:$0xff]   ;;  %v2577_v17 = vld [vmem:[#allocation9 + $0x70] sm:$0xff]  }
  0x52   :  { %v2585_v18 = vld [vmem:[#allocation6 + $0x4] ss:$12 sps:$4 sm:$0xff]   ;;  %v2586_v19 = vld [vmem:[#allocation6 + $0x8] ss:$12 sps:$4 sm:$0xff]   ;;  %v2580_v21 = vld [vmem:[#allocation9 + $0x78] sm:$0xff]  }
  0x53   :  { %2482 = vmatpush3.bf16.msra.mxu0 %v2566_v4  ;;  %v2578_v20 = vld [vmem:[#allocation9 + $0x30] sm:$0xff]   ;;  %382 = vmatprep.mubr.bf16.mxu0 %v2585_v18  ;;  %v2587_v22 = vld [vmem:[#allocation6 + $0x20] ss:$12 sps:$4 sm:$0xff]   ;;  %v2594_v23 = vld [vmem:[#allocation6 + $0x38] ss:$12 sps:$4 sm:$0xff]  }
  0x54   :  { %2483 = vmatprep.subr.bf16.mxu0 %v2567_v5  ;;  %2530 = vmatpush3.bf16.msra.mxu1 %v2576_v11  ;;  %v2581_v24 = vld [vmem:[#allocation9 + $0x38] sm:$0xff]   ;;  %v3143_v25 = vld [vmem:[%s3877_s1] sm:$0xff]  ;;  %v2598_v2 = vld [vmem:[#allocation6 + $0x48] ss:$12 sps:$4 sm:$0xff]  }
  0x55   :  { %2531 = vmatprep.subr.bf16.mxu1 %v2579_v14  ;;  %2535 = vmatprep.mubr.msk.bf16.mxu1 %vm337_vm0, %v2586_v19  ;;  %v2583_v26 = vld [vmem:[#allocation6] ss:$12 sps:$4 sm:$0xff]   ;;  %vm926_vm1 = vcmp.gt.s32.totalorder %v3143_v25, 0  ;;  %vm1234_vm2 = vcmp.gt.s32.totalorder %v3143_v25, 1  ;;  %v2588_v27 = vld [vmem:[#allocation6 + $0x1c] ss:$12 sps:$4 sm:$0xff]  }
  0x56   :  { %v2415_v29 = vsel %vm926_vm1, 1.0, %v3030_v28  ;;  %v2451_v30 = vsel %vm1234_vm2, 1.0, %v3030_v28  ;;  %v2599_v31 = vld [vmem:[#allocation11] ss:$16 sps:$4 sm:$0xff]   ;;  %v2601_v34 = vld [vmem:[#allocation11 + $0x4] ss:$16 sps:$4 sm:$0xff]  }
  0x57   :  { %2484 = vmatpush3.bf16.msra.mxu0 %v2568_v6  ;;  %v2595_v32 = vld [vmem:[#allocation6 + $0x50] ss:$12 sps:$4 sm:$0xff]   ;;  %1211 = vperm.xlu0 %2561, %v2415_v29   ;;  %v1215_v33 = vsub.f32 1.0, %v2415_v29  ;;  %vm1385_vm3 = vcmp.gt.s32.totalorder %v3143_v25, 2  ;;  %v2602_v35 = vld [vmem:[#allocation11 + $0x8] ss:$16 sps:$4 sm:$0xff]  }
  0x58   :  { %2485 = vmatprep.subr.bf16.mxu0 %v2569_v7  ;;  %2532 = vmatpush3.bf16.msra.mxu1 %v2579_v14  ;;  %v1363_v36 = vsub.f32 1.0, %v2451_v30  ;;  %v2604_v37 = vld [vmem:[#allocation11 + $0xc] ss:$16 sps:$4 sm:$0xff]   ;;  %v2590_v38 = vld [vmem:[#allocation6 + $0x18] ss:$12 sps:$4 sm:$0xff]   ;;  %v2455_v42 = vsel %vm1385_vm3, 1.0, %v3030_v28 }
  0x59   :  { %2533 = vmatprep.subr.bf16.mxu1 %v2582_v16  ;;  %1359 = vperm.xlu1 %2562, %v2451_v30   ;;  %v2605_v39 = vld [vmem:[#allocation11 + $0x20] ss:$16 sps:$4 sm:$0xff]   ;;  %v2607_v40 = vld [vmem:[#allocation11 + $0x24] ss:$16 sps:$4 sm:$0xff]   ;;  %vm1536_vm4 = vcmp.gt.s32.totalorder %v3143_v25, 3  ;;  %v1514_v49 = vsub.f32 1.0, %v2455_v42 }
  0x5a   :  { %v2591_v41 = vld [vmem:[#allocation6 + $0x34] ss:$12 sps:$4 sm:$0xff]   ;;  %v2610_v43 = vld [vmem:[#allocation11 + $0x2c] ss:$16 sps:$4 sm:$0xff]   ;;  %v2608_v44 = vld [vmem:[#allocation11 + $0x28] ss:$16 sps:$4 sm:$0xff]  }
  0x5b   :  { %2486 = vmatpush3.bf16.msra.mxu0 %v2570_v9  ;;  %1218 = vperm.xlu0 %2561, %v1215_v33   ;;  %v2613_v45 = vld [vmem:[#allocation11 + $0x44] ss:$16 sps:$4 sm:$0xff]   ;;  %v2611_v46 = vld [vmem:[#allocation11 + $0x40] ss:$16 sps:$4 sm:$0xff]   ;;  %v2459_v47 = vsel %vm1536_vm4, 1.0, %v3030_v28  ;;  %vm1687_vm5 = vcmp.gt.s32.totalorder %v3143_v25, 4 }
  0x5c   :  { %2487 = vmatprep.subr.bf16.mxu0 %v2571_v10  ;;  %2534 = vmatpush3.bf16.msra.mxu1 %v2582_v16  ;;  %v2616_v48 = vld [vmem:[#allocation11 + $0x4c] ss:$16 sps:$4 sm:$0xff]   ;;  %v2619_v50 = vld [vmem:[#allocation11 + $0x64] ss:$16 sps:$4 sm:$0xff]   ;;  %v2614_v51 = vld [vmem:[#allocation11 + $0x48] ss:$16 sps:$4 sm:$0xff]  }
  0x5d   :  { %714 = vmatprep.subr.bf16.mxu1 %v2601_v34  ;;  %1366 = vperm.xlu1 %2562, %v1363_v36   ;;  %v2593_v52 = vld [vmem:[#allocation6 + $0x30] ss:$12 sps:$4 sm:$0xff]   ;;  %v2596_v55 = vld [vmem:[#allocation6 + $0x4c] ss:$12 sps:$4 sm:$0xff]   ;;  %v2463_v56 = vsel %vm1687_vm5, 1.0, %v3030_v28  ;;  %v1665_v59 = vsub.f32 1.0, %v2459_v47 }
  0x5e   :  { %v2617_v53 = vld [vmem:[#allocation11 + $0x60] ss:$16 sps:$4 sm:$0xff]   ;;  %v2622_v54 = vld [vmem:[#allocation11 + $0x6c] ss:$16 sps:$4 sm:$0xff]   ;;  %v2620_v57 = vld [vmem:[#allocation11 + $0x68] ss:$16 sps:$4 sm:$0xff]  }
  0x5f   :  { %2488 = vmatpush3.bf16.msra.mxu0 %v2572_v12  ;;  %2536 = vmatmul.mubr.msk.bf16.vlgmr.msra.gmra.mrb[0].mxu1 %vm337_vm0, %v2587_v22  ;;  %v2625_v58 = vld [vmem:[#allocation11 + $0x84] ss:$16 sps:$4 sm:$0xff]   ;;  %vm1838_vm6 = vcmp.gt.s32.totalorder %v3143_v25, 5  ;;  %v2623_v60 = vld [vmem:[#allocation11 + $0x80] ss:$16 sps:$4 sm:$0xff]   ;;  %v1816_v1 = vsub.f32 1.0, %v2463_v56 }
  0x60   :  { %2489 = vmatprep.subr.bf16.mxu0 %v2574_v13  ;;  %2539 = vmatprep.mubr.msk.bf16.mxu1 %vm337_vm0, %v2594_v23  ;;  %v2628_v61 = vld [vmem:[#allocation11 + $0x8c] ss:$16 sps:$4 sm:$0xff]   ;;  %v2467_v62 = vsel %vm1838_vm6, 1.0, %v3030_v28  ;;  %v2626_v63 = vld [vmem:[#allocation11 + $0x88] ss:$16 sps:$4 sm:$0xff]   ;;  %vm1989_vm7 = vcmp.gt.s32.totalorder %v3143_v25, 6 }
  0x61   :  { %715 = vmatpush1.bf16.msra.mxu1 %v2599_v31  ;;  %1510 = vperm.xlu0 %2561, %v2455_v42   ;;  %v2471_v3 = vsel %vm1989_vm7, 1.0, %v3030_v28  ;;  %v1967_v4 = vsub.f32 1.0, %v2467_v62  ;;  %vm2140_vm8 = vcmp.gt.s32.totalorder %v3143_v25, 7  ;;  %v2631_v8 = vld [vmem:[#allocation11 + $0xa4] ss:$16 sps:$4 sm:$0xff]  }
  0x62   :  { %716 = vmatprep.subr.bf16.mxu1 %v2607_v40  ;;  %1517 = vperm.xlu1 %2562, %v1514_v49   ;;  %v2475_v5 = vsel %vm2140_vm8, 1.0, %v3030_v28  ;;  %v2118_v6 = vsub.f32 1.0, %v2471_v3  ;;  %v2634_v9 = vld [vmem:[#allocation11 + $0xac] ss:$16 sps:$4 sm:$0xff]   ;;  %v2629_v10 = vld [vmem:[#allocation11 + $0xa0] ss:$16 sps:$4 sm:$0xff]  }
  0x63   :  { %2490 = vmatpush3.bf16.msra.mxu0 %v2575_v15  ;;  %v2269_v7 = vsub.f32 1.0, %v2475_v5  ;;  %v2632_v11 = vld [vmem:[#allocation11 + $0xa8] ss:$16 sps:$4 sm:$0xff]   ;;  %v2637_v12 = vld [vmem:[#allocation11 + $0xc4] ss:$16 sps:$4 sm:$0xff]  }
  0x64   :  { %2491 = vmatprep.subr.bf16.mxu0 %v2577_v17  ;;  %v2640_v13 = vld [vmem:[#allocation11 + $0xcc] ss:$16 sps:$4 sm:$0xff]   ;;  %v2635_v14 = vld [vmem:[#allocation11 + $0xc0] ss:$16 sps:$4 sm:$0xff]   ;;  %v2638_v15 = vld [vmem:[#allocation11 + $0xc8] ss:$16 sps:$4 sm:$0xff]  }
  0x65   :  { %717 = vmatpush1.bf16.msra.mxu1 %v2605_v39  ;;  %1661 = vperm.xlu0 %2561, %v2459_v47   ;;  %v2643_v16 = vld [vmem:[#allocation11 + $0xe4] ss:$16 sps:$4 sm:$0xff]   ;;  %v2646_v17 = vld [vmem:[#allocation11 + $0xec] ss:$16 sps:$4 sm:$0xff]   ;;  %v2641_v18 = vld [vmem:[#allocation11 + $0xe0] ss:$16 sps:$4 sm:$0xff]  }
  0x66   :  { %718 = vmatprep.subr.bf16.mxu1 %v2613_v45  ;;  %1668 = vperm.xlu1 %2562, %v1665_v59   ;;  %v2644_v19 = vld [vmem:[#allocation11 + $0xe8] ss:$16 sps:$4 sm:$0xff]   ;;  %v3177_v30 = vld [vmem:[%s3879_s3] ss:$0 sm:$0xff] }
  0x67   :  { %2492 = vmatpush3.bf16.msra.mxu0 %v2578_v20  ;;  %2540 = vmatmul.mubr.msk.bf16.gmra.mrb[4].mxu1 %vm337_vm0, %v2595_v32  ;;  %v3164_v20 = vld [vmem:[#allocation12 + $0x4] ss:$16 sps:$4 sm:$0xff]  }
  0x68   :  { %2493 = vmatprep.subr.bf16.mxu0 %v2580_v21  ;;  %746 = vmatprep.mubr.bf16.mxu1 %v3886_v0  ;;  %v3166_v21 = vld [vmem:[#allocation12 + $0xc] ss:$16 sps:$4 sm:$0xff]  }
  0x69   :  { %719 = vmatpush1.bf16.msra.mxu1 %v2611_v46  ;;  %1812 = vperm.xlu0 %2561, %v2463_v56  }
  0x6a   :  { %720 = vmatprep.subr.bf16.mxu1 %v2619_v50  ;;  %1819 = vperm.xlu1 %2562, %v1816_v1   ;;  %v3209_v1 = vld [vmem:[#allocation12 + $0x20] ss:$16 sps:$4 sm:$0xff]  }
  0x6b   :  { %2494 = vmatpush3.bf16.msra.mxu0 %v2581_v24 }
  0x6c   :  { %787 = vmatprep.subr.bf16.mxu0 %v2604_v37 }
  0x6d   :  { %721 = vmatpush1.bf16.msra.mxu1 %v2617_v53  ;;  %1963 = vperm.xlu0 %2561, %v2467_v62  }
  0x6e   :  { %383 = vmatmul.mubr.bf16.vlgmr.msra.gmra.mrb[0].mxu0 %v2583_v26  ;;  %722 = vmatprep.subr.bf16.mxu1 %v2625_v58 }
  0x6f   :  { %390 = vmatprep.mubr.bf16.mxu0 %v2588_v27  ;;  %788 = vmatpush1.bf16.msra.mxu0 %v2602_v35 }
  0x70   :  { %789 = vmatprep.subr.bf16.mxu0 %v2610_v43  ;;  %1970 = vperm.xlu1 %2562, %v1967_v4  }
  0x71   :  { %723 = vmatpush1.bf16.msra.mxu1 %v2623_v60  ;;  %2114 = vperm.xlu0 %2561, %v2471_v3   ;;  %v3202_v60 = vld [vmem:[#allocation12 + $0x24] ss:$16 sps:$4 sm:$0xff]  }
  0x72   :  { %724 = vmatprep.subr.bf16.mxu1 %v2631_v8 }
  0x73   :  { %790 = vmatpush1.bf16.msra.mxu0 %v2608_v44 }
  0x74   :  { %791 = vmatprep.subr.bf16.mxu0 %v2616_v48  ;;  %2121 = vperm.xlu1 %2562, %v2118_v6  }
  0x75   :  { %2265 = vperm.xlu0 %2561, %v2475_v5   ;;  %725 = vmatpush1.bf16.msra.mxu1 %v2629_v10 }
  0x76   :  { %391 = vmatmul.mubr.bf16.gmra.mrb[4].mxu0 %v2590_v38  ;;  %726 = vmatprep.subr.bf16.mxu1 %v2637_v12 }
  0x77   :  { %398 = vmatprep.mubr.bf16.mxu0 %v2591_v41  ;;  %792 = vmatpush1.bf16.msra.mxu0 %v2614_v51 }
  0x78   :  { %793 = vmatprep.subr.bf16.mxu0 %v2622_v54  ;;  %2272 = vperm.xlu1 %2562, %v2269_v7   ;;  %v3196_v54 = vld [vmem:[#allocation12] ss:$16 sps:$4 sm:$0xff]   ;;  %v3217_v7 = vld [vmem:[#allocation12 + $0x44] ss:$16 sps:$4 sm:$0xff]  }
  0x79   :  { %727 = vmatpush1.bf16.msra.mxu1 %v2635_v14 }
  0x7a   :  { %728 = vmatprep.subr.bf16.mxu1 %v2643_v16  ;;  %v3228_v16 = vld [vmem:[#allocation12 + $0x48] ss:$16 sps:$4 sm:$0xff]  }
  0x7b   :  { %794 = vmatpush1.bf16.msra.mxu0 %v2620_v57 }
  0x7c   :  { %795 = vmatprep.subr.bf16.mxu0 %v2628_v61  ;;  %v3204_v61 = vld [vmem:[#allocation12 + $0x2c] ss:$16 sps:$4 sm:$0xff]  }
  0x7d   :  { %729 = vmatpush1.bf16.msra.mxu1 %v2641_v18 }
  0x7e   :  { %399 = vmatmul.mubr.bf16.gmra.mrb[8].mxu0 %v2593_v52  ;;  %1099 = vmatprep.subr.bf16.mxu1 %v3164_v20 }
  0x7f   :  { %406 = vmatprep.mubr.bf16.mxu0 %v2596_v55  ;;  %796 = vmatpush1.bf16.msra.mxu0 %v2626_v63  ;;  %v3198_v55 = vld [vmem:[#allocation12 + $0x8] ss:$16 sps:$4 sm:$0xff]  }
  0x80   :  { %797 = vmatprep.subr.bf16.mxu0 %v2634_v9  ;;  %v3221_v9 = vld [vmem:[#allocation12 + $0x4c] ss:$16 sps:$4 sm:$0xff]  }
  0x83   :  { %798 = vmatpush1.bf16.msra.mxu0 %v2632_v11 }
  0x84   :  { %799 = vmatprep.subr.bf16.mxu0 %v2640_v13 }
  0x86   :  { %407 = vmatmul.mubr.bf16.gmra.mrb[12].mxu0 %v2598_v2  ;;  %v3211_v2 = vld [vmem:[#allocation12 + $0x28] ss:$16 sps:$4 sm:$0xff]  }
  0x87   :  { %819 = vmatprep.mubr.bf16.mxu0 %v3886_v0  ;;  %800 = vmatpush1.bf16.msra.mxu0 %v2638_v15  ;;  %v3226_v15 = vld [vmem:[#allocation12 + $0x40] ss:$16 sps:$4 sm:$0xff]  }
  0x88   :  { %801 = vmatprep.subr.bf16.mxu0 %v2646_v17 }
  0x8b   :  { %802 = vmatpush1.bf16.msra.mxu0 %v2644_v19 }
  0x8c   :  { %1140 = vmatprep.subr.bf16.mxu0 %v3166_v21 }
  0xd6   :  { %v3170_v22 = vpop.permute.xlu0 %1211 }
  0xd8   :  { %v3191_v46 = vpop.permute.xlu1 %1359 }
  0xd9   :  { %3902 = vst [vmem:[#allocation24_spill] sm:$0xff] %v3191_v46 }
  0xda   :  { %v3172_v25 = vpop.permute.xlu0 %1218 }
  0xe0   :  { %v3179_v31 = vpop.permute.xlu0 %1510 }
  0xe1   :  { %3901 = vst [vmem:[#allocation23_spill] sm:$0xff] %v3179_v31 }
  0xe4   :  { %v3193_v48 = vpop.permute.xlu0 %1661 }
  0xe5   :  { %3903 = vst [vmem:[#allocation25_spill] sm:$0xff] %v3193_v48 }
  0xe8   :  { %v3213_v3 = vpop.permute.xlu0 %1812 }
  0xe9   :  { %3904 = vst [vmem:[#allocation26_spill] sm:$0xff] %v3213_v3 }
 0x132   :  { %v2537_v23 = vpop.f32.mrb[0].mxu1 }
 0x133   :  { %v449_v24 = vpop.f32.mrb[1].mxu1 }
 0x134   :  { %v2538_v26 = vpop.f32.mrb[2].mxu1 }
 0x135   :  { %v452_v27 = vpop.f32.mrb[3].mxu1 }
 0x13a   :  { %v3181_v34 = vpop.f32.mrb[4].mxu1 }
 0x13b   :  { %v3183_v36 = vpop.f32.mrb[5].mxu1 }
 0x13c   :  { %v3186_v39 = vpop.f32.mrb[6].mxu1 }
 0x13d   :  { %v3188_v40 = vpop.f32.mrb[7].mxu1 }
 0x141   :  { %v2495_v28 = vpop.f32.mrb[0].mxu0 }
 0x142   :  { %v2496_v29 = vpop.f32.mrb[1].mxu0 }
 0x143   :  { %v2497_v32 = vadd.f32 %v2496_v29, %v2495_v28  ;;  %v2498_v33 = vpop.f32.mrb[2].mxu0 }
 0x144   :  { %v2499_v35 = vpop.f32.mrb[3].mxu0 }
 0x145   :  { %v385_v37 = vadd.f32 %v2497_v32, %v3177_v30  ;;  %v2500_v38 = vadd.f32 %v2499_v35, %v2498_v33  ;;  %v3244_v32 = vld [vmem:[#allocation12 + $0x60] ss:$16 sps:$4 sm:$0xff]   ;;  %v3246_v33 = vld [vmem:[#allocation12 + $0x68] ss:$16 sps:$4 sm:$0xff]  }
 0x147   :  { %v450_v41 = vadd.f32 %v449_v24, %v385_v37  ;;  %v388_v42 = vadd.f32 %v2500_v38, %v3177_v30  ;;  %v3233_v24 = vld [vmem:[#allocation12 + $0x64] ss:$16 sps:$4 sm:$0xff]  }
 0x149   :  { %v480_v43 = vmax.f32 %v450_v41, 0.0  ;;  %v453_v44 = vadd.f32 %v452_v27, %v388_v42  ;;  %v2501_v45 = vpop.f32.mrb[4].mxu0  ;;  %v3238_v27 = vpop.permute.xlu0 %1963  ;;  %v3255_v42 = vld [vmem:[#allocation12 + $0x8c] ss:$16 sps:$4 sm:$0xff]  }
 0x14a   :  { %v2502_v47 = vpop.f32.mrb[5].mxu0  ;;  %3905 = vst [vmem:[#allocation27_spill] sm:$0xff] %v3238_v27 }
 0x14b   :  { %v481_v49 = vmax.f32 %v453_v44, 0.0  ;;  %v1230_v50 = vmul.f32 %v3170_v22, %v480_v43  ;;  %v2503_v51 = vadd.f32 %v2502_v47, %v2501_v45  ;;  %v2504_v52 = vpop.f32.mrb[6].mxu0 }
 0x14c   :  { %v2505_v53 = vpop.f32.mrb[7].mxu0 }
 0x14d   :  { %v496_v56 = vpack.c.bf16 %v481_v49, %v480_v43  ;;  %1231 = vst [vmem:[#allocation17] sm:$0xff] %v1230_v50  ;;  %v393_v57 = vadd.f32 %v2503_v51, %v3177_v30  ;;  %v1380_v58 = vmul.f32 %v3191_v46, %v481_v49  ;;  %v2506_v59 = vadd.f32 %v2505_v53, %v2504_v52  ;;  %v3260_v49 = vld [vmem:[#allocation12 + $0x80] ss:$16 sps:$4 sm:$0xff]   ;;  %v3262_v50 = vpop.permute.xlu0 %2114  ;;  %v3264_v51 = vld [vmem:[#allocation12 + $0x88] ss:$16 sps:$4 sm:$0xff]  }
 0x14e   :  { %3906 = vst [vmem:[#allocation28_spill] sm:$0xff] %v3262_v50 }
 0x14f   :  { %v458_v62 = vadd.f32 %v2537_v23, %v393_v57  ;;  %1382 = vst [vmem:[#allocation17 + $0x8] sm:$0xff] %v1380_v58  ;;  %v396_v63 = vadd.f32 %v2506_v59, %v3177_v30  ;;  %747 = vmatmul.mubr.bf16.vlgmr.msra.gmra.mrb[8].mxu1 %v496_v56  ;;  %820 = vmatmul.mubr.bf16.vlgmr.msra.gmra.mrb[16].mxu0 %v496_v56  ;;  %v3269_v58 = vld [vmem:[#allocation12 + $0xa4] ss:$16 sps:$4 sm:$0xff]   ;;  %v3271_v59 = vld [vmem:[#allocation12 + $0xac] ss:$16 sps:$4 sm:$0xff]  }
 0x150   :  { %1100 = vmatpush1.bf16.msra.mxu1 %v3196_v54  ;;  %1141 = vmatpush1.bf16.msra.mxu0 %v3198_v55 }
 0x151   :  { %v482_v4 = vmax.f32 %v458_v62, 0.0  ;;  %v461_v5 = vadd.f32 %v2538_v26, %v396_v63  ;;  %v2507_v6 = vpop.f32.mrb[8].mxu0  ;;  %1101 = vmatprep.subr.bf16.mxu1 %v3202_v60  ;;  %1142 = vmatprep.subr.bf16.mxu0 %v3204_v61  ;;  %v3235_v26 = vld [vmem:[#allocation12 + $0x6c] ss:$16 sps:$4 sm:$0xff]  }
 0x152   :  { %v2508_v8 = vpop.f32.mrb[9].mxu0  ;;  %756 = vmatprep.mubr.bf16.mxu1 %v3886_v0  ;;  %829 = vmatprep.mubr.bf16.mxu0 %v3886_v0 }
 0x153   :  { %v483_v10 = vmax.f32 %v461_v5, 0.0  ;;  %v1531_v11 = vmul.f32 %v3179_v31, %v482_v4  ;;  %v2509_v12 = vadd.f32 %v2508_v8, %v2507_v6  ;;  %v2510_v13 = vpop.f32.mrb[10].mxu0  ;;  %v3280_v5 = vld [vmem:[#allocation12 + $0xa8] ss:$16 sps:$4 sm:$0xff]   ;;  %v3285_v8 = vld [vmem:[#allocation12 + $0xc4] ss:$16 sps:$4 sm:$0xff]  }
 0x154   :  { %1102 = vmatpush1.bf16.msra.mxu1 %v3209_v1  ;;  %v2511_v14 = vpop.f32.mrb[11].mxu0  ;;  %1143 = vmatpush1.bf16.msra.mxu0 %v3211_v2 }
 0x155   :  { %1533 = vst [vmem:[#allocation17 + $0x10] sm:$0xff] %v1531_v11  ;;  %v401_v17 = vadd.f32 %v2509_v12, %v3177_v30  ;;  %v1682_v18 = vmul.f32 %v3193_v48, %v483_v10  ;;  %v2512_v19 = vadd.f32 %v2511_v14, %v2510_v13  ;;  %1103 = vmatprep.subr.bf16.mxu1 %v3217_v7  ;;  %v3296_v13 = vld [vmem:[#allocation12 + $0xc0] ss:$16 sps:$4 sm:$0xff]  }
 0x156   :  { %v497_v23 = vpack.c.bf16 %v483_v10, %v482_v4  ;;  %1144 = vmatprep.subr.bf16.mxu0 %v3221_v9  ;;  %v3278_v4 = vld [vmem:[#allocation12 + $0xa0] ss:$16 sps:$4 sm:$0xff]   ;;  %v3289_v10 = vpop.permute.xlu0 %2265 }
 0x157   :  { %v466_v28 = vadd.f32 %v3183_v36, %v401_v17  ;;  %1684 = vst [vmem:[#allocation17 + $0x18] sm:$0xff] %v1682_v18  ;;  %v404_v29 = vadd.f32 %v2512_v19, %v3177_v30  ;;  %v3251_v36 = vld [vmem:[#allocation12 + $0x84] ss:$16 sps:$4 sm:$0xff]   ;;  %3907 = vst [vmem:[#allocation29_spill] sm:$0xff] %v3289_v10  ;;  %v3305_v19 = vld [vmem:[#allocation12 + $0xec] ss:$16 sps:$4 sm:$0xff]  }
 0x158   :  { %757 = vmatmul.mubr.bf16.gmra.mrb[12].mxu1 %v497_v23  ;;  %830 = vmatmul.mubr.bf16.gmra.mrb[20].mxu0 %v497_v23  ;;  %v3303_v18 = vld [vmem:[#allocation12 + $0xe4] ss:$16 sps:$4 sm:$0xff]   ;;  %v3309_v23 = vld [vmem:[#allocation12 + $0xe0] ss:$16 sps:$4 sm:$0xff]  }
 0x159   :  { %1104 = vmatpush1.bf16.msra.mxu1 %v3226_v15  ;;  %1145 = vmatpush1.bf16.msra.mxu0 %v3228_v16  ;;  %v484_v35 = vmax.f32 %v466_v28, 0.0  ;;  %v469_v37 = vadd.f32 %v3188_v40, %v404_v29  ;;  %v2513_v38 = vpop.f32.mrb[12].mxu0  ;;  %v3311_v28 = vld [vmem:[#allocation12 + $0xe8] ss:$16 sps:$4 sm:$0xff]   ;;  %v3031_v29 = vmov 0.0|0.0  }
 0x15a   :  { %1105 = vmatprep.subr.bf16.mxu1 %v3233_v24  ;;  %1146 = vmatprep.subr.bf16.mxu0 %v3235_v26  ;;  %v2514_v41 = vpop.f32.mrb[13].mxu0 }
 0x15b   :  { %766 = vmatprep.mubr.bf16.mxu1 %v3886_v0  ;;  %839 = vmatprep.mubr.bf16.mxu0 %v3886_v0  ;;  %v485_v43 = vmax.f32 %v469_v37, 0.0  ;;  %v1833_v44 = vmul.f32 %v3213_v3, %v484_v35  ;;  %v2515_v45 = vadd.f32 %v2514_v41, %v2513_v38  ;;  %v2516_v47 = vpop.f32.mrb[14].mxu0 }
 0x15c   :  { %v2517_v40 = vpop.f32.mrb[15].mxu0 }
 0x15d   :  { %1106 = vmatpush1.bf16.msra.mxu1 %v3244_v32  ;;  %1147 = vmatpush1.bf16.msra.mxu0 %v3246_v33  ;;  %v498_v52 = vpack.c.bf16 %v485_v43, %v484_v35  ;;  %1835 = vst [vmem:[#allocation17 + $0x20] sm:$0xff] %v1833_v44  ;;  %v409_v53 = vadd.f32 %v2515_v45, %v3177_v30  ;;  %v534_v35 = vlaneseq }
 0x15e   :  { %v1984_v56 = vmul.f32 %v3238_v27, %v485_v43  ;;  %v2518_v57 = vadd.f32 %v2517_v40, %v2516_v47  ;;  %1107 = vmatprep.subr.bf16.mxu1 %v3251_v36  ;;  %1148 = vmatprep.subr.bf16.mxu0 %v3255_v42  ;;  %v532_v43 = vld [vmem:[%s3882_s6] sm:$0xf]  ;;  %s3032_s6 = smov [#allocation14]  }
 0x15f   :  { %v474_v62 = vadd.f32 %v3181_v34, %v409_v53  ;;  %v535_v37 = vshrl.u32 %v534_v35, 7  ;;  %s2296_s20 = sshll.u32 %s3032_s6, 4  ;;  %s2297_s20 = int_to_ptr.vmem [resolvable:$true] %s2296_s20 }
 0x160   :  { %1986 = vst [vmem:[#allocation17 + $0x28] sm:$0xff] %v1984_v56  ;;  %v412_v63 = vadd.f32 %v2518_v57, %v3177_v30  ;;  %767 = vmatmul.mubr.bf16.gmra.mrb[16].mxu1 %v498_v52  ;;  %840 = vmatmul.mubr.bf16.gmra.mrb[24].mxu0 %v498_v52  ;;  %v3287_v30 = vld [vmem:[#allocation12 + $0xcc] ss:$16 sps:$4 sm:$0xff]   ;;  %s2943_s0 = scalar_lea.vmem %s2297_s20, 1024  ;;  %p2948_p5 = scmp.lt.s32.totalorder %s2297_s20, %s2297_s20 }
 0x161   :  { %1108 = vmatpush1.bf16.msra.mxu1 %v3260_v49  ;;  %1149 = vmatpush1.bf16.msra.mxu0 %v3264_v51  ;;  %v486_v6 = vmax.f32 %v474_v62, 0.0  ;;  %v536_v38 = vsub.s32 0, %v535_v37  ;;  %v544_v41 = vsub.s32 2, %v535_v37  ;;  %v540_v44 = vsub.s32 1, %v535_v37  ;;  %p2944_p4 = scmp.ne.s32.totalorder %s2297_s20, %s2943_s0  ;;  %p2949_p6 = scmp.lt.s32.totalorder %s2943_s0, %s2943_s0 }
 0x162   :  { %1109 = vmatprep.subr.bf16.mxu1 %v3269_v58  ;;  %1150 = vmatprep.subr.bf16.mxu0 %v3271_v59  ;;  %v477_v34 = vadd.f32 %v3186_v39, %v412_v63  ;;  %v3298_v39 = vld [vmem:[#allocation12 + $0xc8] ss:$16 sps:$4 sm:$0xff]   ;;  %v548_v45 = vsub.s32 3, %v535_v37 }
 0x163   :  { %776 = vmatprep.mubr.bf16.mxu1 %v3886_v0  ;;  %849 = vmatprep.mubr.bf16.mxu0 %v3886_v0  ;;  %v2135_v11 = vmul.f32 %v3262_v50, %v486_v6  ;;  %v537_v52 = vrot.slane %v532_v43, %v536_v38  ;;  %v545_v53 = vrot.slane %v532_v43, %v544_v41  ;;  %p2950_p7 = por %p2949_p6, %p2948_p5 }
 0x164   :  { %v487_v12 = vmax.f32 %v477_v34, 0.0  ;;  %v541_v62 = vrot.slane %v532_v43, %v540_v44  ;;  %v549_v63 = vrot.slane %v532_v43, %v548_v45 }
 0x165   :  { %1110 = vmatpush1.bf16.msra.mxu1 %v3278_v4  ;;  %1151 = vmatpush1.bf16.msra.mxu0 %v3280_v5  ;;  %2137 = vst [vmem:[#allocation17 + $0x30] sm:$0xff] %v2135_v11  ;;  %p2951_p8 = pnand %p2950_p7, %p2944_p4 }
 0x166   :  { %v2286_v14 = vmul.f32 %v3289_v10, %v487_v12  ;;  %1111 = vmatprep.subr.bf16.mxu1 %v3285_v8  ;;  %v499_v17 = vpack.c.bf16 %v487_v12, %v486_v6  ;;  %1152 = vmatprep.subr.bf16.mxu0 %v3287_v30 }
 0x168   :  { %2288 = vst [vmem:[#allocation17 + $0x38] sm:$0xff] %v2286_v14  ;;  %777 = vmatmul.mubr.bf16.gmra.mrb[20].mxu1 %v499_v17  ;;  %850 = vmatmul.mubr.bf16.gmra.mrb[28].mxu0 %v499_v17 }
 0x169   :  { %1112 = vmatpush1.bf16.msra.mxu1 %v3296_v13  ;;  %1153 = vmatpush1.bf16.msra.mxu0 %v3298_v39 }
 0x16a   :  { %1113 = vmatprep.subr.bf16.mxu1 %v3303_v18  ;;  %1154 = vmatprep.subr.bf16.mxu0 %v3305_v19 }
 0x16b   :  { %1131 = vmatprep.mubr.bf16.mxu1 %v3886_v0  ;;  %1172 = vmatprep.mubr.bf16.mxu0 %v3886_v0 }
 0x16d   :  { %1114 = vmatpush1.bf16.msra.mxu1 %v3309_v23  ;;  %1155 = vmatpush1.bf16.msra.mxu0 %v3311_v28 }
 0x16e   :  { %1247 = vmatprep.subr.bf16.mxu1 %v3164_v20  ;;  %1288 = vmatprep.subr.bf16.mxu0 %v3166_v21 }
 0x170   :  { %1132 = vmatmul.mubr.bf16.vlgmr.msra.gmra.mrb[24].mxu1 %v3031_v29  ;;  %1173 = vmatmul.mubr.bf16.vlgmr.msra.gmra.mrb[32].mxu0 %v3031_v29 }
 0x171   :  { %1248 = vmatpush1.bf16.msra.mxu1 %v3196_v54  ;;  %1289 = vmatpush1.bf16.msra.mxu0 %v3198_v55 }
 0x172   :  { %1249 = vmatprep.subr.bf16.mxu1 %v3202_v60  ;;  %1290 = vmatprep.subr.bf16.mxu0 %v3204_v61 }
 0x173   :  { %1279 = vmatprep.mubr.bf16.mxu1 %v3886_v0  ;;  %1320 = vmatprep.mubr.bf16.mxu0 %v3886_v0 }
 0x175   :  { %1250 = vmatpush1.bf16.msra.mxu1 %v3209_v1  ;;  %1291 = vmatpush1.bf16.msra.mxu0 %v3211_v2 }
 0x176   :  { %1251 = vmatprep.subr.bf16.mxu1 %v3217_v7  ;;  %1292 = vmatprep.subr.bf16.mxu0 %v3221_v9 }
 0x179   :  { %1252 = vmatpush1.bf16.msra.mxu1 %v3226_v15  ;;  %1293 = vmatpush1.bf16.msra.mxu0 %v3228_v16 }
 0x17a   :  { %1253 = vmatprep.subr.bf16.mxu1 %v3233_v24  ;;  %1294 = vmatprep.subr.bf16.mxu0 %v3235_v26 }
 0x17d   :  { %1254 = vmatpush1.bf16.msra.mxu1 %v3244_v32  ;;  %1295 = vmatpush1.bf16.msra.mxu0 %v3246_v33 }
 0x17e   :  { %1255 = vmatprep.subr.bf16.mxu1 %v3251_v36  ;;  %1296 = vmatprep.subr.bf16.mxu0 %v3255_v42 }
 0x181   :  { %1256 = vmatpush1.bf16.msra.mxu1 %v3260_v49  ;;  %1297 = vmatpush1.bf16.msra.mxu0 %v3264_v51 }
 0x182   :  { %1257 = vmatprep.subr.bf16.mxu1 %v3269_v58  ;;  %1298 = vmatprep.subr.bf16.mxu0 %v3271_v59 }
 0x185   :  { %1258 = vmatpush1.bf16.msra.mxu1 %v3278_v4  ;;  %1299 = vmatpush1.bf16.msra.mxu0 %v3280_v5 }
 0x186   :  { %1259 = vmatprep.subr.bf16.mxu1 %v3285_v8  ;;  %1300 = vmatprep.subr.bf16.mxu0 %v3287_v30 }
 0x189   :  { %1260 = vmatpush1.bf16.msra.mxu1 %v3296_v13  ;;  %1301 = vmatpush1.bf16.msra.mxu0 %v3298_v39 }
 0x18a   :  { %1261 = vmatprep.subr.bf16.mxu1 %v3303_v18  ;;  %1302 = vmatprep.subr.bf16.mxu0 %v3305_v19 }
 0x18d   :  { %1262 = vmatpush1.bf16.msra.mxu1 %v3309_v23  ;;  %1303 = vmatpush1.bf16.msra.mxu0 %v3311_v28 }
 0x18e   :  { %1398 = vmatprep.subr.bf16.mxu1 %v3164_v20  ;;  %1439 = vmatprep.subr.bf16.mxu0 %v3166_v21 }
 0x222   :  { %v3358_v47 = vpop.f32.mrb[8].mxu1  ;;  %v3360_v40 = vpop.f32.mrb[16].mxu0 }
 0x223   :  { %v750_v56 = vpop.f32.mrb[9].mxu1  ;;  %v823_v57 = vpop.f32.mrb[17].mxu0 }
 0x224   :  { %v752_v6 = vpop.f32.mrb[10].mxu1  ;;  %v825_v34 = vpop.f32.mrb[18].mxu0 }
 0x225   :  { %v3362_v11 = vadd.f32 %v752_v6, %v537_v52  ;;  %v3364_v12 = vadd.f32 %v825_v34, %v545_v53  ;;  %v754_v14 = vpop.f32.mrb[11].mxu1  ;;  %v827_v17 = vpop.f32.mrb[19].mxu0 }
 0x226   :  { %v3366_v29 = vadd.f32 %v754_v14, %v541_v62  ;;  %v3368_v35 = vadd.f32 %v827_v17, %v549_v63 }
 0x22b   :  { %v758_v37 = vpop.f32.mrb[12].mxu1  ;;  %v831_v0 = vpop.f32.mrb[20].mxu0 }
 0x22c   :  { %v3370_v38 = vadd.f32 %v758_v37, %v537_v52  ;;  %v3372_v41 = vadd.f32 %v831_v0, %v545_v53  ;;  %v760_v44 = vpop.f32.mrb[13].mxu1  ;;  %v833_v43 = vpop.f32.mrb[21].mxu0 }
 0x22d   :  { %v3374_v45 = vadd.f32 %v760_v44, %v541_v62  ;;  %v3376_v6 = vadd.f32 %v833_v43, %v549_v63  ;;  %v762_v34 = vpop.f32.mrb[14].mxu1  ;;  %v835_v10 = vpop.f32.mrb[22].mxu0 }
 0x22e   :  { %3908 = vst [vmem:[#allocation30_spill] sm:$0xff] %v3370_v38  ;;  %3909 = vst [vmem:[#allocation31_spill] sm:$0xff] %v3372_v41  ;;  %v3378_v50 = vadd.f32 %v762_v34, %v537_v52  ;;  %v3380_v14 = vadd.f32 %v835_v10, %v545_v53  ;;  %v764_v17 = vpop.f32.mrb[15].mxu1  ;;  %v837_v27 = vpop.f32.mrb[23].mxu0 }
 0x22f   :  { %3910 = vst [vmem:[#allocation32_spill] sm:$0xff] %v3374_v45  ;;  %3911 = vst [vmem:[#allocation33_spill] sm:$0xff] %v3376_v6  ;;  %v3382_v3 = vadd.f32 %v764_v17, %v541_v62  ;;  %v3384_v37 = vadd.f32 %v837_v27, %v549_v63 }
 0x230   :  { %3912 = vst [vmem:[#allocation34_spill] sm:$0xff] %v3378_v50  ;;  %3913 = vst [vmem:[#allocation35_spill] sm:$0xff] %v3380_v14 }
 0x231   :  { %3914 = vst [vmem:[#allocation36_spill] sm:$0xff] %v3382_v3  ;;  %3915 = vst [vmem:[#allocation37_spill] sm:$0xff] %v3384_v37 }
 0x233   :  { %v768_v0 = vpop.f32.mrb[16].mxu1  ;;  %v841_v48 = vpop.f32.mrb[24].mxu0 }
 0x234   :  { %v3386_v31 = vadd.f32 %v768_v0, %v537_v52  ;;  %v3388_v44 = vadd.f32 %v841_v48, %v545_v53  ;;  %v770_v43 = vpop.f32.mrb[17].mxu1  ;;  %v843_v6 = vpop.f32.mrb[25].mxu0 }
 0x235   :  { %v3390_v45 = vadd.f32 %v770_v43, %v541_v62  ;;  %v3392_v34 = vadd.f32 %v843_v6, %v549_v63  ;;  %v772_v10 = vpop.f32.mrb[18].mxu1  ;;  %v845_v14 = vpop.f32.mrb[26].mxu0 }
 0x236   :  { %3916 = vst [vmem:[#allocation38_spill] sm:$0xff] %v3386_v31  ;;  %3917 = vst [vmem:[#allocation39_spill] sm:$0xff] %v3388_v44  ;;  %v3394_v50 = vadd.f32 %v772_v10, %v537_v52  ;;  %v3396_v17 = vadd.f32 %v845_v14, %v545_v53  ;;  %v774_v27 = vpop.f32.mrb[19].mxu1  ;;  %v847_v37 = vpop.f32.mrb[27].mxu0 }
 0x237   :  { %3918 = vst [vmem:[#allocation40_spill] sm:$0xff] %v3390_v45  ;;  %3919 = vst [vmem:[#allocation41_spill] sm:$0xff] %v3392_v34  ;;  %v3398_v3 = vadd.f32 %v774_v27, %v541_v62  ;;  %v3400_v0 = vadd.f32 %v847_v37, %v549_v63 }
 0x238   :  { %3920 = vst [vmem:[#allocation42_spill] sm:$0xff] %v3394_v50  ;;  %3921 = vst [vmem:[#allocation43_spill] sm:$0xff] %v3396_v17 }
 0x239   :  { %3922 = vst [vmem:[#allocation44_spill] sm:$0xff] %v3398_v3  ;;  %3923 = vst [vmem:[#allocation45_spill] sm:$0xff] %v3400_v0 }
 0x23b   :  { %v778_v48 = vpop.f32.mrb[20].mxu1  ;;  %v851_v44 = vpop.f32.mrb[28].mxu0 }
 0x23c   :  { %v3402_v31 = vadd.f32 %v778_v48, %v537_v52  ;;  %v3404_v43 = vadd.f32 %v851_v44, %v545_v53  ;;  %v780_v6 = vpop.f32.mrb[21].mxu1  ;;  %v853_v34 = vpop.f32.mrb[29].mxu0  ;;  %v749_v44 = vadd.f32 %v3358_v47, %v537_v52 }
 0x23d   :  { %v3406_v45 = vadd.f32 %v780_v6, %v541_v62  ;;  %v3408_v10 = vadd.f32 %v853_v34, %v549_v63  ;;  %v782_v14 = vpop.f32.mrb[22].mxu1  ;;  %v855_v17 = vpop.f32.mrb[30].mxu0  ;;  %v751_v6 = vadd.f32 %v750_v56, %v541_v62 }
 0x23e   :  { %3924 = vst [vmem:[#allocation46_spill] sm:$0xff] %v3402_v31  ;;  %3925 = vst [vmem:[#allocation47_spill] sm:$0xff] %v3404_v43  ;;  %v3410_v50 = vadd.f32 %v782_v14, %v537_v52  ;;  %v3412_v27 = vadd.f32 %v855_v17, %v545_v53  ;;  %v784_v37 = vpop.f32.mrb[23].mxu1  ;;  %v857_v0 = vpop.f32.mrb[31].mxu0  ;;  %v822_v43 = vadd.f32 %v3360_v40, %v545_v53 }
 0x23f   :  { %3926 = vst [vmem:[#allocation48_spill] sm:$0xff] %v3406_v45  ;;  %3927 = vst [vmem:[#allocation49_spill] sm:$0xff] %v3408_v10  ;;  %v3414_v3 = vadd.f32 %v784_v37, %v541_v62  ;;  %v3416_v48 = vadd.f32 %v857_v0, %v549_v63  ;;  %v824_v45 = vadd.f32 %v823_v57, %v549_v63 }
 0x240   :  { %3928 = vst [vmem:[#allocation50_spill] sm:$0xff] %v3410_v50  ;;  %3929 = vst [vmem:[#allocation51_spill] sm:$0xff] %v3412_v27 }
 0x241   :  { %3930 = vst [vmem:[#allocation52_spill] sm:$0xff] %v3414_v3  ;;  %3931 = vst [vmem:[#allocation53_spill] sm:$0xff] %v3416_v48 }
 0x243   :  { %v1133_v34 = vpop.f32.mrb[24].mxu1  ;;  %v1174_v10 = vpop.f32.mrb[32].mxu0 }
 0x244   :  { %v1181_v31 = vadd.f32 %v1133_v34, %v749_v44  ;;  %v1183_v41 = vadd.f32 %v1174_v10, %v822_v43  ;;  %v1135_v14 = vpop.f32.mrb[25].mxu1  ;;  %v1176_v50 = vpop.f32.mrb[33].mxu0 }
 0x245   :  { %v1182_v17 = vadd.f32 %v1135_v14, %v751_v6  ;;  %v1184_v27 = vadd.f32 %v1176_v50, %v824_v45  ;;  %v1137_v38 = vpop.f32.mrb[26].mxu1  ;;  %v1178_v46 = vpop.f32.mrb[34].mxu0 }
 0x246   :  { %v2448_v37 = vmul.f32 -1.442695, %v1181_v31  ;;  %v1138_v3 = vpop.f32.mrb[27].mxu1  ;;  %v1179_v0 = vpop.f32.mrb[35].mxu0  ;;  %v1221_v38 = vmul.f32 0.0, %v3172_v25  ;;  %v3932_v25 = vmov 0  }
 0x247   :  { %v2449_v48 = vmul.f32 -1.442695, %v1182_v17  ;;  %v2450_v47 = vmul.f32 -1.442695, %v1184_v27 }
 0x248   :  { %2695 = vpow2.f32 %v2448_v37 }
 0x249   :  { %2697 = vpow2.f32 %v2449_v48 }
 0x24a   :  { %2699 = vpow2.f32 %v2450_v47 }
 0x24b   :  { %2701 = vtanh.f32 %v1183_v41 }
 0x252   :  { %v2696_v40 = vpop.eup %2695 }
 0x253   :  { %v2698_v52 = vpop.eup %2697  ;;  %v1188_v53 = vadd.f32 1.0, %v2696_v40 }
 0x254   :  { %v1194_v56 = vadd.f32 1.0, %v2698_v52  ;;  %v2700_v57 = vpop.eup %2699 }
 0x255   :  { %2703 = vrcp.f32 %v1188_v53  ;;  %v2702_v62 = vpop.eup %2701  ;;  %v1201_v46 = vadd.f32 1.0, %v2700_v57 }
 0x256   :  { %2705 = vrcp.f32 %v1194_v56 }
 0x257   :  { %2707 = vrcp.f32 %v1201_v46 }
 0x25f   :  { %v2704_v50 = vpop.eup %2703 }
 0x260   :  { %v2706_v63 = vpop.eup %2705  ;;  %v1205_v31 = vmul.f32 %v2704_v50, %v2702_v62 }
 0x261   :  { %v1204_v3 = vmul.f32 0.0, %v2706_v63  ;;  %v2708_v41 = vpop.eup %2707 }
 0x263   :  { %v1206_v45 = vadd.f32 %v1205_v31, %v1204_v3 }
 0x265   :  { %2709 = vtanh.f32 %v1206_v45  ;;  %v1214_v43 = vmul.f32 %v3170_v22, %v1206_v45 }
 0x267   :  { %v3422_v10 = vadd.f32 %v1221_v38, %v1214_v43 }
 0x26f   :  { %v2710_v27 = vpop.eup %2709 }
 0x270   :  { %v1208_v48 = vmul.f32 %v2710_v27, %v2708_v41 }
 0x272   :  { %v1224_v44 = vmul.f32 %v3170_v22, %v1208_v48 }
 0x274   :  { %v3425_v6 = vadd.f32 %v1224_v44, %v1221_v38  ;;  %1228 = vst [vmem:[#allocation14] sm:$0xff] %v1224_v44 }
 0x276   :  { %v1246_v34 = vpack.c.bf16 %v3425_v6, %v3425_v6 }
 0x278   :  { %1280 = vmatmul.mubr.bf16.vlgmr.msra.gmra.mrb[28].mxu1 %v1246_v34  ;;  %1321 = vmatmul.mubr.bf16.vlgmr.msra.gmra.mrb[36].mxu0 %v1246_v34 }
 0x279   :  { %1399 = vmatpush1.bf16.msra.mxu1 %v3196_v54  ;;  %1440 = vmatpush1.bf16.msra.mxu0 %v3198_v55 }
 0x27a   :  { %1400 = vmatprep.subr.bf16.mxu1 %v3202_v60  ;;  %1441 = vmatprep.subr.bf16.mxu0 %v3204_v61 }
 0x27b   :  { %1430 = vmatprep.mubr.bf16.mxu1 %v3932_v25  ;;  %1471 = vmatprep.mubr.bf16.mxu0 %v3932_v25 }
 0x27d   :  { %1401 = vmatpush1.bf16.msra.mxu1 %v3209_v1  ;;  %1442 = vmatpush1.bf16.msra.mxu0 %v3211_v2 }
 0x27e   :  { %1402 = vmatprep.subr.bf16.mxu1 %v3217_v7  ;;  %1443 = vmatprep.subr.bf16.mxu0 %v3221_v9 }
 0x281   :  { %1403 = vmatpush1.bf16.msra.mxu1 %v3226_v15  ;;  %1444 = vmatpush1.bf16.msra.mxu0 %v3228_v16 }
 0x282   :  { %1404 = vmatprep.subr.bf16.mxu1 %v3233_v24  ;;  %1445 = vmatprep.subr.bf16.mxu0 %v3235_v26 }
 0x285   :  { %1405 = vmatpush1.bf16.msra.mxu1 %v3244_v32  ;;  %1446 = vmatpush1.bf16.msra.mxu0 %v3246_v33 }
 0x286   :  { %1406 = vmatprep.subr.bf16.mxu1 %v3251_v36  ;;  %1447 = vmatprep.subr.bf16.mxu0 %v3255_v42 }
 0x289   :  { %1407 = vmatpush1.bf16.msra.mxu1 %v3260_v49  ;;  %1448 = vmatpush1.bf16.msra.mxu0 %v3264_v51 }
 0x28a   :  { %1408 = vmatprep.subr.bf16.mxu1 %v3269_v58  ;;  %1449 = vmatprep.subr.bf16.mxu0 %v3271_v59 }
 0x28d   :  { %1409 = vmatpush1.bf16.msra.mxu1 %v3278_v4  ;;  %1450 = vmatpush1.bf16.msra.mxu0 %v3280_v5 }
 0x28e   :  { %1410 = vmatprep.subr.bf16.mxu1 %v3285_v8  ;;  %1451 = vmatprep.subr.bf16.mxu0 %v3287_v30 }
 0x291   :  { %1411 = vmatpush1.bf16.msra.mxu1 %v3296_v13  ;;  %1452 = vmatpush1.bf16.msra.mxu0 %v3298_v39 }
 0x292   :  { %1412 = vmatprep.subr.bf16.mxu1 %v3303_v18  ;;  %1453 = vmatprep.subr.bf16.mxu0 %v3305_v19 }
 0x295   :  { %1413 = vmatpush1.bf16.msra.mxu1 %v3309_v23  ;;  %1454 = vmatpush1.bf16.msra.mxu0 %v3311_v28 }
 0x296   :  { %1549 = vmatprep.subr.bf16.mxu1 %v3164_v20  ;;  %1590 = vmatprep.subr.bf16.mxu0 %v3166_v21 }
 0x34b   :  { %v1281_v22 = vpop.f32.mrb[28].mxu1  ;;  %v1322_v14 = vpop.f32.mrb[36].mxu0 }
 0x34c   :  { %v1329_v17 = vadd.f32 %v1281_v22, %v3362_v11  ;;  %v1331_v37 = vadd.f32 %v1322_v14, %v3364_v12  ;;  %v1283_v0 = vpop.f32.mrb[29].mxu1  ;;  %v1324_v47 = vpop.f32.mrb[37].mxu0 }
 0x34d   :  { %v1330_v40 = vadd.f32 %v1283_v0, %v3366_v29  ;;  %v1332_v52 = vadd.f32 %v1324_v47, %v3368_v35  ;;  %v1285_v53 = vpop.f32.mrb[30].mxu1  ;;  %v1326_v56 = vpop.f32.mrb[38].mxu0 }
 0x34e   :  { %v2452_v57 = vmul.f32 -1.442695, %v1329_v17  ;;  %v1286_v62 = vpop.f32.mrb[31].mxu1  ;;  %v1327_v50 = vpop.f32.mrb[39].mxu0  ;;  %v3934_v53 = vld [vmem:[#allocation30_spill] sm:$0xff] }
 0x34f   :  { %v2453_v63 = vmul.f32 -1.442695, %v1330_v40  ;;  %v2454_v46 = vmul.f32 -1.442695, %v1332_v52  ;;  %v3471_v14 = vpop.permute.xlu1 %1366 }
 0x350   :  { %2711 = vpow2.f32 %v2452_v57  ;;  %v1373_v17 = vmul.f32 %v3471_v14, %v3425_v6  ;;  %v3935_v57 = vld [vmem:[#allocation31_spill] sm:$0xff] }
 0x351   :  { %2713 = vpow2.f32 %v2453_v63 }
 0x352   :  { %2715 = vpow2.f32 %v2454_v46  ;;  %v3936_v46 = vld [vmem:[#allocation32_spill] sm:$0xff] }
 0x353   :  { %2717 = vtanh.f32 %v1331_v37  ;;  %v3933_v37 = vld [vmem:[#allocation24_spill] sm:$0xff] }
 0x35a   :  { %v2712_v31 = vpop.eup %2711 }
 0x35b   :  { %v2714_v3 = vpop.eup %2713  ;;  %v1336_v11 = vadd.f32 1.0, %v2712_v31 }
 0x35c   :  { %v1342_v12 = vadd.f32 1.0, %v2714_v3  ;;  %v2716_v29 = vpop.eup %2715  ;;  %v3937_v3 = vld [vmem:[#allocation33_spill] sm:$0xff] }
 0x35d   :  { %2719 = vrcp.f32 %v1336_v11  ;;  %v2718_v38 = vpop.eup %2717  ;;  %v1349_v43 = vadd.f32 1.0, %v2716_v29 }
 0x35e   :  { %2721 = vrcp.f32 %v1342_v12 }
 0x35f   :  { %2723 = vrcp.f32 %v1349_v43 }
 0x367   :  { %v2720_v35 = vpop.eup %2719 }
 0x368   :  { %v2722_v45 = vpop.eup %2721  ;;  %v1353_v41 = vmul.f32 %v2720_v35, %v2718_v38 }
 0x369   :  { %v1352_v27 = vmul.f32 %v2722_v45, %v3422_v10  ;;  %v2724_v44 = vpop.eup %2723 }
 0x36b   :  { %v3468_v48 = vadd.f32 %v1353_v41, %v1352_v27 }
 0x36d   :  { %2725 = vtanh.f32 %v3468_v48 }
 0x377   :  { %v2726_v34 = vpop.eup %2725 }
 0x378   :  { %v1356_v22 = vmul.f32 %v2726_v34, %v2724_v44  ;;  %v1362_v34 = vmul.f32 %v3933_v37, %v3468_v48 }
 0x37a   :  { %v1372_v0 = vmul.f32 %v3933_v37, %v1356_v22 }
 0x37c   :  { %v3476_v47 = vadd.f32 %v1373_v17, %v1372_v0  ;;  %1377 = vst [vmem:[#allocation14 + $0x8] sm:$0xff] %v1372_v0  ;;  %v1369_v17 = vmul.f32 %v3471_v14, %v3422_v10  ;;  %v3938_v14 = vld [vmem:[#allocation23_spill] sm:$0xff] }
 0x37e   :  { %v1397_v40 = vpack.c.bf16 %v3476_v47, %v3476_v47 }
 0x380   :  { %1431 = vmatmul.mubr.bf16.vlgmr.msra.gmra.mrb[32].mxu1 %v1397_v40  ;;  %1472 = vmatmul.mubr.bf16.vlgmr.msra.gmra.mrb[40].mxu0 %v1397_v40 }
 0x381   :  { %1550 = vmatpush1.bf16.msra.mxu1 %v3196_v54  ;;  %1591 = vmatpush1.bf16.msra.mxu0 %v3198_v55 }
 0x382   :  { %1551 = vmatprep.subr.bf16.mxu1 %v3202_v60  ;;  %1592 = vmatprep.subr.bf16.mxu0 %v3204_v61 }
 0x383   :  { %1581 = vmatprep.mubr.bf16.mxu1 %v3932_v25  ;;  %1622 = vmatprep.mubr.bf16.mxu0 %v3932_v25 }
 0x385   :  { %1552 = vmatpush1.bf16.msra.mxu1 %v3209_v1  ;;  %1593 = vmatpush1.bf16.msra.mxu0 %v3211_v2 }
 0x386   :  { %1553 = vmatprep.subr.bf16.mxu1 %v3217_v7  ;;  %1594 = vmatprep.subr.bf16.mxu0 %v3221_v9 }
 0x389   :  { %1554 = vmatpush1.bf16.msra.mxu1 %v3226_v15  ;;  %1595 = vmatpush1.bf16.msra.mxu0 %v3228_v16 }
 0x38a   :  { %1555 = vmatprep.subr.bf16.mxu1 %v3233_v24  ;;  %1596 = vmatprep.subr.bf16.mxu0 %v3235_v26 }
 0x38d   :  { %1556 = vmatpush1.bf16.msra.mxu1 %v3244_v32  ;;  %1597 = vmatpush1.bf16.msra.mxu0 %v3246_v33 }
 0x38e   :  { %1557 = vmatprep.subr.bf16.mxu1 %v3251_v36  ;;  %1598 = vmatprep.subr.bf16.mxu0 %v3255_v42 }
 0x391   :  { %1558 = vmatpush1.bf16.msra.mxu1 %v3260_v49  ;;  %1599 = vmatpush1.bf16.msra.mxu0 %v3264_v51 }
 0x392   :  { %1559 = vmatprep.subr.bf16.mxu1 %v3269_v58  ;;  %1600 = vmatprep.subr.bf16.mxu0 %v3271_v59 }
 0x395   :  { %1560 = vmatpush1.bf16.msra.mxu1 %v3278_v4  ;;  %1601 = vmatpush1.bf16.msra.mxu0 %v3280_v5 }
 0x396   :  { %1561 = vmatprep.subr.bf16.mxu1 %v3285_v8  ;;  %1602 = vmatprep.subr.bf16.mxu0 %v3287_v30 }
 0x399   :  { %1562 = vmatpush1.bf16.msra.mxu1 %v3296_v13  ;;  %1603 = vmatpush1.bf16.msra.mxu0 %v3298_v39 }
 0x39a   :  { %1563 = vmatprep.subr.bf16.mxu1 %v3303_v18  ;;  %1604 = vmatprep.subr.bf16.mxu0 %v3305_v19 }
 0x39d   :  { %1564 = vmatpush1.bf16.msra.mxu1 %v3309_v23  ;;  %1605 = vmatpush1.bf16.msra.mxu0 %v3311_v28 }
 0x39e   :  { %1700 = vmatprep.subr.bf16.mxu1 %v3164_v20  ;;  %1741 = vmatprep.subr.bf16.mxu0 %v3166_v21 }
 0x453   :  { %v1432_v6 = vpop.f32.mrb[32].mxu1  ;;  %v1473_v52 = vpop.f32.mrb[40].mxu0 }
 0x454   :  { %v1480_v56 = vadd.f32 %v1432_v6, %v3934_v53  ;;  %v1482_v62 = vadd.f32 %v1473_v52, %v3935_v57  ;;  %v1434_v50 = vpop.f32.mrb[33].mxu1  ;;  %v1475_v63 = vpop.f32.mrb[41].mxu0  ;;  %v3522_v6 = vadd.f32 %v1369_v17, %v1362_v34 }
 0x455   :  { %v1481_v31 = vadd.f32 %v1434_v50, %v3936_v46  ;;  %v1483_v11 = vadd.f32 %v1475_v63, %v3937_v3  ;;  %v1436_v12 = vpop.f32.mrb[34].mxu1  ;;  %v1477_v29 = vpop.f32.mrb[42].mxu0 }
 0x456   :  { %v2456_v38 = vmul.f32 -1.442695, %v1480_v56  ;;  %v1437_v35 = vpop.f32.mrb[35].mxu1  ;;  %v1478_v45 = vpop.f32.mrb[43].mxu0  ;;  %v3941_v12 = vld [vmem:[#allocation36_spill] sm:$0xff] }
 0x457   :  { %v2457_v20 = vmul.f32 -1.442695, %v1481_v31  ;;  %v2458_v21 = vmul.f32 -1.442695, %v1483_v11  ;;  %v3528_v63 = vpop.permute.xlu1 %1517 }
 0x458   :  { %2727 = vpow2.f32 %v2456_v38  ;;  %v1524_v10 = vmul.f32 %v3528_v63, %v3476_v47  ;;  %v3942_v38 = vld [vmem:[#allocation37_spill] sm:$0xff] }
 0x459   :  { %2729 = vpow2.f32 %v2457_v20 }
 0x45a   :  { %2731 = vpow2.f32 %v2458_v21 }
 0x45b   :  { %2733 = vtanh.f32 %v1482_v62 }
 0x462   :  { %v2728_v43 = vpop.eup %2727 }
 0x463   :  { %v2730_v41 = vpop.eup %2729  ;;  %v1487_v27 = vadd.f32 1.0, %v2728_v43 }
 0x464   :  { %v1493_v44 = vadd.f32 1.0, %v2730_v41  ;;  %v2732_v22 = vpop.eup %2731 }
 0x465   :  { %2735 = vrcp.f32 %v1487_v27  ;;  %v2734_v0 = vpop.eup %2733  ;;  %v1500_v56 = vadd.f32 1.0, %v2732_v22 }
 0x466   :  { %2737 = vrcp.f32 %v1493_v44 }
 0x467   :  { %2739 = vrcp.f32 %v1500_v56 }
 0x46f   :  { %v2736_v40 = vpop.eup %2735 }
 0x470   :  { %v2738_v52 = vpop.eup %2737  ;;  %v1504_v53 = vmul.f32 %v2736_v40, %v2734_v0 }
 0x471   :  { %v1503_v57 = vmul.f32 %v2738_v52, %v3522_v6  ;;  %v2740_v50 = vpop.eup %2739 }
 0x473   :  { %v3525_v62 = vadd.f32 %v1504_v53, %v1503_v57  ;;  %v1520_v53 = vmul.f32 %v3528_v63, %v3522_v6  ;;  %v3943_v6 = vld [vmem:[#allocation25_spill] sm:$0xff] }
 0x475   :  { %2741 = vtanh.f32 %v3525_v62  ;;  %v1513_v40 = vmul.f32 %v3938_v14, %v3525_v62 }
 0x47f   :  { %v2742_v48 = vpop.eup %2741 }
 0x480   :  { %v1507_v37 = vmul.f32 %v2742_v48, %v2740_v50  ;;  %v3583_v50 = vadd.f32 %v1520_v53, %v1513_v40 }
 0x482   :  { %v1523_v46 = vmul.f32 %v3938_v14, %v1507_v37 }
 0x484   :  { %v3533_v31 = vadd.f32 %v1524_v10, %v1523_v46  ;;  %1528 = vst [vmem:[#allocation14 + $0x10] sm:$0xff] %v1523_v46 }
 0x486   :  { %v1548_v3 = vpack.c.bf16 %v3533_v31, %v3533_v31 }
 0x488   :  { %1582 = vmatmul.mubr.bf16.vlgmr.msra.gmra.mrb[36].mxu1 %v1548_v3  ;;  %1623 = vmatmul.mubr.bf16.vlgmr.msra.gmra.mrb[44].mxu0 %v1548_v3 }
 0x489   :  { %1701 = vmatpush1.bf16.msra.mxu1 %v3196_v54  ;;  %1742 = vmatpush1.bf16.msra.mxu0 %v3198_v55  ;;  %v3569_v54 = vld [vmem:[#allocation12 + $0x4] ss:$16 sps:$4 sm:$0xff]   ;;  %v3572_v55 = vld [vmem:[#allocation12 + $0xc] ss:$16 sps:$4 sm:$0xff]  }
 0x48a   :  { %1702 = vmatprep.subr.bf16.mxu1 %v3202_v60  ;;  %1743 = vmatprep.subr.bf16.mxu0 %v3204_v61 }
 0x48b   :  { %1732 = vmatprep.mubr.bf16.mxu1 %v3932_v25  ;;  %1773 = vmatprep.mubr.bf16.mxu0 %v3932_v25 }
 0x48d   :  { %1703 = vmatpush1.bf16.msra.mxu1 %v3209_v1  ;;  %1744 = vmatpush1.bf16.msra.mxu0 %v3211_v2  ;;  %v3939_v1 = vld [vmem:[#allocation34_spill] sm:$0xff] }
 0x48e   :  { %1704 = vmatprep.subr.bf16.mxu1 %v3217_v7  ;;  %1745 = vmatprep.subr.bf16.mxu0 %v3221_v9  ;;  %v3940_v7 = vld [vmem:[#allocation35_spill] sm:$0xff] }
 0x491   :  { %1705 = vmatpush1.bf16.msra.mxu1 %v3226_v15  ;;  %1746 = vmatpush1.bf16.msra.mxu0 %v3228_v16 }
 0x492   :  { %1706 = vmatprep.subr.bf16.mxu1 %v3233_v24  ;;  %1747 = vmatprep.subr.bf16.mxu0 %v3235_v26 }
 0x495   :  { %1707 = vmatpush1.bf16.msra.mxu1 %v3244_v32  ;;  %1748 = vmatpush1.bf16.msra.mxu0 %v3246_v33 }
 0x496   :  { %1708 = vmatprep.subr.bf16.mxu1 %v3251_v36  ;;  %1749 = vmatprep.subr.bf16.mxu0 %v3255_v42 }
 0x499   :  { %1709 = vmatpush1.bf16.msra.mxu1 %v3260_v49  ;;  %1750 = vmatpush1.bf16.msra.mxu0 %v3264_v51 }
 0x49a   :  { %1710 = vmatprep.subr.bf16.mxu1 %v3269_v58  ;;  %1751 = vmatprep.subr.bf16.mxu0 %v3271_v59 }
 0x49d   :  { %1711 = vmatpush1.bf16.msra.mxu1 %v3278_v4  ;;  %1752 = vmatpush1.bf16.msra.mxu0 %v3280_v5 }
 0x49e   :  { %1712 = vmatprep.subr.bf16.mxu1 %v3285_v8  ;;  %1753 = vmatprep.subr.bf16.mxu0 %v3287_v30 }
 0x4a1   :  { %1713 = vmatpush1.bf16.msra.mxu1 %v3296_v13  ;;  %1754 = vmatpush1.bf16.msra.mxu0 %v3298_v39 }
 0x4a2   :  { %1714 = vmatprep.subr.bf16.mxu1 %v3303_v18  ;;  %1755 = vmatprep.subr.bf16.mxu0 %v3305_v19 }
 0x4a5   :  { %1715 = vmatpush1.bf16.msra.mxu1 %v3309_v23  ;;  %1756 = vmatpush1.bf16.msra.mxu0 %v3311_v28 }
 0x4a6   :  { %1851 = vmatprep.subr.bf16.mxu1 %v3569_v54  ;;  %1892 = vmatprep.subr.bf16.mxu0 %v3572_v55 }
 0x55b   :  { %v1583_v60 = vpop.f32.mrb[36].mxu1  ;;  %v1624_v61 = vpop.f32.mrb[44].mxu0 }
 0x55c   :  { %v1631_v2 = vadd.f32 %v1583_v60, %v3939_v1  ;;  %v1633_v9 = vadd.f32 %v1624_v61, %v3940_v7  ;;  %v1585_v47 = vpop.f32.mrb[37].mxu1  ;;  %v1626_v11 = vpop.f32.mrb[45].mxu0 }
 0x55d   :  { %v1632_v29 = vadd.f32 %v1585_v47, %v3941_v12  ;;  %v1634_v35 = vadd.f32 %v1626_v11, %v3942_v38  ;;  %v1587_v45 = vpop.f32.mrb[38].mxu1  ;;  %v1628_v20 = vpop.f32.mrb[46].mxu0  ;;  %v3601_v47 = vld [vmem:[#allocation12 + $0x8] ss:$16 sps:$4 sm:$0xff]   ;;  %v3604_v11 = vld [vmem:[#allocation12 + $0x24] ss:$16 sps:$4 sm:$0xff]  }
 0x55e   :  { %v2460_v21 = vmul.f32 -1.442695, %v1631_v2  ;;  %v1588_v43 = vpop.f32.mrb[39].mxu1  ;;  %v1629_v41 = vpop.f32.mrb[47].mxu0  ;;  %v3612_v12 = vld [vmem:[#allocation12 + $0x20] ss:$16 sps:$4 sm:$0xff]  }
 0x55f   :  { %v2461_v27 = vmul.f32 -1.442695, %v1632_v29  ;;  %v2462_v44 = vmul.f32 -1.442695, %v1634_v35  ;;  %v3589_v61 = vpop.permute.xlu1 %1668  ;;  %v3615_v29 = vld [vmem:[#allocation12 + $0x28] ss:$16 sps:$4 sm:$0xff]  }
 0x560   :  { %2743 = vpow2.f32 %v2460_v21  ;;  %v1675_v1 = vmul.f32 %v3589_v61, %v3533_v31  ;;  %v3607_v31 = vld [vmem:[#allocation12 + $0x2c] ss:$16 sps:$4 sm:$0xff]   ;;  %v3618_v38 = vld [vmem:[#allocation12 + $0x44] ss:$16 sps:$4 sm:$0xff]   ;;  %v1671_v43 = vmul.f32 %v3589_v61, %v3583_v50  ;;  %v3693_v61 = vld [vmem:[#allocation12 + $0x60] ss:$16 sps:$4 sm:$0xff]  }
 0x561   :  { %2745 = vpow2.f32 %v2461_v27  ;;  %v3621_v35 = vld [vmem:[#allocation12 + $0x4c] ss:$16 sps:$4 sm:$0xff]  }
 0x562   :  { %2747 = vpow2.f32 %v2462_v44 }
 0x563   :  { %2749 = vtanh.f32 %v1633_v9  ;;  %v3598_v9 = vld [vmem:[#allocation12] ss:$16 sps:$4 sm:$0xff]  }
 0x56a   :  { %v2744_v34 = vpop.eup %2743 }
 0x56b   :  { %v2746_v22 = vpop.eup %2745  ;;  %v1638_v17 = vadd.f32 1.0, %v2744_v34 }
 0x56c   :  { %v1644_v0 = vadd.f32 1.0, %v2746_v22  ;;  %v2748_v52 = vpop.eup %2747 }
 0x56d   :  { %2751 = vrcp.f32 %v1638_v17  ;;  %v2750_v56 = vpop.eup %2749  ;;  %v1651_v10 = vadd.f32 1.0, %v2748_v52 }
 0x56e   :  { %2753 = vrcp.f32 %v1644_v0 }
 0x56f   :  { %2755 = vrcp.f32 %v1651_v10 }
 0x577   :  { %v2752_v57 = vpop.eup %2751 }
 0x578   :  { %v2754_v48 = vpop.eup %2753  ;;  %v1655_v37 = vmul.f32 %v2752_v57, %v2750_v56  ;;  %v3662_v57 = vpop.permute.xlu1 %1819 }
 0x579   :  { %v1654_v46 = vmul.f32 %v2754_v48, %v3583_v50  ;;  %v2756_v60 = vpop.eup %2755  ;;  %v3948_v50 = vld [vmem:[#allocation26_spill] sm:$0xff] }
 0x57b   :  { %v3586_v3 = vadd.f32 %v1655_v37, %v1654_v46 }
 0x57d   :  { %2757 = vtanh.f32 %v3586_v3  ;;  %v1664_v20 = vmul.f32 %v3943_v6, %v3586_v3  ;;  %v3681_v3 = vld [vmem:[#allocation12 + $0x40] ss:$16 sps:$4 sm:$0xff]  }
 0x57f   :  { %v3656_v44 = vadd.f32 %v1671_v43, %v1664_v20 }
 0x587   :  { %v2758_v62 = vpop.eup %2757 }
 0x588   :  { %v1658_v14 = vmul.f32 %v2758_v62, %v2756_v60  ;;  %v3684_v60 = vld [vmem:[#allocation12 + $0x48] ss:$16 sps:$4 sm:$0xff]   ;;  %v3687_v62 = vld [vmem:[#allocation12 + $0x64] ss:$16 sps:$4 sm:$0xff]  }
 0x58a   :  { %v1674_v63 = vmul.f32 %v3943_v6, %v1658_v14  ;;  %v3690_v14 = vld [vmem:[#allocation12 + $0x6c] ss:$16 sps:$4 sm:$0xff]   ;;  %v3696_v6 = vld [vmem:[#allocation12 + $0x68] ss:$16 sps:$4 sm:$0xff]  }
 0x58c   :  { %v3594_v2 = vadd.f32 %v1675_v1, %v1674_v63  ;;  %1679 = vst [vmem:[#allocation14 + $0x18] sm:$0xff] %v1674_v63  ;;  %v3699_v63 = vld [vmem:[#allocation12 + $0x84] ss:$16 sps:$4 sm:$0xff]   ;;  %v3702_v1 = vld [vmem:[#allocation12 + $0x8c] ss:$16 sps:$4 sm:$0xff]  }
 0x58e   :  { %v1699_v7 = vpack.c.bf16 %v3594_v2, %v3594_v2  ;;  %v1826_v37 = vmul.f32 %v3662_v57, %v3594_v2  ;;  %v3705_v2 = vld [vmem:[#allocation12 + $0x80] ss:$16 sps:$4 sm:$0xff]  }
 0x590   :  { %1733 = vmatmul.mubr.bf16.vlgmr.msra.gmra.mrb[40].mxu1 %v1699_v7  ;;  %1774 = vmatmul.mubr.bf16.vlgmr.msra.gmra.mrb[48].mxu0 %v1699_v7  ;;  %v3708_v7 = vld [vmem:[#allocation12 + $0x88] ss:$16 sps:$4 sm:$0xff]  }
 0x591   :  { %1852 = vmatpush1.bf16.msra.mxu1 %v3598_v9  ;;  %1893 = vmatpush1.bf16.msra.mxu0 %v3601_v47 }
 0x592   :  { %1853 = vmatprep.subr.bf16.mxu1 %v3604_v11  ;;  %1894 = vmatprep.subr.bf16.mxu0 %v3607_v31 }
 0x593   :  { %1883 = vmatprep.mubr.bf16.mxu1 %v3932_v25  ;;  %1924 = vmatprep.mubr.bf16.mxu0 %v3932_v25 }
 0x595   :  { %1854 = vmatpush1.bf16.msra.mxu1 %v3612_v12  ;;  %1895 = vmatpush1.bf16.msra.mxu0 %v3615_v29 }
 0x596   :  { %1855 = vmatprep.subr.bf16.mxu1 %v3618_v38  ;;  %1896 = vmatprep.subr.bf16.mxu0 %v3621_v35 }
 0x599   :  { %1856 = vmatpush1.bf16.msra.mxu1 %v3226_v15  ;;  %1897 = vmatpush1.bf16.msra.mxu0 %v3228_v16 }
 0x59a   :  { %1857 = vmatprep.subr.bf16.mxu1 %v3233_v24  ;;  %1898 = vmatprep.subr.bf16.mxu0 %v3235_v26  ;;  %v3944_v24 = vld [vmem:[#allocation38_spill] sm:$0xff] }
 0x59d   :  { %1858 = vmatpush1.bf16.msra.mxu1 %v3244_v32  ;;  %1899 = vmatpush1.bf16.msra.mxu0 %v3246_v33  ;;  %v3945_v32 = vld [vmem:[#allocation39_spill] sm:$0xff] }
 0x59e   :  { %1859 = vmatprep.subr.bf16.mxu1 %v3251_v36  ;;  %1900 = vmatprep.subr.bf16.mxu0 %v3255_v42 }
 0x5a1   :  { %1860 = vmatpush1.bf16.msra.mxu1 %v3260_v49  ;;  %1901 = vmatpush1.bf16.msra.mxu0 %v3264_v51  ;;  %v3946_v49 = vld [vmem:[#allocation40_spill] sm:$0xff] }
 0x5a2   :  { %1861 = vmatprep.subr.bf16.mxu1 %v3269_v58  ;;  %1902 = vmatprep.subr.bf16.mxu0 %v3271_v59  ;;  %v3947_v58 = vld [vmem:[#allocation41_spill] sm:$0xff] }
 0x5a5   :  { %1862 = vmatpush1.bf16.msra.mxu1 %v3278_v4  ;;  %1903 = vmatpush1.bf16.msra.mxu0 %v3280_v5 }
 0x5a6   :  { %1863 = vmatprep.subr.bf16.mxu1 %v3285_v8  ;;  %1904 = vmatprep.subr.bf16.mxu0 %v3287_v30 }
 0x5a9   :  { %1864 = vmatpush1.bf16.msra.mxu1 %v3296_v13  ;;  %1905 = vmatpush1.bf16.msra.mxu0 %v3298_v39 }
 0x5aa   :  { %1865 = vmatprep.subr.bf16.mxu1 %v3303_v18  ;;  %1906 = vmatprep.subr.bf16.mxu0 %v3305_v19 }
 0x5ad   :  { %1866 = vmatpush1.bf16.msra.mxu1 %v3309_v23  ;;  %1907 = vmatpush1.bf16.msra.mxu0 %v3311_v28 }
 0x5ae   :  { %2002 = vmatprep.subr.bf16.mxu1 %v3569_v54  ;;  %2043 = vmatprep.subr.bf16.mxu0 %v3572_v55 }
 0x663   :  { %v1734_v15 = vpop.f32.mrb[40].mxu1  ;;  %v1775_v16 = vpop.f32.mrb[48].mxu0 }
 0x664   :  { %v1782_v26 = vadd.f32 %v1734_v15, %v3944_v24  ;;  %v1784_v33 = vadd.f32 %v1775_v16, %v3945_v32  ;;  %v1736_v36 = vpop.f32.mrb[41].mxu1  ;;  %v1777_v42 = vpop.f32.mrb[49].mxu0  ;;  %v3711_v15 = vld [vmem:[#allocation12 + $0xa4] ss:$16 sps:$4 sm:$0xff]   ;;  %v3714_v16 = vld [vmem:[#allocation12 + $0xac] ss:$16 sps:$4 sm:$0xff]  }
 0x665   :  { %v1783_v51 = vadd.f32 %v1736_v36, %v3946_v49  ;;  %v1785_v59 = vadd.f32 %v1777_v42, %v3947_v58  ;;  %v1738_v4 = vpop.f32.mrb[42].mxu1  ;;  %v1779_v5 = vpop.f32.mrb[50].mxu0  ;;  %v3717_v24 = vld [vmem:[#allocation12 + $0xa0] ss:$16 sps:$4 sm:$0xff]   ;;  %v3723_v32 = vld [vmem:[#allocation12 + $0xc4] ss:$16 sps:$4 sm:$0xff]  }
 0x666   :  { %v2464_v8 = vmul.f32 -1.442695, %v1782_v26  ;;  %v1739_v30 = vpop.f32.mrb[43].mxu1  ;;  %v1780_v13 = vpop.f32.mrb[51].mxu0  ;;  %v3720_v26 = vld [vmem:[#allocation12 + $0xa8] ss:$16 sps:$4 sm:$0xff]  }
 0x667   :  { %v2465_v39 = vmul.f32 -1.442695, %v1783_v51  ;;  %v2466_v18 = vmul.f32 -1.442695, %v1785_v59  ;;  %v3729_v36 = vld [vmem:[#allocation12 + $0xc0] ss:$16 sps:$4 sm:$0xff]  }
 0x668   :  { %2759 = vpow2.f32 %v2464_v8  ;;  %v3732_v42 = vld [vmem:[#allocation12 + $0xc8] ss:$16 sps:$4 sm:$0xff]   ;;  %v3735_v49 = vld [vmem:[#allocation12 + $0xe4] ss:$16 sps:$4 sm:$0xff]   ;;  %v3738_v51 = vld [vmem:[#allocation12 + $0xec] ss:$16 sps:$4 sm:$0xff]  }
 0x669   :  { %2761 = vpow2.f32 %v2465_v39  ;;  %v3741_v58 = vld [vmem:[#allocation12 + $0xe0] ss:$16 sps:$4 sm:$0xff]   ;;  %v3744_v59 = vld [vmem:[#allocation12 + $0xe8] ss:$16 sps:$4 sm:$0xff]  }
 0x66a   :  { %2763 = vpow2.f32 %v2466_v18  ;;  %v3949_v8 = vld [vmem:[#allocation42_spill] sm:$0xff]  ;;  %v3950_v13 = vld [vmem:[#allocation43_spill] sm:$0xff] }
 0x66b   :  { %2765 = vtanh.f32 %v1784_v33  ;;  %v3726_v33 = vld [vmem:[#allocation12 + $0xcc] ss:$16 sps:$4 sm:$0xff]  }
 0x672   :  { %v2760_v19 = vpop.eup %2759 }
 0x673   :  { %v2762_v23 = vpop.eup %2761  ;;  %v1789_v28 = vadd.f32 1.0, %v2760_v19 }
 0x674   :  { %v1795_v45 = vadd.f32 1.0, %v2762_v23  ;;  %v2764_v21 = vpop.eup %2763  ;;  %v3951_v23 = vld [vmem:[#allocation44_spill] sm:$0xff] }
 0x675   :  { %2767 = vrcp.f32 %v1789_v28  ;;  %v2766_v41 = vpop.eup %2765  ;;  %v1802_v17 = vadd.f32 1.0, %v2764_v21 }
 0x676   :  { %2769 = vrcp.f32 %v1795_v45  ;;  %v3952_v45 = vld [vmem:[#allocation45_spill] sm:$0xff] }
 0x677   :  { %2771 = vrcp.f32 %v1802_v17 }
 0x67f   :  { %v2768_v27 = vpop.eup %2767 }
 0x680   :  { %v2770_v34 = vpop.eup %2769  ;;  %v1806_v22 = vmul.f32 %v2768_v27, %v2766_v41 }
 0x681   :  { %v1805_v0 = vmul.f32 %v2770_v34, %v3656_v44  ;;  %v2772_v52 = vpop.eup %2771 }
 0x683   :  { %v3659_v40 = vadd.f32 %v1806_v22, %v1805_v0 }
 0x685   :  { %2773 = vtanh.f32 %v3659_v40 }
 0x68f   :  { %v2774_v53 = vpop.eup %2773 }
 0x690   :  { %v1809_v56 = vmul.f32 %v2774_v53, %v2772_v52  ;;  %v1815_v53 = vmul.f32 %v3948_v50, %v3659_v40 }
 0x692   :  { %v1825_v48 = vmul.f32 %v3948_v50, %v1809_v56 }
 0x694   :  { %v3667_v10 = vadd.f32 %v1826_v37, %v1825_v48  ;;  %1830 = vst [vmem:[#allocation14 + $0x20] sm:$0xff] %v1825_v48  ;;  %v1822_v48 = vmul.f32 %v3662_v57, %v3656_v44  ;;  %v3953_v44 = vld [vmem:[#allocation27_spill] sm:$0xff] }
 0x696   :  { %v1850_v46 = vpack.c.bf16 %v3667_v10, %v3667_v10 }
 0x698   :  { %1884 = vmatmul.mubr.bf16.vlgmr.msra.gmra.mrb[44].mxu1 %v1850_v46  ;;  %1925 = vmatmul.mubr.bf16.vlgmr.msra.gmra.mrb[52].mxu0 %v1850_v46 }
 0x699   :  { %2003 = vmatpush1.bf16.msra.mxu1 %v3598_v9  ;;  %2044 = vmatpush1.bf16.msra.mxu0 %v3601_v47 }
 0x69a   :  { %2004 = vmatprep.subr.bf16.mxu1 %v3604_v11  ;;  %2045 = vmatprep.subr.bf16.mxu0 %v3607_v31 }
 0x69b   :  { %2034 = vmatprep.mubr.bf16.mxu1 %v3932_v25  ;;  %2075 = vmatprep.mubr.bf16.mxu0 %v3932_v25 }
 0x69d   :  { %2005 = vmatpush1.bf16.msra.mxu1 %v3612_v12  ;;  %2046 = vmatpush1.bf16.msra.mxu0 %v3615_v29 }
 0x69e   :  { %2006 = vmatprep.subr.bf16.mxu1 %v3618_v38  ;;  %2047 = vmatprep.subr.bf16.mxu0 %v3621_v35 }
 0x6a1   :  { %2007 = vmatpush1.bf16.msra.mxu1 %v3681_v3  ;;  %2048 = vmatpush1.bf16.msra.mxu0 %v3684_v60 }
 0x6a2   :  { %2008 = vmatprep.subr.bf16.mxu1 %v3687_v62  ;;  %2049 = vmatprep.subr.bf16.mxu0 %v3690_v14 }
 0x6a5   :  { %2009 = vmatpush1.bf16.msra.mxu1 %v3693_v61  ;;  %2050 = vmatpush1.bf16.msra.mxu0 %v3696_v6 }
 0x6a6   :  { %2010 = vmatprep.subr.bf16.mxu1 %v3699_v63  ;;  %2051 = vmatprep.subr.bf16.mxu0 %v3702_v1 }
 0x6a9   :  { %2011 = vmatpush1.bf16.msra.mxu1 %v3705_v2  ;;  %2052 = vmatpush1.bf16.msra.mxu0 %v3708_v7 }
 0x6aa   :  { %2012 = vmatprep.subr.bf16.mxu1 %v3711_v15  ;;  %2053 = vmatprep.subr.bf16.mxu0 %v3714_v16 }
 0x6ad   :  { %2013 = vmatpush1.bf16.msra.mxu1 %v3717_v24  ;;  %2054 = vmatpush1.bf16.msra.mxu0 %v3720_v26 }
 0x6ae   :  { %2014 = vmatprep.subr.bf16.mxu1 %v3723_v32  ;;  %2055 = vmatprep.subr.bf16.mxu0 %v3726_v33 }
 0x6b1   :  { %2015 = vmatpush1.bf16.msra.mxu1 %v3729_v36  ;;  %2056 = vmatpush1.bf16.msra.mxu0 %v3732_v42 }
 0x6b2   :  { %2016 = vmatprep.subr.bf16.mxu1 %v3735_v49  ;;  %2057 = vmatprep.subr.bf16.mxu0 %v3738_v51 }
 0x6b5   :  { %2017 = vmatpush1.bf16.msra.mxu1 %v3741_v58  ;;  %2058 = vmatpush1.bf16.msra.mxu0 %v3744_v59 }
 0x6b6   :  { %2153 = vmatprep.subr.bf16.mxu1 %v3569_v54  ;;  %2194 = vmatprep.subr.bf16.mxu0 %v3572_v55 }
 0x76b   :  { %v1885_v4 = vpop.f32.mrb[44].mxu1  ;;  %v1926_v5 = vpop.f32.mrb[52].mxu0 }
 0x76c   :  { %v1933_v30 = vadd.f32 %v1885_v4, %v3949_v8  ;;  %v1935_v39 = vadd.f32 %v1926_v5, %v3950_v13  ;;  %v1887_v18 = vpop.f32.mrb[45].mxu1  ;;  %v1928_v19 = vpop.f32.mrb[53].mxu0  ;;  %v3757_v4 = vadd.f32 %v1822_v48, %v1815_v53 }
 0x76d   :  { %v1934_v28 = vadd.f32 %v1887_v18, %v3951_v23  ;;  %v1936_v20 = vadd.f32 %v1928_v19, %v3952_v45  ;;  %v1889_v21 = vpop.f32.mrb[46].mxu1  ;;  %v1930_v43 = vpop.f32.mrb[54].mxu0 }
 0x76e   :  { %v2468_v41 = vmul.f32 -1.442695, %v1933_v30  ;;  %v1890_v27 = vpop.f32.mrb[47].mxu1  ;;  %v1931_v34 = vpop.f32.mrb[55].mxu0 }
 0x76f   :  { %v2469_v54 = vmul.f32 -1.442695, %v1934_v28  ;;  %v2470_v55 = vmul.f32 -1.442695, %v1936_v20  ;;  %v3763_v19 = vpop.permute.xlu1 %1970 }
 0x770   :  { %2775 = vpow2.f32 %v2468_v41  ;;  %v1977_v23 = vmul.f32 %v3763_v19, %v3667_v10 }
 0x771   :  { %2777 = vpow2.f32 %v2469_v54  ;;  %v3958_v54 = vld [vmem:[#allocation28_spill] sm:$0xff] }
 0x772   :  { %2779 = vpow2.f32 %v2470_v55 }
 0x773   :  { %2781 = vtanh.f32 %v1935_v39  ;;  %v2122_v34 = vpop.permute.xlu1 %2121 }
 0x77a   :  { %v2776_v22 = vpop.eup %2775 }
 0x77b   :  { %v2778_v17 = vpop.eup %2777  ;;  %v1940_v0 = vadd.f32 1.0, %v2776_v22 }
 0x77c   :  { %v1946_v52 = vadd.f32 1.0, %v2778_v17  ;;  %v2780_v56 = vpop.eup %2779 }
 0x77d   :  { %2783 = vrcp.f32 %v1940_v0  ;;  %v2782_v37 = vpop.eup %2781  ;;  %v1953_v30 = vadd.f32 1.0, %v2780_v56  ;;  %v3959_v56 = vld [vmem:[#allocation50_spill] sm:$0xff] }
 0x77e   :  { %2785 = vrcp.f32 %v1946_v52 }
 0x77f   :  { %2787 = vrcp.f32 %v1953_v30 }
 0x787   :  { %v2784_v46 = vpop.eup %2783 }
 0x788   :  { %v2786_v5 = vpop.eup %2785  ;;  %v1957_v8 = vmul.f32 %v2784_v46, %v2782_v37  ;;  %v3960_v37 = vld [vmem:[#allocation51_spill] sm:$0xff] }
 0x789   :  { %v1956_v13 = vmul.f32 %v2786_v5, %v3757_v4  ;;  %v2788_v18 = vpop.eup %2787 }
 0x78b   :  { %v3760_v39 = vadd.f32 %v1957_v8, %v1956_v13  ;;  %v3961_v8 = vld [vmem:[#allocation52_spill] sm:$0xff]  ;;  %v3962_v13 = vld [vmem:[#allocation53_spill] sm:$0xff] }
 0x78d   :  { %2789 = vtanh.f32 %v3760_v39 }
 0x797   :  { %v2790_v40 = vpop.eup %2789 }
 0x798   :  { %v1960_v50 = vmul.f32 %v2790_v40, %v2788_v18 }
 0x79a   :  { %v1976_v57 = vmul.f32 %v3953_v44, %v1960_v50 }
 0x79c   :  { %v3768_v28 = vadd.f32 %v1977_v23, %v1976_v57  ;;  %1981 = vst [vmem:[#allocation14 + $0x28] sm:$0xff] %v1976_v57 }
 0x79e   :  { %v2001_v45 = vpack.c.bf16 %v3768_v28, %v3768_v28  ;;  %v2128_v22 = vmul.f32 %v2122_v34, %v3768_v28 }
 0x7a0   :  { %2035 = vmatmul.mubr.bf16.vlgmr.msra.gmra.mrb[48].mxu1 %v2001_v45  ;;  %2076 = vmatmul.mubr.bf16.vlgmr.msra.gmra.mrb[56].mxu0 %v2001_v45 }
 0x7a1   :  { %2154 = vmatpush1.bf16.msra.mxu1 %v3598_v9  ;;  %2195 = vmatpush1.bf16.msra.mxu0 %v3601_v47  ;;  %v3954_v47 = vld [vmem:[#allocation46_spill] sm:$0xff] }
 0x7a2   :  { %2155 = vmatprep.subr.bf16.mxu1 %v3604_v11  ;;  %2196 = vmatprep.subr.bf16.mxu0 %v3607_v31  ;;  %v3955_v31 = vld [vmem:[#allocation47_spill] sm:$0xff] }
 0x7a3   :  { %2185 = vmatprep.mubr.bf16.mxu1 %v3932_v25  ;;  %2226 = vmatprep.mubr.bf16.mxu0 %v3932_v25 }
 0x7a5   :  { %2156 = vmatpush1.bf16.msra.mxu1 %v3612_v12  ;;  %2197 = vmatpush1.bf16.msra.mxu0 %v3615_v29 }
 0x7a6   :  { %2157 = vmatprep.subr.bf16.mxu1 %v3618_v38  ;;  %2198 = vmatprep.subr.bf16.mxu0 %v3621_v35  ;;  %v3956_v35 = vld [vmem:[#allocation48_spill] sm:$0xff] }
 0x7a9   :  { %2158 = vmatpush1.bf16.msra.mxu1 %v3681_v3  ;;  %2199 = vmatpush1.bf16.msra.mxu0 %v3684_v60  ;;  %v3957_v3 = vld [vmem:[#allocation49_spill] sm:$0xff] }
 0x7aa   :  { %2159 = vmatprep.subr.bf16.mxu1 %v3687_v62  ;;  %2200 = vmatprep.subr.bf16.mxu0 %v3690_v14 }
 0x7ad   :  { %2160 = vmatpush1.bf16.msra.mxu1 %v3693_v61  ;;  %2201 = vmatpush1.bf16.msra.mxu0 %v3696_v6 }
 0x7ae   :  { %2161 = vmatprep.subr.bf16.mxu1 %v3699_v63  ;;  %2202 = vmatprep.subr.bf16.mxu0 %v3702_v1 }
 0x7b1   :  { %2162 = vmatpush1.bf16.msra.mxu1 %v3705_v2  ;;  %2203 = vmatpush1.bf16.msra.mxu0 %v3708_v7 }
 0x7b2   :  { %2163 = vmatprep.subr.bf16.mxu1 %v3711_v15  ;;  %2204 = vmatprep.subr.bf16.mxu0 %v3714_v16 }
 0x7b5   :  { %2164 = vmatpush1.bf16.msra.mxu1 %v3717_v24  ;;  %2205 = vmatpush1.bf16.msra.mxu0 %v3720_v26  ;;  %v1966_v26 = vmul.f32 %v3953_v44, %v3760_v39 }
 0x7b6   :  { %2165 = vmatprep.subr.bf16.mxu1 %v3723_v32  ;;  %2206 = vmatprep.subr.bf16.mxu0 %v3726_v33  ;;  %v1973_v33 = vmul.f32 %v3763_v19, %v3757_v4 }
 0x7b9   :  { %2166 = vmatpush1.bf16.msra.mxu1 %v3729_v36  ;;  %2207 = vmatpush1.bf16.msra.mxu0 %v3732_v42 }
 0x7ba   :  { %2167 = vmatprep.subr.bf16.mxu1 %v3735_v49  ;;  %2208 = vmatprep.subr.bf16.mxu0 %v3738_v51  ;;  %v1974_v49 = vadd.f32 %v1973_v33, %v1966_v26 }
 0x7bd   :  { %2168 = vmatpush1.bf16.msra.mxu1 %v3741_v58  ;;  %2209 = vmatpush1.bf16.msra.mxu0 %v3744_v59 }
 0x873   :  { %v2036_v25 = vpop.f32.mrb[48].mxu1  ;;  %v2077_v9 = vpop.f32.mrb[56].mxu0 }
 0x874   :  { %v2084_v11 = vadd.f32 %v2036_v25, %v3954_v47  ;;  %v2086_v12 = vadd.f32 %v2077_v9, %v3955_v31  ;;  %v2038_v29 = vpop.f32.mrb[49].mxu1  ;;  %v2079_v38 = vpop.f32.mrb[57].mxu0  ;;  %v2124_v31 = vmul.f32 %v2122_v34, %v1974_v49 }
 0x875   :  { %v2085_v10 = vadd.f32 %v2038_v29, %v3956_v35  ;;  %v2087_v60 = vadd.f32 %v2079_v38, %v3957_v3  ;;  %v2040_v62 = vpop.f32.mrb[50].mxu1  ;;  %v2081_v14 = vpop.f32.mrb[58].mxu0 }
 0x876   :  { %v2472_v61 = vmul.f32 -1.442695, %v2084_v11  ;;  %v2041_v6 = vpop.f32.mrb[51].mxu1  ;;  %v2082_v63 = vpop.f32.mrb[59].mxu0 }
 0x877   :  { %v2473_v1 = vmul.f32 -1.442695, %v2085_v10  ;;  %v2474_v2 = vmul.f32 -1.442695, %v2087_v60  ;;  %v2273_v63 = vpop.permute.xlu1 %2272 }
 0x878   :  { %2791 = vpow2.f32 %v2472_v61 }
 0x879   :  { %2793 = vpow2.f32 %v2473_v1  ;;  %v3963_v1 = vld [vmem:[#allocation29_spill] sm:$0xff] }
 0x87a   :  { %2795 = vpow2.f32 %v2474_v2 }
 0x87b   :  { %2797 = vtanh.f32 %v2086_v12 }
 0x882   :  { %v2792_v7 = vpop.eup %2791 }
 0x883   :  { %v2794_v15 = vpop.eup %2793  ;;  %v2091_v16 = vadd.f32 1.0, %v2792_v7 }
 0x884   :  { %v2097_v24 = vadd.f32 1.0, %v2794_v15  ;;  %v2796_v32 = vpop.eup %2795 }
 0x885   :  { %2799 = vrcp.f32 %v2091_v16  ;;  %v2798_v36 = vpop.eup %2797  ;;  %v2104_v59 = vadd.f32 1.0, %v2796_v32 }
 0x886   :  { %2801 = vrcp.f32 %v2097_v24 }
 0x887   :  { %2803 = vrcp.f32 %v2104_v59 }
 0x88f   :  { %v2800_v42 = vpop.eup %2799 }
 0x890   :  { %v2802_v51 = vpop.eup %2801  ;;  %v2108_v58 = vmul.f32 %v2800_v42, %v2798_v36 }
 0x891   :  { %v2107_v20 = vmul.f32 %v2802_v51, %v1974_v49  ;;  %v2804_v43 = vpop.eup %2803 }
 0x893   :  { %v2109_v21 = vadd.f32 %v2108_v58, %v2107_v20 }
 0x895   :  { %2805 = vtanh.f32 %v2109_v21  ;;  %v2117_v47 = vmul.f32 %v3958_v54, %v2109_v21 }
 0x897   :  { %v2125_v38 = vadd.f32 %v2124_v31, %v2117_v47 }
 0x89f   :  { %v2806_v41 = vpop.eup %2805 }
 0x8a0   :  { %v2111_v27 = vmul.f32 %v2806_v41, %v2804_v43 }
 0x8a2   :  { %v2127_v55 = vmul.f32 %v3958_v54, %v2111_v27 }
 0x8a4   :  { %v2129_v17 = vadd.f32 %v2128_v22, %v2127_v55  ;;  %2132 = vst [vmem:[#allocation14 + $0x30] sm:$0xff] %v2127_v55 }
 0x8a6   :  { %v2152_v0 = vpack.c.bf16 %v2129_v17, %v2129_v17  ;;  %v2279_v7 = vmul.f32 %v2273_v63, %v2129_v17 }
 0x8a8   :  { %2186 = vmatmul.mubr.bf16.vlgmr.msra.gmra.mrb[52].mxu1 %v2152_v0  ;;  %2227 = vmatmul.mubr.bf16.vlgmr.msra.gmra.mrb[60].mxu0 %v2152_v0 }
 0x97b   :  { %v2187_v52 = vpop.f32.mrb[52].mxu1  ;;  %v2228_v53 = vpop.f32.mrb[60].mxu0 }
 0x97c   :  { %v2235_v48 = vadd.f32 %v2187_v52, %v3959_v56  ;;  %v2237_v46 = vadd.f32 %v2228_v53, %v3960_v37  ;;  %v2189_v4 = vpop.f32.mrb[53].mxu1  ;;  %v2230_v5 = vpop.f32.mrb[61].mxu0 }
 0x97d   :  { %v2236_v30 = vadd.f32 %v2189_v4, %v3961_v8  ;;  %v2238_v39 = vadd.f32 %v2230_v5, %v3962_v13  ;;  %v2191_v18 = vpop.f32.mrb[54].mxu1  ;;  %v2232_v40 = vpop.f32.mrb[62].mxu0 }
 0x97e   :  { %v2476_v50 = vmul.f32 -1.442695, %v2235_v48  ;;  %v2192_v19 = vpop.f32.mrb[55].mxu1  ;;  %v2233_v44 = vpop.f32.mrb[63].mxu0 }
 0x97f   :  { %v2477_v57 = vmul.f32 -1.442695, %v2236_v30  ;;  %v2478_v23 = vmul.f32 -1.442695, %v2238_v39 }
 0x980   :  { %2807 = vpow2.f32 %v2476_v50 }
 0x981   :  { %2809 = vpow2.f32 %v2477_v57 }
 0x982   :  { %2811 = vpow2.f32 %v2478_v23 }
 0x983   :  { %2813 = vtanh.f32 %v2237_v46 }
 0x98a   :  { %v2808_v28 = vpop.eup %2807 }
 0x98b   :  { %v2810_v45 = vpop.eup %2809  ;;  %v2242_v25 = vadd.f32 1.0, %v2808_v28 }
 0x98c   :  { %v2248_v9 = vadd.f32 1.0, %v2810_v45  ;;  %v2812_v11 = vpop.eup %2811 }
 0x98d   :  { %2815 = vrcp.f32 %v2242_v25  ;;  %v2814_v12 = vpop.eup %2813  ;;  %v2255_v3 = vadd.f32 1.0, %v2812_v11 }
 0x98e   :  { %2817 = vrcp.f32 %v2248_v9 }
 0x98f   :  { %2819 = vrcp.f32 %v2255_v3 }
 0x997   :  { %v2816_v29 = vpop.eup %2815 }
 0x998   :  { %v2818_v35 = vpop.eup %2817  ;;  %v2259_v10 = vmul.f32 %v2816_v29, %v2814_v12 }
 0x999   :  { %v2258_v60 = vmul.f32 %v2818_v35, %v2125_v38  ;;  %v2820_v14 = vpop.eup %2819 }
 0x99b   :  { %v2260_v62 = vadd.f32 %v2259_v10, %v2258_v60 }
 0x99d   :  { %2821 = vtanh.f32 %v2260_v62 }
 0x9a7   :  { %v2822_v61 = vpop.eup %2821 }
 0x9a8   :  { %v2262_v6 = vmul.f32 %v2822_v61, %v2820_v14 }
 0x9aa   :  { %v2278_v2 = vmul.f32 %v3963_v1, %v2262_v6 }
 0x9ac   :  { %v2280_v15 = vadd.f32 %v2279_v7, %v2278_v2  ;;  %2283 = vst [vmem:[#allocation14 + $0x38] sm:$0xff] %v2278_v2 }
 0x9ad   :  { %2954 = shalt.err (!%p2951_p8)
}
 0x9ae   :  { %s2955_s27 = scalar_lea.hbm %s3883_s7, 1024 }
 0x9af   :  { %p2956_p9 = scmp.ne.s32.totalorder %s3883_s7, %s2955_s27  ;;  %p2959_p10 = scmp.lt.u32.totalorder %s2955_s27, %s3883_s7 }
 0x9b1   :  { %p2961_p11 = pnand %p2959_p10, %p2956_p9 }
 0x9b3   :  { %2964 = shalt.err (!%p2961_p11)
}
 0x9b4   :  { %s3035_s12 = smov 128   ;;  %s3036_s2 = smov 8   ;;  %2290 = vst [vmem:[#allocation15] sm:$0xff] %v2280_v15 }
 0x9b5   :  { %2302 = dma.vmem_to_hbm [thread:$0]  %s2297_s20, 1024, %s3883_s7, [#allocation8], %s3035_s12, %s3035_s12, %s3036_s2  }
 0x9b6   :  { %s2965_s14 = scalar_lea.vmem %s3820_s22, 128  ;;  %p2970_p13 = scmp.lt.s32.totalorder %s3820_s22, %s3820_s22 }
 0x9b7   :  { %p2966_p12 = scmp.ne.s32.totalorder %s3820_s22, %s2965_s14  ;;  %p2971_p0 = scmp.lt.s32.totalorder %s2965_s14, %s2965_s14 }
 0x9b9   :  { %p2972_p1 = por %p2971_p0, %p2970_p13 }
 0x9bb   :  { %p2973_p2 = pnand %p2972_p1, %p2966_p12 }
 0x9bd   :  { %2976 = shalt.err (!%p2973_p2)
}
 0x9be   :  { %s2977_s16 = scalar_lea.hbm %s3884_s8, 128 }
 0x9bf   :  { %p2978_p3 = scmp.ne.s32.totalorder %s3884_s8, %s2977_s16  ;;  %p2981_p4 = scmp.lt.u32.totalorder %s2977_s16, %s3884_s8 }
 0x9c1   :  { %p2983_p5 = pnand %p2981_p4, %p2978_p3 }
 0x9c3   :  { %2986 = shalt.err (!%p2983_p5)
}
 0x9c4   :  { %2312 = dma.vmem_to_hbm [thread:$0]  %s3820_s22, 128, %s3884_s8, [#allocation16]  }
 0x9c5   :  { %s2987_s19 = scalar_lea.vmem %s3822_s25, 1024  ;;  %p2992_p7 = scmp.lt.s32.totalorder %s3822_s25, %s3822_s25 }
 0x9c6   :  { %p2988_p6 = scmp.ne.s32.totalorder %s3822_s25, %s2987_s19  ;;  %p2993_p8 = scmp.lt.s32.totalorder %s2987_s19, %s2987_s19 }
 0x9c8   :  { %p2994_p9 = por %p2993_p8, %p2992_p7 }
 0x9ca   :  { %p2995_p10 = pnand %p2994_p9, %p2988_p6 }
 0x9cc   :  { %2998 = shalt.err (!%p2995_p10)
}
 0x9cd   :  { %s2999_s21 = scalar_lea.hbm %s3885_s9, 1024 }
 0x9ce   :  { %p3000_p11 = scmp.ne.s32.totalorder %s3885_s9, %s2999_s21  ;;  %p3003_p12 = scmp.lt.u32.totalorder %s2999_s21, %s3885_s9 }
 0x9d0   :  { %p3005_p13 = pnand %p3003_p12, %p3000_p11 }
 0x9d2   :  { %3008 = shalt.err (!%p3005_p13)
}
 0x9d3   :  { %2324 = dma.vmem_to_hbm [thread:$0]  %s3822_s25, 1024, %s3885_s9, [#allocation16], %s3035_s12, %s3035_s12, %s3036_s2  }
 0x9d4   :  { %3015 = dma.done.wait [#allocation8], 1024  }
 0x9d5   :  { %3016 = vsyncadd [#allocation8], 4294966272 }
 0x9d6   :  { %3017 = dma.done.wait [#allocation16], 1152  }
 0x9d7   :  { %3018 = vsyncadd [#allocation16], 4294966144 }
 0x9d8   :  { %2334 = vsyncpa [#allocation7], 1 }
 0x9d9   :  { %2335 = vsyncpa [#allocation10], 1 }
 0x9da   :  { %2336 = vsyncpa [#allocation13], 1 }
 0x9db   :  { %2337 = vsyncpa [#allocation8], 1 }
 0x9dc   :  { %2338 = vsyncpa [#allocation16], 1 }

</bundles_post_ra>
